<compile_context>
chip_gen: v7x
topology: tpu7x:2x2x1
jax: 0.10.0
libtpu: 0.0.40
codegen_flags: <defaults>
</compile_context>

<pallas_src>
import functools
import math

import jax
import jax.numpy as jnp
from jax.experimental import pallas as pl
from jax.experimental.pallas import tpu as pltpu


def _round_up(v, m):
    return (v + m - 1) // m * m


# ----------------------------- conv Pallas kernel ---------------------------


def _conv_kernel(x_ref, w_ref, b_ref, o_ref, *, offsets, lo, relu):
    """One (Cout-tile j, Cin-chunk c) grid step of a tap convolution.

    x_ref: [N, L, TC]   flattened padded activation (f32), channel chunk c
    w_ref: [T, TC, TN]  bf16 weight taps for (chunk c, Cout tile j)
    b_ref: [1, TN]      f32 bias tile
    o_ref: [N, LO, TN]  f32 output tile; resident accumulator across the c axis
    """
    c = pl.program_id(1)

    @pl.when(c == 0)
    def _init():
        o_ref[...] = jnp.zeros_like(o_ref)

    nb = x_ref.shape[0]
    for n in range(nb):
        acc = jnp.zeros((lo, o_ref.shape[-1]), jnp.float32)
        for q, off in enumerate(offsets):
            a = x_ref[n, pl.ds(off, lo), :].astype(jnp.bfloat16)
            acc = acc + jnp.dot(a, w_ref[q],
                                preferred_element_type=jnp.float32)
        o_ref[n, :, :] += acc

    @pl.when(c == pl.num_programs(1) - 1)
    def _finish():
        res = o_ref[...] + b_ref[...]
        if relu:
            res = jnp.maximum(res, 0.0)
        o_ref[...] = res


# ------------------------- conv glue (layout only) --------------------------


def _flatten_for_taps(xb, kh_sz, kw_sz, stride):
    """Flatten a padded NHWC activation so every conv tap is a row window.

    Returns (x_flat [N, L, C], tap offsets, wide-row count LO, row width,
    Ho, Wo).  For stride>1 the input is split into stride^2 parity subgrids
    (1x copy) so all taps become stride-1 row windows.
    """
    N, Hp, Wp, C = xb.shape
    s = stride
    Ho = (Hp - kh_sz) // s + 1
    Wo = (Wp - kw_sz) // s + 1
    if s == 1:
        rw = Wp
        segs = [xb.reshape(N, Hp * Wp, C)]
        tap_seg = [0] * (kh_sz * kw_sz)
        tap_off = [kh * Wp + kw for kh in range(kh_sz) for kw in range(kw_sz)]
    else:
        assert Hp % s == 0 and Wp % s == 0
        assert (Hp - kh_sz) % s == 0 and (Wp - kw_sz) % s == 0
        Hs, Ws = Hp // s, Wp // s
        rw = Ws
        segs = [xb[:, i::s, j::s, :].reshape(N, Hs * Ws, C)
                for i in range(s) for j in range(s)]
        tap_seg = [(kh % s) * s + (kw % s)
                   for kh in range(kh_sz) for kw in range(kw_sz)]
        tap_off = [(kh // s) * Ws + (kw // s)
                   for kh in range(kh_sz) for kw in range(kw_sz)]
    lo = Ho * rw
    seg_raw = segs[0].shape[1]
    seg_len = _round_up(max(seg_raw, max(tap_off) + lo), 8)
    segs = [jnp.pad(sg, ((0, 0), (0, seg_len - seg_raw), (0, 0)))
            for sg in segs]
    x_flat = segs[0] if len(segs) == 1 else jnp.concatenate(segs, axis=1)
    offsets = tuple(int(tap_seg[q]) * seg_len + int(tap_off[q])
                    for q in range(kh_sz * kw_sz))
    return x_flat, offsets, lo, rw, Ho, Wo


def _prepare_conv(w, b, stride, padding):
    """Pre-pack a PyTorch-layout Conv2d weight [Cout,Cin,KH,KW] for the kernel."""
    cout, cin, kh_sz, kw_sz = w.shape
    if cout < 128:
        tn, coutp = cout, cout
    else:
        tn = 256 if cout % 512 == 0 else 128
        coutp = _round_up(cout, tn)
    if cin < 128:
        tc, cinp = cin, cin
    else:
        cinp = _round_up(cin, 128)
        tc = 512 if cinp % 512 == 0 else (256 if cinp % 256 == 0 else 128)
    wt = jnp.transpose(w, (2, 3, 1, 0)).reshape(kh_sz * kw_sz, cin, cout)
    wt = jnp.pad(wt, ((0, 0), (0, cinp - cin), (0, coutp - cout)))
    bt = jnp.pad(b, (0, coutp - cout)).reshape(1, coutp)
    return {"w": wt.astype(jnp.bfloat16), "b": bt.astype(jnp.float32),
            "khw": (kh_sz, kw_sz), "stride": stride, "pad": padding,
            "cin": cin, "cout": cout, "tc": tc, "tn": tn}


def conv_apply(cp, x, relu=False):
    """x: [N,H,W,Cin] float -> [N,Ho,Wo,Cout] f32 (bias, optional ReLU fused)."""
    N, H, W, C = x.shape
    kh_sz, kw_sz = cp["khw"]
    stride, padding = cp["stride"], cp["pad"]
    assert C == cp["cin"]
    xb = x.astype(jnp.float32)
    if padding:
        xb = jnp.pad(xb, ((0, 0), (padding, padding), (padding, padding), (0, 0)))
    cinp = cp["w"].shape[1]
    if cinp != C:
        xb = jnp.pad(xb, ((0, 0), (0, 0), (0, 0), (0, cinp - C)))
    x_flat, offsets, lo, rw, Ho, Wo = _flatten_for_taps(xb, kh_sz, kw_sz, stride)
    L = x_flat.shape[1]
    coutp = cp["w"].shape[2]
    tn, tc = cp["tn"], cp["tc"]
    nj, nc = coutp // tn, cinp // tc

    out = pl.pallas_call(
        functools.partial(_conv_kernel, offsets=offsets, lo=lo, relu=relu),
        out_shape=jax.ShapeDtypeStruct((N, lo, coutp), jnp.float32),
        grid_spec=pltpu.PrefetchScalarGridSpec(
            num_scalar_prefetch=0,
            grid=(nj, nc),
            in_specs=[
                pl.BlockSpec((N, L, tc), lambda j, c: (0, 0, c)),
                pl.BlockSpec((kh_sz * kw_sz, tc, tn), lambda j, c: (0, c, j)),
                pl.BlockSpec((1, tn), lambda j, c: (0, j)),
            ],
            out_specs=pl.BlockSpec((N, lo, tn), lambda j, c: (0, 0, j)),
        ),
        compiler_params=pltpu.CompilerParams(
            dimension_semantics=("parallel", "arbitrary"),
            vmem_limit_bytes=32 * 1024 * 1024),
    )(x_flat, cp["w"], cp["b"])

    out = out.reshape(N, Ho, rw, coutp)[:, :, :Wo, :cp["cout"]]
    return out


# --------------------- ConvTranspose2d(4, stride 2, pad 1) ------------------


def _prepare_conv_transpose(w_t, b):
    """w_t: [Cin, Cout, 4, 4] torch ConvTranspose layout -> 4 parity sub-convs."""
    cin, cout, kh_sz, kw_sz = w_t.shape
    assert kh_sz == 4 and kw_sz == 4
    subs = []
    for ph in range(2):
        for pw in range(2):
            kh_idx = jnp.array([3 - ph, 1 - ph])
            kw_idx = jnp.array([3 - pw, 1 - pw])
            k_sub = w_t[:, :, kh_idx[:, None], kw_idx[None, :]]   # [Cin,Cout,2,2]
            k_conv = jnp.transpose(k_sub, (1, 0, 2, 3))           # [Cout,Cin,2,2]
            subs.append(_prepare_conv(k_conv, b, stride=1, padding=0))
    return subs


def conv_transpose_apply(subs, x):
    """ConvTranspose2d(k=4, stride=2, pad=1) via 4 stride-1 2x2 sub-convs."""
    N, H, W, _ = x.shape
    xp = jnp.pad(x.astype(jnp.float32), ((0, 0), (1, 1), (1, 1), (0, 0)))
    outs = []
    for idx, (ph, pw) in enumerate(((0, 0), (0, 1), (1, 0), (1, 1))):
        xs = xp[:, ph:ph + H + 1, pw:pw + W + 1, :]
        outs.append(conv_apply(subs[idx], xs, relu=False))        # [N,H,W,Cout]
    cout = outs[0].shape[-1]
    o = jnp.stack(outs, axis=0).reshape(2, 2, N, H, W, cout)
    o = o.transpose(2, 3, 0, 4, 1, 5).reshape(N, 2 * H, 2 * W, cout)
    return o


# ------------------------------ BatchNorm2d ---------------------------------


def _bn_stats_kernel(x_ref, s_ref):
    i = pl.program_id(0)

    @pl.when(i == 0)
    def _init():
        s_ref[...] = jnp.zeros_like(s_ref)

    x = x_ref[...]
    s_ref[0:1, :] += jnp.sum(x, axis=0, keepdims=True)
    s_ref[1:2, :] += jnp.sum(x * x, axis=0, keepdims=True)


def _bn_norm_kernel(x_ref, sc_ref, sh_ref, o_ref):
    o_ref[...] = (x_ref[...] * sc_ref[...] + sh_ref[...]).astype(o_ref.dtype)


def batchnorm_nhwc(x, gamma, beta, eps=1e-5):
    """Training-mode BatchNorm2d (batch statistics, biased variance), NHWC."""
    N, H, W, C = x.shape
    M = N * H * W
    xr = x.reshape(M, C).astype(jnp.float32)
    tr = min(1024, _round_up(M, 8))
    Mp = _round_up(M, tr)
    if Mp != M:
        xr = jnp.pad(xr, ((0, Mp - M), (0, 0)))

    stats = pl.pallas_call(
        _bn_stats_kernel,
        out_shape=jax.ShapeDtypeStruct((2, C), jnp.float32),
        grid_spec=pltpu.PrefetchScalarGridSpec(
            num_scalar_prefetch=0,
            grid=(Mp // tr,),
            in_specs=[pl.BlockSpec((tr, C), lambda i: (i, 0))],
            out_specs=pl.BlockSpec((2, C), lambda i: (0, 0)),
        ),
        compiler_params=pltpu.CompilerParams(
            dimension_semantics=("arbitrary",)),
    )(xr)

    mean = stats[0] / M
    var = jnp.maximum(stats[1] / M - mean * mean, 0.0)     # biased variance
    scale = gamma * jax.lax.rsqrt(var + eps)
    shift = beta - mean * scale

    y = pl.pallas_call(
        _bn_norm_kernel,
        out_shape=jax.ShapeDtypeStruct((Mp, C), jnp.float32),
        grid_spec=pltpu.PrefetchScalarGridSpec(
            num_scalar_prefetch=0,
            grid=(Mp // tr,),
            in_specs=[
                pl.BlockSpec((tr, C), lambda i: (i, 0)),
                pl.BlockSpec((1, C), lambda i: (0, 0)),
                pl.BlockSpec((1, C), lambda i: (0, 0)),
            ],
            out_specs=pl.BlockSpec((tr, C), lambda i: (i, 0)),
        ),
        compiler_params=pltpu.CompilerParams(
            dimension_semantics=("parallel",)),
    )(xr, scale.reshape(1, C), shift.reshape(1, C))
    return y[:M].reshape(N, H, W, C)


# ------------------------------ model forward -------------------------------


def block_forward(p, x, up):
    h = conv_apply(p["conv1"], x, relu=True)
    h = batchnorm_nhwc(h, p["bn1_g"], p["bn1_b"])
    h = conv_apply(p["conv2"], h, relu=True)
    h = batchnorm_nhwc(h, p["bn2_g"], p["bn2_b"])
    if up:
        return conv_transpose_apply(p["trans"], h)
    return conv_apply(p["trans"], h, relu=False)


def simple_unet_forward(params, x_nchw, timestep=None):
    # timestep is unused, matching the PyTorch forward.
    x = jnp.transpose(x_nchw, (0, 2, 3, 1))            # NCHW -> NHWC once
    x = conv_apply(params["conv0"], x, relu=False)
    residuals = []
    for p in params["downs"]:
        x = block_forward(p, x, up=False)
        residuals.append(x)
    for p in params["ups"]:
        r = residuals.pop()
        x = jnp.concatenate([x, r], axis=-1)            # torch.cat((x, res), 1)
        x = block_forward(p, x, up=True)
    x = conv_apply(params["out"], x, relu=False)
    return jnp.transpose(x, (0, 3, 1, 2))               # NHWC -> NCHW


# ------------------------------ parameter init ------------------------------


def init_params(key, image_channels):
    down_channels = (64, 128, 256, 512, 1024)
    up_channels = (1024, 512, 256, 128, 64)
    keys = iter(jax.random.split(key, 64))

    def conv_w(cin, cout, k):
        fan_in = cin * k * k
        w = jax.random.normal(next(keys), (cout, cin, k, k),
                              jnp.float32) / math.sqrt(fan_in)
        return w, jnp.zeros((cout,), jnp.float32)

    def convt_w(cin, cout, k):
        fan_in = cin * k * k
        w = jax.random.normal(next(keys), (cin, cout, k, k),
                              jnp.float32) / math.sqrt(fan_in)
        return w, jnp.zeros((cout,), jnp.float32)

    def block(in_ch, out_ch, up):
        p = {}
        c1_in = 2 * in_ch if up else in_ch
        w, b = conv_w(c1_in, out_ch, 3)
        p["conv1"] = _prepare_conv(w, b, stride=1, padding=1)
        w, b = conv_w(out_ch, out_ch, 3)
        p["conv2"] = _prepare_conv(w, b, stride=1, padding=1)
        if up:
            w, b = convt_w(out_ch, out_ch, 4)
            p["trans"] = _prepare_conv_transpose(w, b)
        else:
            w, b = conv_w(out_ch, out_ch, 4)
            p["trans"] = _prepare_conv(w, b, stride=2, padding=1)
        for i in (1, 2):
            p[f"bn{i}_g"] = jnp.ones((out_ch,), jnp.float32)
            p[f"bn{i}_b"] = jnp.zeros((out_ch,), jnp.float32)
        return p

    params = {}
    w, b = conv_w(image_channels, down_channels[0], 3)
    params["conv0"] = _prepare_conv(w, b, stride=1, padding=1)
    params["downs"] = [block(down_channels[i], down_channels[i + 1], up=False)
                       for i in range(len(down_channels) - 1)]
    params["ups"] = [block(up_channels[i], up_channels[i + 1], up=True)
                     for i in range(len(up_channels) - 1)]
    w, b = conv_w(up_channels[-1], image_channels, 1)
    params["out"] = _prepare_conv(w, b, stride=1, padding=0)
    return params


# ----------------------------------- main -----------------------------------

if __name__ == "__main__":
    image_channels = 4
    key = jax.random.PRNGKey(0)
    pkey, xkey = jax.random.split(key)
    params = init_params(pkey, image_channels)
    x = jax.random.normal(xkey, (2, image_channels, 16, 16), jnp.float32)

    out = simple_unet_forward(params, x)
    out = jax.block_until_ready(out)
    assert out.shape == (2, image_channels, 16, 16), out.shape
    assert out.dtype == jnp.float32
    assert bool(jnp.all(jnp.isfinite(out)))
    print("KERNEL_OK")
</pallas_src>

<mosaic_0001>
module attributes {stable_mosaic.version = 11 : i64} {
  func.func @_conv_kernel(%arg0: i32, %arg1: i32, %arg2: memref<2x328x4xf32, #tpu.memory_space<vmem>>, %arg3: memref<9x4x64xbf16, #tpu.memory_space<vmem>>, %arg4: memref<1x64xf32, #tpu.memory_space<vmem>>, %arg5: memref<2x288x64xf32, #tpu.memory_space<vmem>>) attributes {dimension_semantics = [#tpu.dimension_semantics<parallel>, #tpu.dimension_semantics<arbitrary>], iteration_bounds = array<i64: 1, 1>, scalar_prefetch = 0 : i64, scratch_operands = 0 : i64, tpu.core_type = #tpu.core_type<tc>, window_params = [{transform_indices = @transform_0, window_bounds = array<i64: 2, 328, 4>}, {transform_indices = @transform_1, window_bounds = array<i64: 9, 4, 64>}, {transform_indices = @transform_2, window_bounds = array<i64: 1, 64>}, {transform_indices = @transform_3, window_bounds = array<i64: 2, 288, 64>}]} {
    %c0_i32 = arith.constant 0 : i32
    %0 = arith.cmpi eq, %arg1, %c0_i32 : i32
    %1 = arith.extui %0 : i1 to i32
    %c0_i32_0 = arith.constant 0 : i32
    %2 = arith.cmpi ne, %1, %c0_i32_0 : i32
    scf.if %2 {
      %cst_127 = arith.constant 0.000000e+00 : f32
      %146 = vector.broadcast %cst_127 : f32 to vector<2x288x64xf32>
      %c0_128 = arith.constant 0 : index
      %c0_129 = arith.constant 0 : index
      %c0_130 = arith.constant 0 : index
      %147 = vector.load %arg5[%c0_128, %c0_129, %c0_130] : memref<2x288x64xf32, #tpu.memory_space<vmem>>, vector<2x288x64xf32>
      tpu.vector_store %arg5[%c0_128, %c0_129, %c0_130], %146 {strides = array<i32>} : memref<2x288x64xf32, #tpu.memory_space<vmem>>, vector<2x288x64xf32>,
    } else {
    }
    %cst = arith.constant 0.000000e+00 : f32
    %3 = vector.broadcast %cst : f32 to vector<288x64xf32>
    %c0 = arith.constant 0 : index
    %c0_1 = arith.constant 0 : index
    %c0_2 = arith.constant 0 : index
    %4 = vector.load %arg2[%c0, %c0_1, %c0_2] : memref<2x328x4xf32, #tpu.memory_space<vmem>>, vector<1x288x4xf32>
    %5 = vector.shape_cast %4 : vector<1x288x4xf32> to vector<288x4xf32>
    %6 = arith.truncf %5 : vector<288x4xf32> to vector<288x4xbf16>
    %c0_3 = arith.constant 0 : index
    %c0_4 = arith.constant 0 : index
    %c0_5 = arith.constant 0 : index
    %7 = vector.load %arg3[%c0_3, %c0_4, %c0_5] : memref<9x4x64xbf16, #tpu.memory_space<vmem>>, vector<1x4x64xbf16>
    %8 = vector.shape_cast %7 : vector<1x4x64xbf16> to vector<4x64xbf16>
    %cst_6 = arith.constant dense<0.000000e+00> : vector<288x64xf32>
    %9 = tpu.matmul %6, %8, %cst_6 {dimension_numbers = #tpu.dot_dimension_numbers<[1], [0], [0], [1], [0, 0, 1, 1], [], []>} : vector<288x4xbf16>, vector<4x64xbf16>, vector<288x64xf32> -> vector<288x64xf32>
    %10 = arith.addf %3, %9 : vector<288x64xf32>
    %c0_7 = arith.constant 0 : index
    %c1 = arith.constant 1 : index
    %c0_8 = arith.constant 0 : index
    %11 = vector.load %arg2[%c0_7, %c1, %c0_8] : memref<2x328x4xf32, #tpu.memory_space<vmem>>, vector<1x288x4xf32>
    %12 = vector.shape_cast %11 : vector<1x288x4xf32> to vector<288x4xf32>
    %13 = arith.truncf %12 : vector<288x4xf32> to vector<288x4xbf16>
    %c1_9 = arith.constant 1 : index
    %c0_10 = arith.constant 0 : index
    %c0_11 = arith.constant 0 : index
    %14 = vector.load %arg3[%c1_9, %c0_10, %c0_11] : memref<9x4x64xbf16, #tpu.memory_space<vmem>>, vector<1x4x64xbf16>
    %15 = vector.shape_cast %14 : vector<1x4x64xbf16> to vector<4x64xbf16>
    %cst_12 = arith.constant dense<0.000000e+00> : vector<288x64xf32>
    %16 = tpu.matmul %13, %15, %cst_12 {dimension_numbers = #tpu.dot_dimension_numbers<[1], [0], [0], [1], [0, 0, 1, 1], [], []>} : vector<288x4xbf16>, vector<4x64xbf16>, vector<288x64xf32> -> vector<288x64xf32>
    %17 = arith.addf %10, %16 : vector<288x64xf32>
    %c0_13 = arith.constant 0 : index
    %c2 = arith.constant 2 : index
    %c0_14 = arith.constant 0 : index
    %18 = vector.load %arg2[%c0_13, %c2, %c0_14] : memref<2x328x4xf32, #tpu.memory_space<vmem>>, vector<1x288x4xf32>
    %19 = vector.shape_cast %18 : vector<1x288x4xf32> to vector<288x4xf32>
    %20 = arith.truncf %19 : vector<288x4xf32> to vector<288x4xbf16>
    %c2_15 = arith.constant 2 : index
    %c0_16 = arith.constant 0 : index
    %c0_17 = arith.constant 0 : index
    %21 = vector.load %arg3[%c2_15, %c0_16, %c0_17] : memref<9x4x64xbf16, #tpu.memory_space<vmem>>, vector<1x4x64xbf16>
    %22 = vector.shape_cast %21 : vector<1x4x64xbf16> to vector<4x64xbf16>
    %cst_18 = arith.constant dense<0.000000e+00> : vector<288x64xf32>
    %23 = tpu.matmul %20, %22, %cst_18 {dimension_numbers = #tpu.dot_dimension_numbers<[1], [0], [0], [1], [0, 0, 1, 1], [], []>} : vector<288x4xbf16>, vector<4x64xbf16>, vector<288x64xf32> -> vector<288x64xf32>
    %24 = arith.addf %17, %23 : vector<288x64xf32>
    %c0_19 = arith.constant 0 : index
    %c18 = arith.constant 18 : index
    %c0_20 = arith.constant 0 : index
    %25 = vector.load %arg2[%c0_19, %c18, %c0_20] : memref<2x328x4xf32, #tpu.memory_space<vmem>>, vector<1x288x4xf32>
    %26 = vector.shape_cast %25 : vector<1x288x4xf32> to vector<288x4xf32>
    %27 = arith.truncf %26 : vector<288x4xf32> to vector<288x4xbf16>
    %c3 = arith.constant 3 : index
    %c0_21 = arith.constant 0 : index
    %c0_22 = arith.constant 0 : index
    %28 = vector.load %arg3[%c3, %c0_21, %c0_22] : memref<9x4x64xbf16, #tpu.memory_space<vmem>>, vector<1x4x64xbf16>
    %29 = vector.shape_cast %28 : vector<1x4x64xbf16> to vector<4x64xbf16>
    %cst_23 = arith.constant dense<0.000000e+00> : vector<288x64xf32>
    %30 = tpu.matmul %27, %29, %cst_23 {dimension_numbers = #tpu.dot_dimension_numbers<[1], [0], [0], [1], [0, 0, 1, 1], [], []>} : vector<288x4xbf16>, vector<4x64xbf16>, vector<288x64xf32> -> vector<288x64xf32>
    %31 = arith.addf %24, %30 : vector<288x64xf32>
    %c0_24 = arith.constant 0 : index
    %c19 = arith.constant 19 : index
    %c0_25 = arith.constant 0 : index
    %32 = vector.load %arg2[%c0_24, %c19, %c0_25] : memref<2x328x4xf32, #tpu.memory_space<vmem>>, vector<1x288x4xf32>
    %33 = vector.shape_cast %32 : vector<1x288x4xf32> to vector<288x4xf32>
    %34 = arith.truncf %33 : vector<288x4xf32> to vector<288x4xbf16>
    %c4 = arith.constant 4 : index
    %c0_26 = arith.constant 0 : index
    %c0_27 = arith.constant 0 : index
    %35 = vector.load %arg3[%c4, %c0_26, %c0_27] : memref<9x4x64xbf16, #tpu.memory_space<vmem>>, vector<1x4x64xbf16>
    %36 = vector.shape_cast %35 : vector<1x4x64xbf16> to vector<4x64xbf16>
    %cst_28 = arith.constant dense<0.000000e+00> : vector<288x64xf32>
    %37 = tpu.matmul %34, %36, %cst_28 {dimension_numbers = #tpu.dot_dimension_numbers<[1], [0], [0], [1], [0, 0, 1, 1], [], []>} : vector<288x4xbf16>, vector<4x64xbf16>, vector<288x64xf32> -> vector<288x64xf32>
    %38 = arith.addf %31, %37 : vector<288x64xf32>
    %c0_29 = arith.constant 0 : index
    %c20 = arith.constant 20 : index
    %c0_30 = arith.constant 0 : index
    %39 = vector.load %arg2[%c0_29, %c20, %c0_30] : memref<2x328x4xf32, #tpu.memory_space<vmem>>, vector<1x288x4xf32>
    %40 = vector.shape_cast %39 : vector<1x288x4xf32> to vector<288x4xf32>
    %41 = arith.truncf %40 : vector<288x4xf32> to vector<288x4xbf16>
    %c5 = arith.constant 5 : index
    %c0_31 = arith.constant 0 : index
    %c0_32 = arith.constant 0 : index
    %42 = vector.load %arg3[%c5, %c0_31, %c0_32] : memref<9x4x64xbf16, #tpu.memory_space<vmem>>, vector<1x4x64xbf16>
    %43 = vector.shape_cast %42 : vector<1x4x64xbf16> to vector<4x64xbf16>
    %cst_33 = arith.constant dense<0.000000e+00> : vector<288x64xf32>
    %44 = tpu.matmul %41, %43, %cst_33 {dimension_numbers = #tpu.dot_dimension_numbers<[1], [0], [0], [1], [0, 0, 1, 1], [], []>} : vector<288x4xbf16>, vector<4x64xbf16>, vector<288x64xf32> -> vector<288x64xf32>
    %45 = arith.addf %38, %44 : vector<288x64xf32>
    %c0_34 = arith.constant 0 : index
    %c36 = arith.constant 36 : index
    %c0_35 = arith.constant 0 : index
    %46 = vector.load %arg2[%c0_34, %c36, %c0_35] : memref<2x328x4xf32, #tpu.memory_space<vmem>>, vector<1x288x4xf32>
    %47 = vector.shape_cast %46 : vector<1x288x4xf32> to vector<288x4xf32>
    %48 = arith.truncf %47 : vector<288x4xf32> to vector<288x4xbf16>
    %c6 = arith.constant 6 : index
    %c0_36 = arith.constant 0 : index
    %c0_37 = arith.constant 0 : index
    %49 = vector.load %arg3[%c6, %c0_36, %c0_37] : memref<9x4x64xbf16, #tpu.memory_space<vmem>>, vector<1x4x64xbf16>
    %50 = vector.shape_cast %49 : vector<1x4x64xbf16> to vector<4x64xbf16>
    %cst_38 = arith.constant dense<0.000000e+00> : vector<288x64xf32>
    %51 = tpu.matmul %48, %50, %cst_38 {dimension_numbers = #tpu.dot_dimension_numbers<[1], [0], [0], [1], [0, 0, 1, 1], [], []>} : vector<288x4xbf16>, vector<4x64xbf16>, vector<288x64xf32> -> vector<288x64xf32>
    %52 = arith.addf %45, %51 : vector<288x64xf32>
    %c0_39 = arith.constant 0 : index
    %c37 = arith.constant 37 : index
    %c0_40 = arith.constant 0 : index
    %53 = vector.load %arg2[%c0_39, %c37, %c0_40] : memref<2x328x4xf32, #tpu.memory_space<vmem>>, vector<1x288x4xf32>
    %54 = vector.shape_cast %53 : vector<1x288x4xf32> to vector<288x4xf32>
    %55 = arith.truncf %54 : vector<288x4xf32> to vector<288x4xbf16>
    %c7 = arith.constant 7 : index
    %c0_41 = arith.constant 0 : index
    %c0_42 = arith.constant 0 : index
    %56 = vector.load %arg3[%c7, %c0_41, %c0_42] : memref<9x4x64xbf16, #tpu.memory_space<vmem>>, vector<1x4x64xbf16>
    %57 = vector.shape_cast %56 : vector<1x4x64xbf16> to vector<4x64xbf16>
    %cst_43 = arith.constant dense<0.000000e+00> : vector<288x64xf32>
    %58 = tpu.matmul %55, %57, %cst_43 {dimension_numbers = #tpu.dot_dimension_numbers<[1], [0], [0], [1], [0, 0, 1, 1], [], []>} : vector<288x4xbf16>, vector<4x64xbf16>, vector<288x64xf32> -> vector<288x64xf32>
    %59 = arith.addf %52, %58 : vector<288x64xf32>
    %c0_44 = arith.constant 0 : index
    %c38 = arith.constant 38 : index
    %c0_45 = arith.constant 0 : index
    %60 = vector.load %arg2[%c0_44, %c38, %c0_45] : memref<2x328x4xf32, #tpu.memory_space<vmem>>, vector<1x288x4xf32>
    %61 = vector.shape_cast %60 : vector<1x288x4xf32> to vector<288x4xf32>
    %62 = arith.truncf %61 : vector<288x4xf32> to vector<288x4xbf16>
    %c8 = arith.constant 8 : index
    %c0_46 = arith.constant 0 : index
    %c0_47 = arith.constant 0 : index
    %63 = vector.load %arg3[%c8, %c0_46, %c0_47] : memref<9x4x64xbf16, #tpu.memory_space<vmem>>, vector<1x4x64xbf16>
    %64 = vector.shape_cast %63 : vector<1x4x64xbf16> to vector<4x64xbf16>
    %cst_48 = arith.constant dense<0.000000e+00> : vector<288x64xf32>
    %65 = tpu.matmul %62, %64, %cst_48 {dimension_numbers = #tpu.dot_dimension_numbers<[1], [0], [0], [1], [0, 0, 1, 1], [], []>} : vector<288x4xbf16>, vector<4x64xbf16>, vector<288x64xf32> -> vector<288x64xf32>
    %66 = arith.addf %59, %65 : vector<288x64xf32>
    %c0_49 = arith.constant 0 : index
    %c0_50 = arith.constant 0 : index
    %c0_51 = arith.constant 0 : index
    %67 = vector.load %arg5[%c0_49, %c0_50, %c0_51] : memref<2x288x64xf32, #tpu.memory_space<vmem>>, vector<1x288x64xf32>
    %68 = vector.shape_cast %67 : vector<1x288x64xf32> to vector<288x64xf32>
    %69 = arith.addf %68, %66 : vector<288x64xf32>
    %c0_52 = arith.constant 0 : index
    %c0_53 = arith.constant 0 : index
    %c0_54 = arith.constant 0 : index
    %70 = vector.load %arg5[%c0_52, %c0_53, %c0_54] : memref<2x288x64xf32, #tpu.memory_space<vmem>>, vector<1x288x64xf32>
    %71 = vector.shape_cast %70 : vector<1x288x64xf32> to vector<288x64xf32>
    %72 = vector.shape_cast %69 : vector<288x64xf32> to vector<1x288x64xf32>
    tpu.vector_store %arg5[%c0_52, %c0_53, %c0_54], %72 {strides = array<i32>} : memref<2x288x64xf32, #tpu.memory_space<vmem>>, vector<1x288x64xf32>,
    %cst_55 = arith.constant 0.000000e+00 : f32
    %73 = vector.broadcast %cst_55 : f32 to vector<288x64xf32>
    %c1_56 = arith.constant 1 : index
    %c0_57 = arith.constant 0 : index
    %c0_58 = arith.constant 0 : index
    %74 = vector.load %arg2[%c1_56, %c0_57, %c0_58] : memref<2x328x4xf32, #tpu.memory_space<vmem>>, vector<1x288x4xf32>
    %75 = vector.shape_cast %74 : vector<1x288x4xf32> to vector<288x4xf32>
    %76 = arith.truncf %75 : vector<288x4xf32> to vector<288x4xbf16>
    %c0_59 = arith.constant 0 : index
    %c0_60 = arith.constant 0 : index
    %c0_61 = arith.constant 0 : index
    %77 = vector.load %arg3[%c0_59, %c0_60, %c0_61] : memref<9x4x64xbf16, #tpu.memory_space<vmem>>, vector<1x4x64xbf16>
    %78 = vector.shape_cast %77 : vector<1x4x64xbf16> to vector<4x64xbf16>
    %cst_62 = arith.constant dense<0.000000e+00> : vector<288x64xf32>
    %79 = tpu.matmul %76, %78, %cst_62 {dimension_numbers = #tpu.dot_dimension_numbers<[1], [0], [0], [1], [0, 0, 1, 1], [], []>} : vector<288x4xbf16>, vector<4x64xbf16>, vector<288x64xf32> -> vector<288x64xf32>
    %80 = arith.addf %73, %79 : vector<288x64xf32>
    %c1_63 = arith.constant 1 : index
    %c1_64 = arith.constant 1 : index
    %c0_65 = arith.constant 0 : index
    %81 = vector.load %arg2[%c1_63, %c1_64, %c0_65] : memref<2x328x4xf32, #tpu.memory_space<vmem>>, vector<1x288x4xf32>
    %82 = vector.shape_cast %81 : vector<1x288x4xf32> to vector<288x4xf32>
    %83 = arith.truncf %82 : vector<288x4xf32> to vector<288x4xbf16>
    %c1_66 = arith.constant 1 : index
    %c0_67 = arith.constant 0 : index
    %c0_68 = arith.constant 0 : index
    %84 = vector.load %arg3[%c1_66, %c0_67, %c0_68] : memref<9x4x64xbf16, #tpu.memory_space<vmem>>, vector<1x4x64xbf16>
    %85 = vector.shape_cast %84 : vector<1x4x64xbf16> to vector<4x64xbf16>
    %cst_69 = arith.constant dense<0.000000e+00> : vector<288x64xf32>
    %86 = tpu.matmul %83, %85, %cst_69 {dimension_numbers = #tpu.dot_dimension_numbers<[1], [0], [0], [1], [0, 0, 1, 1], [], []>} : vector<288x4xbf16>, vector<4x64xbf16>, vector<288x64xf32> -> vector<288x64xf32>
    %87 = arith.addf %80, %86 : vector<288x64xf32>
    %c1_70 = arith.constant 1 : index
    %c2_71 = arith.constant 2 : index
    %c0_72 = arith.constant 0 : index
    %88 = vector.load %arg2[%c1_70, %c2_71, %c0_72] : memref<2x328x4xf32, #tpu.memory_space<vmem>>, vector<1x288x4xf32>
    %89 = vector.shape_cast %88 : vector<1x288x4xf32> to vector<288x4xf32>
    %90 = arith.truncf %89 : vector<288x4xf32> to vector<288x4xbf16>
    %c2_73 = arith.constant 2 : index
    %c0_74 = arith.constant 0 : index
    %c0_75 = arith.constant 0 : index
    %91 = vector.load %arg3[%c2_73, %c0_74, %c0_75] : memref<9x4x64xbf16, #tpu.memory_space<vmem>>, vector<1x4x64xbf16>
    %92 = vector.shape_cast %91 : vector<1x4x64xbf16> to vector<4x64xbf16>
    %cst_76 = arith.constant dense<0.000000e+00> : vector<288x64xf32>
    %93 = tpu.matmul %90, %92, %cst_76 {dimension_numbers = #tpu.dot_dimension_numbers<[1], [0], [0], [1], [0, 0, 1, 1], [], []>} : vector<288x4xbf16>, vector<4x64xbf16>, vector<288x64xf32> -> vector<288x64xf32>
    %94 = arith.addf %87, %93 : vector<288x64xf32>
    %c1_77 = arith.constant 1 : index
    %c18_78 = arith.constant 18 : index
    %c0_79 = arith.constant 0 : index
    %95 = vector.load %arg2[%c1_77, %c18_78, %c0_79] : memref<2x328x4xf32, #tpu.memory_space<vmem>>, vector<1x288x4xf32>
    %96 = vector.shape_cast %95 : vector<1x288x4xf32> to vector<288x4xf32>
    %97 = arith.truncf %96 : vector<288x4xf32> to vector<288x4xbf16>
    %c3_80 = arith.constant 3 : index
    %c0_81 = arith.constant 0 : index
    %c0_82 = arith.constant 0 : index
    %98 = vector.load %arg3[%c3_80, %c0_81, %c0_82] : memref<9x4x64xbf16, #tpu.memory_space<vmem>>, vector<1x4x64xbf16>
    %99 = vector.shape_cast %98 : vector<1x4x64xbf16> to vector<4x64xbf16>
    %cst_83 = arith.constant dense<0.000000e+00> : vector<288x64xf32>
    %100 = tpu.matmul %97, %99, %cst_83 {dimension_numbers = #tpu.dot_dimension_numbers<[1], [0], [0], [1], [0, 0, 1, 1], [], []>} : vector<288x4xbf16>, vector<4x64xbf16>, vector<288x64xf32> -> vector<288x64xf32>
    %101 = arith.addf %94, %100 : vector<288x64xf32>
    %c1_84 = arith.constant 1 : index
    %c19_85 = arith.constant 19 : index
    %c0_86 = arith.constant 0 : index
    %102 = vector.load %arg2[%c1_84, %c19_85, %c0_86] : memref<2x328x4xf32, #tpu.memory_space<vmem>>, vector<1x288x4xf32>
    %103 = vector.shape_cast %102 : vector<1x288x4xf32> to vector<288x4xf32>
    %104 = arith.truncf %103 : vector<288x4xf32> to vector<288x4xbf16>
    %c4_87 = arith.constant 4 : index
    %c0_88 = arith.constant 0 : index
    %c0_89 = arith.constant 0 : index
    %105 = vector.load %arg3[%c4_87, %c0_88, %c0_89] : memref<9x4x64xbf16, #tpu.memory_space<vmem>>, vector<1x4x64xbf16>
    %106 = vector.shape_cast %105 : vector<1x4x64xbf16> to vector<4x64xbf16>
    %cst_90 = arith.constant dense<0.000000e+00> : vector<288x64xf32>
    %107 = tpu.matmul %104, %106, %cst_90 {dimension_numbers = #tpu.dot_dimension_numbers<[1], [0], [0], [1], [0, 0, 1, 1], [], []>} : vector<288x4xbf16>, vector<4x64xbf16>, vector<288x64xf32> -> vector<288x64xf32>
    %108 = arith.addf %101, %107 : vector<288x64xf32>
    %c1_91 = arith.constant 1 : index
    %c20_92 = arith.constant 20 : index
    %c0_93 = arith.constant 0 : index
    %109 = vector.load %arg2[%c1_91, %c20_92, %c0_93] : memref<2x328x4xf32, #tpu.memory_space<vmem>>, vector<1x288x4xf32>
    %110 = vector.shape_cast %109 : vector<1x288x4xf32> to vector<288x4xf32>
    %111 = arith.truncf %110 : vector<288x4xf32> to vector<288x4xbf16>
    %c5_94 = arith.constant 5 : index
    %c0_95 = arith.constant 0 : index
    %c0_96 = arith.constant 0 : index
    %112 = vector.load %arg3[%c5_94, %c0_95, %c0_96] : memref<9x4x64xbf16, #tpu.memory_space<vmem>>, vector<1x4x64xbf16>
    %113 = vector.shape_cast %112 : vector<1x4x64xbf16> to vector<4x64xbf16>
    %cst_97 = arith.constant dense<0.000000e+00> : vector<288x64xf32>
    %114 = tpu.matmul %111, %113, %cst_97 {dimension_numbers = #tpu.dot_dimension_numbers<[1], [0], [0], [1], [0, 0, 1, 1], [], []>} : vector<288x4xbf16>, vector<4x64xbf16>, vector<288x64xf32> -> vector<288x64xf32>
    %115 = arith.addf %108, %114 : vector<288x64xf32>
    %c1_98 = arith.constant 1 : index
    %c36_99 = arith.constant 36 : index
    %c0_100 = arith.constant 0 : index
    %116 = vector.load %arg2[%c1_98, %c36_99, %c0_100] : memref<2x328x4xf32, #tpu.memory_space<vmem>>, vector<1x288x4xf32>
    %117 = vector.shape_cast %116 : vector<1x288x4xf32> to vector<288x4xf32>
    %118 = arith.truncf %117 : vector<288x4xf32> to vector<288x4xbf16>
    %c6_101 = arith.constant 6 : index
    %c0_102 = arith.constant 0 : index
    %c0_103 = arith.constant 0 : index
    %119 = vector.load %arg3[%c6_101, %c0_102, %c0_103] : memref<9x4x64xbf16, #tpu.memory_space<vmem>>, vector<1x4x64xbf16>
    %120 = vector.shape_cast %119 : vector<1x4x64xbf16> to vector<4x64xbf16>
    %cst_104 = arith.constant dense<0.000000e+00> : vector<288x64xf32>
    %121 = tpu.matmul %118, %120, %cst_104 {dimension_numbers = #tpu.dot_dimension_numbers<[1], [0], [0], [1], [0, 0, 1, 1], [], []>} : vector<288x4xbf16>, vector<4x64xbf16>, vector<288x64xf32> -> vector<288x64xf32>
    %122 = arith.addf %115, %121 : vector<288x64xf32>
    %c1_105 = arith.constant 1 : index
    %c37_106 = arith.constant 37 : index
    %c0_107 = arith.constant 0 : index
    %123 = vector.load %arg2[%c1_105, %c37_106, %c0_107] : memref<2x328x4xf32, #tpu.memory_space<vmem>>, vector<1x288x4xf32>
    %124 = vector.shape_cast %123 : vector<1x288x4xf32> to vector<288x4xf32>
    %125 = arith.truncf %124 : vector<288x4xf32> to vector<288x4xbf16>
    %c7_108 = arith.constant 7 : index
    %c0_109 = arith.constant 0 : index
    %c0_110 = arith.constant 0 : index
    %126 = vector.load %arg3[%c7_108, %c0_109, %c0_110] : memref<9x4x64xbf16, #tpu.memory_space<vmem>>, vector<1x4x64xbf16>
    %127 = vector.shape_cast %126 : vector<1x4x64xbf16> to vector<4x64xbf16>
    %cst_111 = arith.constant dense<0.000000e+00> : vector<288x64xf32>
    %128 = tpu.matmul %125, %127, %cst_111 {dimension_numbers = #tpu.dot_dimension_numbers<[1], [0], [0], [1], [0, 0, 1, 1], [], []>} : vector<288x4xbf16>, vector<4x64xbf16>, vector<288x64xf32> -> vector<288x64xf32>
    %129 = arith.addf %122, %128 : vector<288x64xf32>
    %c1_112 = arith.constant 1 : index
    %c38_113 = arith.constant 38 : index
    %c0_114 = arith.constant 0 : index
    %130 = vector.load %arg2[%c1_112, %c38_113, %c0_114] : memref<2x328x4xf32, #tpu.memory_space<vmem>>, vector<1x288x4xf32>
    %131 = vector.shape_cast %130 : vector<1x288x4xf32> to vector<288x4xf32>
    %132 = arith.truncf %131 : vector<288x4xf32> to vector<288x4xbf16>
    %c8_115 = arith.constant 8 : index
    %c0_116 = arith.constant 0 : index
    %c0_117 = arith.constant 0 : index
    %133 = vector.load %arg3[%c8_115, %c0_116, %c0_117] : memref<9x4x64xbf16, #tpu.memory_space<vmem>>, vector<1x4x64xbf16>
    %134 = vector.shape_cast %133 : vector<1x4x64xbf16> to vector<4x64xbf16>
    %cst_118 = arith.constant dense<0.000000e+00> : vector<288x64xf32>
    %135 = tpu.matmul %132, %134, %cst_118 {dimension_numbers = #tpu.dot_dimension_numbers<[1], [0], [0], [1], [0, 0, 1, 1], [], []>} : vector<288x4xbf16>, vector<4x64xbf16>, vector<288x64xf32> -> vector<288x64xf32>
    %136 = arith.addf %129, %135 : vector<288x64xf32>
    %c1_119 = arith.constant 1 : index
    %c0_120 = arith.constant 0 : index
    %c0_121 = arith.constant 0 : index
    %137 = vector.load %arg5[%c1_119, %c0_120, %c0_121] : memref<2x288x64xf32, #tpu.memory_space<vmem>>, vector<1x288x64xf32>
    %138 = vector.shape_cast %137 : vector<1x288x64xf32> to vector<288x64xf32>
    %139 = arith.addf %138, %136 : vector<288x64xf32>
    %c1_122 = arith.constant 1 : index
    %c0_123 = arith.constant 0 : index
    %c0_124 = arith.constant 0 : index
    %140 = vector.load %arg5[%c1_122, %c0_123, %c0_124] : memref<2x288x64xf32, #tpu.memory_space<vmem>>, vector<1x288x64xf32>
    %141 = vector.shape_cast %140 : vector<1x288x64xf32> to vector<288x64xf32>
    %142 = vector.shape_cast %139 : vector<288x64xf32> to vector<1x288x64xf32>
    tpu.vector_store %arg5[%c1_122, %c0_123, %c0_124], %142 {strides = array<i32>} : memref<2x288x64xf32, #tpu.memory_space<vmem>>, vector<1x288x64xf32>,
    %c0_i32_125 = arith.constant 0 : i32
    %143 = arith.cmpi eq, %arg1, %c0_i32_125 : i32
    %144 = arith.extui %143 : i1 to i32
    %c0_i32_126 = arith.constant 0 : i32
    %145 = arith.cmpi ne, %144, %c0_i32_126 : i32
    scf.if %145 {
      %c0_127 = arith.constant 0 : index
      %c0_128 = arith.constant 0 : index
      %c0_129 = arith.constant 0 : index
      %146 = vector.load %arg5[%c0_127, %c0_128, %c0_129] : memref<2x288x64xf32, #tpu.memory_space<vmem>>, vector<2x288x64xf32>
      %c0_130 = arith.constant 0 : index
      %c0_131 = arith.constant 0 : index
      %147 = vector.load %arg4[%c0_130, %c0_131] : memref<1x64xf32, #tpu.memory_space<vmem>>, vector<1x64xf32>
      %148 = vector.shape_cast %147 : vector<1x64xf32> to vector<1x1x64xf32>
      %149 = vector.broadcast %148 : vector<1x1x64xf32> to vector<2x288x64xf32>
      %150 = arith.addf %146, %149 : vector<2x288x64xf32>
      %c0_132 = arith.constant 0 : index
      %c0_133 = arith.constant 0 : index
      %c0_134 = arith.constant 0 : index
      %151 = vector.load %arg5[%c0_132, %c0_133, %c0_134] : memref<2x288x64xf32, #tpu.memory_space<vmem>>, vector<2x288x64xf32>
      tpu.vector_store %arg5[%c0_132, %c0_133, %c0_134], %150 {strides = array<i32>} : memref<2x288x64xf32, #tpu.memory_space<vmem>>, vector<2x288x64xf32>,
    } else {
    }
    return
  }
  func.func @transform_0(%arg0: i32, %arg1: i32) -> (i32, i32, i32) {
    %c0_i32 = arith.constant 0 : i32
    %c0_i32_0 = arith.constant 0 : i32
    %c0_i32_1 = arith.constant 0 : i32
    return %c0_i32, %c0_i32_0, %arg1 : i32, i32, i32
  }
  func.func @transform_1(%arg0: i32, %arg1: i32) -> (i32, i32, i32) {
    %c0_i32 = arith.constant 0 : i32
    %c0_i32_0 = arith.constant 0 : i32
    return %c0_i32, %arg1, %arg0 : i32, i32, i32
  }
  func.func @transform_2(%arg0: i32, %arg1: i32) -> (i32, i32) {
    %c0_i32 = arith.constant 0 : i32
    %c0_i32_0 = arith.constant 0 : i32
    return %c0_i32, %arg0 : i32, i32
  }
  func.func @transform_3(%arg0: i32, %arg1: i32) -> (i32, i32, i32) {
    %c0_i32 = arith.constant 0 : i32
    %c0_i32_0 = arith.constant 0 : i32
    %c0_i32_1 = arith.constant 0 : i32
    return %c0_i32, %c0_i32_0, %arg0 : i32, i32, i32
  }
}

</mosaic_0001>

<bundles_post_ra>
// kernel: tpu_custom_call.1
= control target key start
LH: loop header
LB: loop body
LE: loop exit
PB: predicated region body
PF: predicated region fallthrough
CT: control target
= control target key end

     0   :  { %vm258_vm0 = vcmask 1041408   ;;  %vm203_vm1 = vcmask 31744   ;;  %vm19_vm2 = vcmask 523264   ;;  %s12321_s1 = inlined_call_operand.vmem [shape: bf16[9,4,64], index: 1, kind: input, shape index: {}]   ;;  %s12322_s0 = inlined_call_operand.vmem [shape: f32[2,328,4], index: 0, kind: input, shape index: {}]   ;;  %s12323_s3 = inlined_call_operand.vmem [shape: f32[2,288,64], index: 3, kind: output, shape index: {}]   ;;  %s12324_s2 = inlined_call_operand.vmem [shape: f32[1,64], index: 2, kind: input, shape index: {}]  }
   0x1   :  { %v6257_v0 = vld [vmem:[%s12321_s1 + $0x2] sm:$0x3]  ;;  %v148_v5 = vld [vmem:[%s12322_s0 + $0x9] sm:$0xff]  ;;  %v6464_v7 = vld [vmem:[%s12322_s0 + $0x151] sm:$0xff] }
   0x2   :  { %v6499_v1 = vld [vmem:[%s12321_s1 + $0x2] sm:$0x3]  ;;  %8596 = vmatprep.subr.msk.bf16.mxu0 %vm258_vm0, %v6257_v0  ;;  %v260_v3 = vsel %vm258_vm0, %v6257_v0, 0  ;;  %v6463_v6 = vld [vmem:[%s12322_s0 + $0x149] sm:$0xff]  ;;  %v149_v10 = vld [vmem:[%s12322_s0 + $0x11] sm:$0xff] }
   0x3   :  { %v147_v2 = vld [vmem:[%s12322_s0 + $0x1] sm:$0xff]  ;;  %8605 = vmatprep.subr.msk.bf16.mxu1 %vm258_vm0, %v6499_v1  ;;  %v3230_v4 = vsel %vm258_vm0, %v6499_v1, 0  ;;  %7337 = vmatpush3.bf16.msra.mxu0 %v260_v3  ;;  %v3156_v9 = vpack.c.bf16 %v6464_v7, %v6463_v6  ;;  %v150_v11 = vld [vmem:[%s12322_s0 + $0x19] sm:$0xff]  ;;  %v152_v21 = vld [vmem:[%s12322_s0 + $0x29] sm:$0xff] }
   0x4   :  { %7679 = vmatpush3.bf16.msra.mxu1 %v3230_v4  ;;  %v183_v8 = vpack.c.bf16 %v148_v5, %v147_v2  ;;  %v146_v12 = vld [vmem:[%s12321_s1] sm:$0x3]  ;;  %v184_v13 = vpack.c.bf16 %v150_v11, %v149_v10  ;;  %v6467_v22 = vld [vmem:[%s12322_s0 + $0x169] sm:$0xff]  ;;  %v6468_v24 = vld [vmem:[%s12322_s0 + $0x171] sm:$0xff] }
   0x5   :  { %8597 = vmatprep.subr.msk.bf16.mxu0 %vm258_vm0, %v146_v12  ;;  %v6465_v14 = vld [vmem:[%s12322_s0 + $0x159] sm:$0xff]  ;;  %v6466_v15 = vld [vmem:[%s12322_s0 + $0x161] sm:$0xff]  ;;  %v494_v17 = vsel %vm258_vm0, %v146_v12, 0  ;;  %7680 = vmatprep.mubr.msk.bf16.mxu1 %vm203_vm1, %v3156_v9  ;;  %v3158_v25 = vpack.c.bf16 %v6468_v24, %v6467_v22  ;;  %v153_v26 = vld [vmem:[%s12322_s0 + $0x31] sm:$0xff] }
   0x6   :  { %v3119_v16 = vld [vmem:[%s12321_s1] sm:$0x3]  ;;  %7338 = vmatprep.mubr.msk.bf16.mxu0 %vm203_vm1, %v183_v8  ;;  %v3157_v18 = vpack.c.bf16 %v6466_v15, %v6465_v14  ;;  %v156_v31 = vld [vmem:[%s12322_s0 + $0x49] sm:$0xff]  ;;  %v6472_v33 = vld [vmem:[%s12322_s0 + $0x191] sm:$0xff] }
   0x7   :  { %v3464_v19 = vsel %vm258_vm0, %v3119_v16, 0  ;;  %v151_v20 = vld [vmem:[%s12322_s0 + $0x21] sm:$0xff]  ;;  %7339 = vmatmul.mubr.msk.bf16.vlgmr.msra.gmra.mrb[0].mxu0 %vm203_vm1, %v184_v13  ;;  %8606 = vmatprep.subr.msk.bf16.mxu1 %vm258_vm0, %v3119_v16  ;;  %v154_v27 = vld [vmem:[%s12322_s0 + $0x39] sm:$0xff]  ;;  %v6471_v32 = vld [vmem:[%s12322_s0 + $0x189] sm:$0xff] }
   0x8   :  { %v185_v23 = vpack.c.bf16 %v152_v21, %v151_v20  ;;  %7681 = vmatmul.mubr.msk.bf16.vlgmr.msra.gmra.mrb[0].mxu1 %vm203_vm1, %v3157_v18  ;;  %7375 = vmatpush3.bf16.msra.mxu0 %v494_v17  ;;  %v6469_v28 = vld [vmem:[%s12322_s0 + $0x179] sm:$0xff]  ;;  %v6470_v29 = vld [vmem:[%s12322_s0 + $0x181] sm:$0xff]  ;;  %v186_v34 = vpack.c.bf16 %v154_v27, %v153_v26  ;;  %v3160_v37 = vpack.c.bf16 %v6472_v33, %v6471_v32  ;;  %v157_v38 = vld [vmem:[%s12322_s0 + $0x51] sm:$0xff] }
   0x9   :  { %7717 = vmatpush3.bf16.msra.mxu1 %v3464_v19  ;;  %v155_v30 = vld [vmem:[%s12322_s0 + $0x41] sm:$0xff]  ;;  %7684 = vmatprep.mubr.msk.bf16.mxu1 %vm203_vm1, %v3158_v25  ;;  %v3159_v35 = vpack.c.bf16 %v6470_v29, %v6469_v28  ;;  %v158_v39 = vld [vmem:[%s12322_s0 + $0x59] sm:$0xff]  ;;  %v160_v43 = vld [vmem:[%s12322_s0 + $0x69] sm:$0xff] }
   0xa   :  { %7342 = vmatprep.mubr.msk.bf16.mxu0 %vm203_vm1, %v185_v23  ;;  %v187_v36 = vpack.c.bf16 %v156_v31, %v155_v30  ;;  %v6473_v40 = vld [vmem:[%s12322_s0 + $0x199] sm:$0xff]  ;;  %v6474_v41 = vld [vmem:[%s12322_s0 + $0x1a1] sm:$0xff]  ;;  %v6475_v44 = vld [vmem:[%s12322_s0 + $0x1a9] sm:$0xff]  ;;  %v188_v46 = vpack.c.bf16 %v158_v39, %v157_v38 }
   0xb   :  { %v159_v42 = vld [vmem:[%s12322_s0 + $0x61] sm:$0xff]  ;;  %v6476_v45 = vld [vmem:[%s12322_s0 + $0x1b1] sm:$0xff]  ;;  %v3161_v47 = vpack.c.bf16 %v6474_v41, %v6473_v40  ;;  %v162_v51 = vld [vmem:[%s12322_s0 + $0x79] sm:$0xff] }
   0xc   :  { %v189_v48 = vpack.c.bf16 %v160_v43, %v159_v42  ;;  %v3162_v49 = vpack.c.bf16 %v6476_v45, %v6475_v44  ;;  %v161_v50 = vld [vmem:[%s12322_s0 + $0x71] sm:$0xff]  ;;  %v6477_v52 = vld [vmem:[%s12322_s0 + $0x1b9] sm:$0xff]  ;;  %v6478_v53 = vld [vmem:[%s12322_s0 + $0x1c1] sm:$0xff] }
   0xd   :  { %v163_v54 = vld [vmem:[%s12322_s0 + $0x81] sm:$0xff]  ;;  %v164_v55 = vld [vmem:[%s12322_s0 + $0x89] sm:$0xff]  ;;  %v6480_v57 = vld [vmem:[%s12322_s0 + $0x1d1] sm:$0xff]  ;;  %v190_v58 = vpack.c.bf16 %v162_v51, %v161_v50  ;;  %v3163_v59 = vpack.c.bf16 %v6478_v53, %v6477_v52 }
   0xe   :  { %v6479_v56 = vld [vmem:[%s12322_s0 + $0x1c9] sm:$0xff]  ;;  %v191_v60 = vpack.c.bf16 %v164_v55, %v163_v54  ;;  %v8781_v62 = vld [vmem:[%s12321_s1 + $0x4] sm:$0x3]  ;;  %v165_v0 = vld [vmem:[%s12322_s0 + $0x91] sm:$0xff] }
   0xf   :  { %7343 = vmatmul.mubr.msk.bf16.gmra.mrb[4].mxu0 %vm203_vm1, %v186_v34  ;;  %v3164_v61 = vpack.c.bf16 %v6480_v57, %v6479_v56  ;;  %8598 = vmatprep.subr.msk.bf16.mxu0 %vm258_vm0, %v8781_v62  ;;  %v8788_v63 = vld [vmem:[%s12321_s1 + $0x4] sm:$0x3]  ;;  %v166_v1 = vld [vmem:[%s12322_s0 + $0x99] sm:$0xff]  ;;  %v168_v5 = vld [vmem:[%s12322_s0 + $0xa9] sm:$0xff] }
  0x10   :  { %7685 = vmatmul.mubr.msk.bf16.gmra.mrb[4].mxu1 %vm203_vm1, %v3159_v35  ;;  %7346 = vmatprep.mubr.msk.bf16.mxu0 %vm203_vm1, %v187_v36  ;;  %v6481_v2 = vld [vmem:[%s12322_s0 + $0x1d9] sm:$0xff]  ;;  %v6482_v3 = vld [vmem:[%s12322_s0 + $0x1e1] sm:$0xff]  ;;  %v6483_v6 = vld [vmem:[%s12322_s0 + $0x1e9] sm:$0xff]  ;;  %v192_v8 = vpack.c.bf16 %v166_v1, %v165_v0 }
  0x11   :  { %7688 = vmatprep.mubr.msk.bf16.mxu1 %vm203_vm1, %v3160_v37  ;;  %8607 = vmatprep.subr.msk.bf16.mxu1 %vm258_vm0, %v8788_v63  ;;  %v167_v4 = vld [vmem:[%s12322_s0 + $0xa1] sm:$0xff]  ;;  %v6484_v7 = vld [vmem:[%s12322_s0 + $0x1f1] sm:$0xff]  ;;  %v3165_v9 = vpack.c.bf16 %v6482_v3, %v6481_v2  ;;  %v170_v13 = vld [vmem:[%s12322_s0 + $0xb9] sm:$0xff] }
  0x12   :  { %v193_v10 = vpack.c.bf16 %v168_v5, %v167_v4  ;;  %v3166_v11 = vpack.c.bf16 %v6484_v7, %v6483_v6  ;;  %v169_v12 = vld [vmem:[%s12322_s0 + $0xb1] sm:$0xff]  ;;  %v6485_v14 = vld [vmem:[%s12322_s0 + $0x1f9] sm:$0xff]  ;;  %v6486_v15 = vld [vmem:[%s12322_s0 + $0x201] sm:$0xff] }
  0x13   :  { %v171_v16 = vld [vmem:[%s12322_s0 + $0xc1] sm:$0xff]  ;;  %v172_v17 = vld [vmem:[%s12322_s0 + $0xc9] sm:$0xff]  ;;  %v6488_v19 = vld [vmem:[%s12322_s0 + $0x211] sm:$0xff]  ;;  %v194_v20 = vpack.c.bf16 %v170_v13, %v169_v12  ;;  %v3167_v21 = vpack.c.bf16 %v6486_v15, %v6485_v14 }
  0x14   :  { %v6487_v18 = vld [vmem:[%s12322_s0 + $0x209] sm:$0xff]  ;;  %v195_v22 = vpack.c.bf16 %v172_v17, %v171_v16  ;;  %v173_v24 = vld [vmem:[%s12322_s0 + $0xd1] sm:$0xff]  ;;  %v174_v25 = vld [vmem:[%s12322_s0 + $0xd9] sm:$0xff] }
  0x15   :  { %v3168_v23 = vpack.c.bf16 %v6488_v19, %v6487_v18  ;;  %v6489_v26 = vld [vmem:[%s12322_s0 + $0x219] sm:$0xff]  ;;  %v6490_v27 = vld [vmem:[%s12322_s0 + $0x221] sm:$0xff]  ;;  %v176_v29 = vld [vmem:[%s12322_s0 + $0xe9] sm:$0xff]  ;;  %v196_v32 = vpack.c.bf16 %v174_v25, %v173_v24 }
  0x16   :  { %v175_v28 = vld [vmem:[%s12322_s0 + $0xe1] sm:$0xff]  ;;  %v6491_v30 = vld [vmem:[%s12322_s0 + $0x229] sm:$0xff]  ;;  %v6492_v31 = vld [vmem:[%s12322_s0 + $0x231] sm:$0xff]  ;;  %v3169_v33 = vpack.c.bf16 %v6490_v27, %v6489_v26 }
  0x17   :  { %7347 = vmatmul.mubr.msk.bf16.gmra.mrb[8].mxu0 %vm203_vm1, %v188_v46  ;;  %v197_v34 = vpack.c.bf16 %v176_v29, %v175_v28  ;;  %v3170_v35 = vpack.c.bf16 %v6492_v31, %v6491_v30  ;;  %v177_v36 = vld [vmem:[%s12322_s0 + $0xf1] sm:$0xff]  ;;  %v178_v37 = vld [vmem:[%s12322_s0 + $0xf9] sm:$0xff]  ;;  %v6494_v39 = vld [vmem:[%s12322_s0 + $0x241] sm:$0xff] }
  0x18   :  { %7689 = vmatmul.mubr.msk.bf16.gmra.mrb[8].mxu1 %vm203_vm1, %v3161_v47  ;;  %7350 = vmatprep.mubr.msk.bf16.mxu0 %vm203_vm1, %v189_v48  ;;  %v6493_v38 = vld [vmem:[%s12322_s0 + $0x239] sm:$0xff]  ;;  %v179_v40 = vld [vmem:[%s12322_s0 + $0x101] sm:$0xff]  ;;  %v180_v41 = vld [vmem:[%s12322_s0 + $0x109] sm:$0xff]  ;;  %v198_v44 = vpack.c.bf16 %v178_v37, %v177_v36 }
  0x19   :  { %7692 = vmatprep.mubr.msk.bf16.mxu1 %vm203_vm1, %v3162_v49  ;;  %v6495_v42 = vld [vmem:[%s12322_s0 + $0x249] sm:$0xff]  ;;  %v6496_v43 = vld [vmem:[%s12322_s0 + $0x251] sm:$0xff]  ;;  %v3171_v45 = vpack.c.bf16 %v6494_v39, %v6493_v38  ;;  %v199_v46 = vpack.c.bf16 %v180_v41, %v179_v40  ;;  %v182_v49 = vld [vmem:[%s12322_s0 + $0x119] sm:$0xff] }
  0x1a   :  { %v3172_v47 = vpack.c.bf16 %v6496_v43, %v6495_v42  ;;  %v181_v48 = vld [vmem:[%s12322_s0 + $0x111] sm:$0xff]  ;;  %v6497_v50 = vld [vmem:[%s12322_s0 + $0x259] sm:$0xff]  ;;  %v6498_v51 = vld [vmem:[%s12322_s0 + $0x261] sm:$0xff] }
  0x1b   :  { %v92_v52 = vld [vmem:[%s12322_s0] sm:$0xff]  ;;  %v93_v53 = vld [vmem:[%s12322_s0 + $0x8] sm:$0xff]  ;;  %v6428_v55 = vld [vmem:[%s12322_s0 + $0x150] sm:$0xff]  ;;  %v200_v56 = vpack.c.bf16 %v182_v49, %v181_v48  ;;  %v3173_v57 = vpack.c.bf16 %v6498_v51, %v6497_v50 }
  0x1c   :  { %v6427_v54 = vld [vmem:[%s12322_s0 + $0x148] sm:$0xff]  ;;  %v6429_v0 = vld [vmem:[%s12322_s0 + $0x158] sm:$0xff]  ;;  %v6430_v1 = vld [vmem:[%s12322_s0 + $0x160] sm:$0xff] }
  0x1d   :  { %v96_v2 = vld [vmem:[%s12322_s0 + $0x20] sm:$0xff]  ;;  %v97_v3 = vld [vmem:[%s12322_s0 + $0x28] sm:$0xff]  ;;  %v6432_v6 = vld [vmem:[%s12322_s0 + $0x170] sm:$0xff]  ;;  %v3102_v7 = vpack.c.bf16 %v6430_v1, %v6429_v0 }
  0x1e   :  { %v6431_v5 = vld [vmem:[%s12322_s0 + $0x168] sm:$0xff]  ;;  %v98_v12 = vld [vmem:[%s12322_s0 + $0x30] sm:$0xff]  ;;  %v8971_v13 = vld [vmem:[%s12321_s1 + $0x6] sm:$0x3] }
  0x1f   :  { %7351 = vmatmul.mubr.msk.bf16.gmra.mrb[12].mxu0 %vm203_vm1, %v190_v58  ;;  %v128_v58 = vpack.c.bf16 %v93_v53, %v92_v52  ;;  %v8983_v14 = vld [vmem:[%s12321_s1 + $0x6] sm:$0x3]  ;;  %v101_v17 = vld [vmem:[%s12322_s0 + $0x48] sm:$0xff]  ;;  %v6436_v19 = vld [vmem:[%s12322_s0 + $0x190] sm:$0xff] }
  0x20   :  { %7693 = vmatmul.mubr.msk.bf16.gmra.mrb[12].mxu1 %vm203_vm1, %v3163_v59  ;;  %7354 = vmatprep.mubr.msk.bf16.mxu0 %vm203_vm1, %v191_v60  ;;  %v3101_v59 = vpack.c.bf16 %v6428_v55, %v6427_v54  ;;  %v94_v60 = vld [vmem:[%s12322_s0 + $0x10] sm:$0xff]  ;;  %v6434_v15 = vld [vmem:[%s12322_s0 + $0x180] sm:$0xff]  ;;  %v6435_v18 = vld [vmem:[%s12322_s0 + $0x188] sm:$0xff] }
  0x21   :  { %7696 = vmatprep.mubr.msk.bf16.mxu1 %vm203_vm1, %v3164_v61  ;;  %v95_v61 = vld [vmem:[%s12322_s0 + $0x18] sm:$0xff]  ;;  %v100_v16 = vld [vmem:[%s12322_s0 + $0x40] sm:$0xff]  ;;  %v102_v24 = vld [vmem:[%s12322_s0 + $0x50] sm:$0xff] }
  0x22   :  { %v129_v4 = vpack.c.bf16 %v95_v61, %v94_v60  ;;  %v103_v25 = vld [vmem:[%s12322_s0 + $0x58] sm:$0xff]  ;;  %v6438_v27 = vld [vmem:[%s12322_s0 + $0x1a0] sm:$0xff]  ;;  %v105_v29 = vld [vmem:[%s12322_s0 + $0x68] sm:$0xff] }
  0x23   :  { %v6437_v26 = vld [vmem:[%s12322_s0 + $0x198] sm:$0xff]  ;;  %v104_v28 = vld [vmem:[%s12322_s0 + $0x60] sm:$0xff]  ;;  %v6439_v30 = vld [vmem:[%s12322_s0 + $0x1a8] sm:$0xff] }
  0x24   :  { %v6440_v31 = vld [vmem:[%s12322_s0 + $0x1b0] sm:$0xff]  ;;  %v107_v37 = vld [vmem:[%s12322_s0 + $0x78] sm:$0xff]  ;;  %v6442_v39 = vld [vmem:[%s12322_s0 + $0x1c0] sm:$0xff] }
  0x25   :  { %v106_v36 = vld [vmem:[%s12322_s0 + $0x70] sm:$0xff]  ;;  %v6441_v38 = vld [vmem:[%s12322_s0 + $0x1b8] sm:$0xff]  ;;  %v108_v40 = vld [vmem:[%s12322_s0 + $0x80] sm:$0xff] }
  0x26   :  { %v109_v41 = vld [vmem:[%s12322_s0 + $0x88] sm:$0xff]  ;;  %v6444_v43 = vld [vmem:[%s12322_s0 + $0x1d0] sm:$0xff]  ;;  %v111_v49 = vld [vmem:[%s12322_s0 + $0x98] sm:$0xff] }
  0x27   :  { %7355 = vmatmul.mubr.msk.bf16.gmra.mrb[16].mxu0 %vm203_vm1, %v192_v8  ;;  %v784_v8 = vsel %vm258_vm0, %v8781_v62, 0  ;;  %v99_v62 = vld [vmem:[%s12322_s0 + $0x38] sm:$0xff]  ;;  %v6443_v42 = vld [vmem:[%s12322_s0 + $0x1c8] sm:$0xff]  ;;  %v110_v48 = vld [vmem:[%s12322_s0 + $0x90] sm:$0xff] }
  0x28   :  { %7697 = vmatmul.mubr.msk.bf16.gmra.mrb[16].mxu1 %vm203_vm1, %v3165_v9  ;;  %7358 = vmatprep.mubr.msk.bf16.mxu0 %vm203_vm1, %v193_v10  ;;  %v130_v9 = vpack.c.bf16 %v97_v3, %v96_v2  ;;  %v3753_v10 = vsel %vm258_vm0, %v8788_v63, 0  ;;  %v6433_v63 = vld [vmem:[%s12322_s0 + $0x178] sm:$0xff]  ;;  %v6446_v51 = vld [vmem:[%s12322_s0 + $0x1e0] sm:$0xff]  ;;  %v113_v53 = vld [vmem:[%s12322_s0 + $0xa8] sm:$0xff] }
  0x29   :  { %7700 = vmatprep.mubr.msk.bf16.mxu1 %vm203_vm1, %v3166_v11  ;;  %v3103_v11 = vpack.c.bf16 %v6432_v6, %v6431_v5  ;;  %v6445_v50 = vld [vmem:[%s12322_s0 + $0x1d8] sm:$0xff]  ;;  %v112_v52 = vld [vmem:[%s12322_s0 + $0xa0] sm:$0xff]  ;;  %v6447_v54 = vld [vmem:[%s12322_s0 + $0x1e8] sm:$0xff] }
  0x2a   :  { %v6448_v55 = vld [vmem:[%s12322_s0 + $0x1f0] sm:$0xff]  ;;  %v115_v61 = vld [vmem:[%s12322_s0 + $0xb8] sm:$0xff]  ;;  %v6450_v1 = vld [vmem:[%s12322_s0 + $0x200] sm:$0xff] }
  0x2b   :  { %v114_v60 = vld [vmem:[%s12322_s0 + $0xb0] sm:$0xff]  ;;  %v6449_v0 = vld [vmem:[%s12322_s0 + $0x1f8] sm:$0xff]  ;;  %v116_v2 = vld [vmem:[%s12322_s0 + $0xc0] sm:$0xff] }
  0x2c   :  { %v117_v3 = vld [vmem:[%s12322_s0 + $0xc8] sm:$0xff]  ;;  %v6452_v5 = vld [vmem:[%s12322_s0 + $0x210] sm:$0xff]  ;;  %v139_v6 = vpack.c.bf16 %v115_v61, %v114_v60 }
  0x2d   :  { %v679_v60 = vld [vmem:[%s12322_s0 + $0x32] sm:$0xff]  ;;  %v9250_v61 = vld [vmem:[%s12321_s1 + $0x8] sm:$0x3] }
  0x2f   :  { %7359 = vmatmul.mubr.msk.bf16.gmra.mrb[20].mxu0 %vm203_vm1, %v194_v20  ;;  %v131_v20 = vpack.c.bf16 %v99_v62, %v98_v12  ;;  %v6453_v12 = vld [vmem:[%s12322_s0 + $0x218] sm:$0xff]  ;;  %v6454_v62 = vld [vmem:[%s12322_s0 + $0x220] sm:$0xff] }
  0x30   :  { %7701 = vmatmul.mubr.msk.bf16.gmra.mrb[20].mxu1 %vm203_vm1, %v3167_v21  ;;  %7362 = vmatprep.mubr.msk.bf16.mxu0 %vm203_vm1, %v195_v22  ;;  %v3104_v21 = vpack.c.bf16 %v6434_v15, %v6433_v63  ;;  %v132_v22 = vpack.c.bf16 %v101_v17, %v100_v16  ;;  %v120_v63 = vld [vmem:[%s12322_s0 + $0xe0] sm:$0xff]  ;;  %v121_v15 = vld [vmem:[%s12322_s0 + $0xe8] sm:$0xff]  ;;  %v6456_v17 = vld [vmem:[%s12322_s0 + $0x230] sm:$0xff] }
  0x31   :  { %7704 = vmatprep.mubr.msk.bf16.mxu1 %vm203_vm1, %v3168_v23  ;;  %v3105_v23 = vpack.c.bf16 %v6436_v19, %v6435_v18  ;;  %v6455_v16 = vld [vmem:[%s12322_s0 + $0x228] sm:$0xff]  ;;  %v3114_v19 = vpack.c.bf16 %v6454_v62, %v6453_v12  ;;  %v6546_v12 = vld [vmem:[%s12322_s0 + $0x19a] sm:$0xff] }
  0x32   :  { %v6547_v62 = vld [vmem:[%s12322_s0 + $0x1a2] sm:$0xff] }
  0x37   :  { %7363 = vmatmul.mubr.msk.bf16.gmra.mrb[24].mxu0 %vm203_vm1, %v196_v32  ;;  %v133_v32 = vpack.c.bf16 %v103_v25, %v102_v24  ;;  %v6457_v24 = vld [vmem:[%s12322_s0 + $0x238] sm:$0xff]  ;;  %v6458_v25 = vld [vmem:[%s12322_s0 + $0x240] sm:$0xff] }
  0x38   :  { %7705 = vmatmul.mubr.msk.bf16.gmra.mrb[24].mxu1 %vm203_vm1, %v3169_v33  ;;  %7366 = vmatprep.mubr.msk.bf16.mxu0 %vm203_vm1, %v197_v34  ;;  %v3106_v33 = vpack.c.bf16 %v6438_v27, %v6437_v26  ;;  %v134_v34 = vpack.c.bf16 %v105_v29, %v104_v28  ;;  %v124_v26 = vld [vmem:[%s12322_s0 + $0x100] sm:$0xff]  ;;  %v125_v27 = vld [vmem:[%s12322_s0 + $0x108] sm:$0xff]  ;;  %v6460_v29 = vld [vmem:[%s12322_s0 + $0x250] sm:$0xff] }
  0x39   :  { %7708 = vmatprep.mubr.msk.bf16.mxu1 %vm203_vm1, %v3170_v35  ;;  %v3107_v35 = vpack.c.bf16 %v6440_v31, %v6439_v30  ;;  %v6459_v28 = vld [vmem:[%s12322_s0 + $0x248] sm:$0xff]  ;;  %v3116_v31 = vpack.c.bf16 %v6458_v25, %v6457_v24  ;;  %v6550_v24 = vld [vmem:[%s12322_s0 + $0x1ba] sm:$0xff] }
  0x3a   :  { %v6551_v25 = vld [vmem:[%s12322_s0 + $0x1c2] sm:$0xff] }
  0x3f   :  { %7367 = vmatmul.mubr.msk.bf16.gmra.mrb[28].mxu0 %vm203_vm1, %v198_v44  ;;  %v135_v44 = vpack.c.bf16 %v107_v37, %v106_v36  ;;  %v6461_v36 = vld [vmem:[%s12322_s0 + $0x258] sm:$0xff]  ;;  %v6462_v37 = vld [vmem:[%s12322_s0 + $0x260] sm:$0xff] }
  0x40   :  { %7709 = vmatmul.mubr.msk.bf16.gmra.mrb[28].mxu1 %vm203_vm1, %v3171_v45  ;;  %7370 = vmatprep.mubr.msk.bf16.mxu0 %vm203_vm1, %v199_v46  ;;  %v3108_v45 = vpack.c.bf16 %v6442_v39, %v6441_v38  ;;  %v136_v46 = vpack.c.bf16 %v109_v41, %v108_v40  ;;  %v673_v38 = vld [vmem:[%s12322_s0 + $0x2] sm:$0xff]  ;;  %v674_v39 = vld [vmem:[%s12322_s0 + $0xa] sm:$0xff]  ;;  %v6537_v41 = vld [vmem:[%s12322_s0 + $0x152] sm:$0xff] }
  0x41   :  { %7712 = vmatprep.mubr.msk.bf16.mxu1 %vm203_vm1, %v3172_v47  ;;  %v3109_v47 = vpack.c.bf16 %v6444_v43, %v6443_v42  ;;  %v6536_v40 = vld [vmem:[%s12322_s0 + $0x14a] sm:$0xff]  ;;  %v3118_v43 = vpack.c.bf16 %v6462_v37, %v6461_v36  ;;  %v6554_v36 = vld [vmem:[%s12322_s0 + $0x1da] sm:$0xff]  ;;  %v6555_v37 = vld [vmem:[%s12322_s0 + $0x1e2] sm:$0xff] }
  0x47   :  { %7371 = vmatmul.mubr.msk.bf16.gmra.mrb[32].mxu0 %vm203_vm1, %v200_v56  ;;  %v137_v56 = vpack.c.bf16 %v111_v49, %v110_v48  ;;  %v6538_v48 = vld [vmem:[%s12322_s0 + $0x15a] sm:$0xff]  ;;  %v6539_v49 = vld [vmem:[%s12322_s0 + $0x162] sm:$0xff] }
  0x48   :  { %7713 = vmatmul.mubr.msk.bf16.gmra.mrb[32].mxu1 %vm203_vm1, %v3173_v57  ;;  %7376 = vmatprep.mubr.msk.bf16.mxu0 %vm203_vm1, %v128_v58  ;;  %v3110_v57 = vpack.c.bf16 %v6446_v51, %v6445_v50  ;;  %v138_v58 = vpack.c.bf16 %v113_v53, %v112_v52  ;;  %v677_v50 = vld [vmem:[%s12322_s0 + $0x22] sm:$0xff]  ;;  %v678_v51 = vld [vmem:[%s12322_s0 + $0x2a] sm:$0xff] }
  0x49   :  { %7718 = vmatprep.mubr.msk.bf16.mxu1 %vm203_vm1, %v3101_v59  ;;  %v3111_v59 = vpack.c.bf16 %v6448_v55, %v6447_v54  ;;  %v6540_v53 = vld [vmem:[%s12322_s0 + $0x16a] sm:$0xff]  ;;  %v6541_v54 = vld [vmem:[%s12322_s0 + $0x172] sm:$0xff]  ;;  %v9232_v55 = vpack.c.bf16 %v6539_v49, %v6538_v48  ;;  %v6558_v48 = vld [vmem:[%s12322_s0 + $0x1fa] sm:$0xff] }
  0x4a   :  { %v6559_v49 = vld [vmem:[%s12322_s0 + $0x202] sm:$0xff] }
  0x4f   :  { %7377 = vmatmul.mubr.msk.bf16.vlgmr.msra.gmra.mrb[0].mxu0 %vm203_vm1, %v129_v4  ;;  %v6451_v4 = vld [vmem:[%s12322_s0 + $0x208] sm:$0xff] }
  0x50   :  { %7719 = vmatmul.mubr.msk.bf16.vlgmr.msra.gmra.mrb[0].mxu1 %vm203_vm1, %v3102_v7  ;;  %7413 = vmatpush3.bf16.msra.mxu0 %v784_v8  ;;  %v3112_v7 = vpack.c.bf16 %v6450_v1, %v6449_v0  ;;  %v140_v8 = vpack.c.bf16 %v117_v3, %v116_v2  ;;  %v9263_v0 = vld [vmem:[%s12321_s1 + $0x8] sm:$0x3]  ;;  %v682_v3 = vld [vmem:[%s12322_s0 + $0x4a] sm:$0xff] }
  0x51   :  { %7755 = vmatpush3.bf16.msra.mxu1 %v3753_v10  ;;  %7380 = vmatprep.mubr.msk.bf16.mxu0 %vm203_vm1, %v130_v9  ;;  %v3113_v9 = vpack.c.bf16 %v6452_v5, %v6451_v4  ;;  %v118_v10 = vld [vmem:[%s12322_s0 + $0xd0] sm:$0xff]  ;;  %v6543_v1 = vld [vmem:[%s12322_s0 + $0x182] sm:$0xff] }
  0x52   :  { %7722 = vmatprep.mubr.msk.bf16.mxu1 %vm203_vm1, %v3103_v11  ;;  %8599 = vmatprep.subr.msk.bf16.mxu0 %vm258_vm0, %v8971_v13  ;;  %v119_v11 = vld [vmem:[%s12322_s0 + $0xd8] sm:$0xff]  ;;  %v681_v2 = vld [vmem:[%s12322_s0 + $0x42] sm:$0xff]  ;;  %v6544_v4 = vld [vmem:[%s12322_s0 + $0x18a] sm:$0xff] }
  0x53   :  { %8608 = vmatprep.subr.msk.bf16.mxu1 %vm258_vm0, %v8983_v14  ;;  %v141_v18 = vpack.c.bf16 %v119_v11, %v118_v10  ;;  %v6545_v5 = vld [vmem:[%s12322_s0 + $0x192] sm:$0xff]  ;;  %v684_v11 = vld [vmem:[%s12322_s0 + $0x5a] sm:$0xff] }
  0x54   :  { %v683_v10 = vld [vmem:[%s12322_s0 + $0x52] sm:$0xff] }
  0x57   :  { %7381 = vmatmul.mubr.msk.bf16.gmra.mrb[4].mxu0 %vm203_vm1, %v131_v20  ;;  %v142_v20 = vpack.c.bf16 %v121_v15, %v120_v63  ;;  %v685_v63 = vld [vmem:[%s12322_s0 + $0x62] sm:$0xff]  ;;  %v686_v15 = vld [vmem:[%s12322_s0 + $0x6a] sm:$0xff] }
  0x58   :  { %7723 = vmatmul.mubr.msk.bf16.gmra.mrb[4].mxu1 %vm203_vm1, %v3104_v21  ;;  %7384 = vmatprep.mubr.msk.bf16.mxu0 %vm203_vm1, %v132_v22  ;;  %v3115_v21 = vpack.c.bf16 %v6456_v17, %v6455_v16  ;;  %v122_v22 = vld [vmem:[%s12322_s0 + $0xf0] sm:$0xff] }
  0x59   :  { %7726 = vmatprep.mubr.msk.bf16.mxu1 %vm203_vm1, %v3105_v23  ;;  %v123_v23 = vld [vmem:[%s12322_s0 + $0xf8] sm:$0xff]  ;;  %v6548_v16 = vld [vmem:[%s12322_s0 + $0x1aa] sm:$0xff] }
  0x5a   :  { %v143_v30 = vpack.c.bf16 %v123_v23, %v122_v22  ;;  %v6549_v17 = vld [vmem:[%s12322_s0 + $0x1b2] sm:$0xff]  ;;  %v688_v23 = vld [vmem:[%s12322_s0 + $0x7a] sm:$0xff] }
  0x5b   :  { %v687_v22 = vld [vmem:[%s12322_s0 + $0x72] sm:$0xff] }
  0x5f   :  { %7385 = vmatmul.mubr.msk.bf16.gmra.mrb[8].mxu0 %vm203_vm1, %v133_v32  ;;  %v144_v32 = vpack.c.bf16 %v125_v27, %v124_v26  ;;  %v689_v26 = vld [vmem:[%s12322_s0 + $0x82] sm:$0xff]  ;;  %v690_v27 = vld [vmem:[%s12322_s0 + $0x8a] sm:$0xff] }
  0x60   :  { %7727 = vmatmul.mubr.msk.bf16.gmra.mrb[8].mxu1 %vm203_vm1, %v3106_v33  ;;  %7388 = vmatprep.mubr.msk.bf16.mxu0 %vm203_vm1, %v134_v34  ;;  %v3117_v33 = vpack.c.bf16 %v6460_v29, %v6459_v28  ;;  %v126_v34 = vld [vmem:[%s12322_s0 + $0x110] sm:$0xff] }
  0x61   :  { %7730 = vmatprep.mubr.msk.bf16.mxu1 %vm203_vm1, %v3107_v35  ;;  %v127_v35 = vld [vmem:[%s12322_s0 + $0x118] sm:$0xff]  ;;  %v6552_v28 = vld [vmem:[%s12322_s0 + $0x1ca] sm:$0xff] }
  0x62   :  { %v145_v42 = vpack.c.bf16 %v127_v35, %v126_v34  ;;  %v6553_v29 = vld [vmem:[%s12322_s0 + $0x1d2] sm:$0xff]  ;;  %v692_v35 = vld [vmem:[%s12322_s0 + $0x9a] sm:$0xff] }
  0x63   :  { %v691_v34 = vld [vmem:[%s12322_s0 + $0x92] sm:$0xff] }
  0x67   :  { %7389 = vmatmul.mubr.msk.bf16.gmra.mrb[12].mxu0 %vm203_vm1, %v135_v44  ;;  %v709_v44 = vpack.c.bf16 %v674_v39, %v673_v38  ;;  %v693_v38 = vld [vmem:[%s12322_s0 + $0xa2] sm:$0xff]  ;;  %v694_v39 = vld [vmem:[%s12322_s0 + $0xaa] sm:$0xff] }
  0x68   :  { %7731 = vmatmul.mubr.msk.bf16.gmra.mrb[12].mxu1 %vm203_vm1, %v3108_v45  ;;  %7392 = vmatprep.mubr.msk.bf16.mxu0 %vm203_vm1, %v136_v46  ;;  %v3679_v45 = vpack.c.bf16 %v6537_v41, %v6536_v40  ;;  %v675_v46 = vld [vmem:[%s12322_s0 + $0x12] sm:$0xff]  ;;  %v6556_v40 = vld [vmem:[%s12322_s0 + $0x1ea] sm:$0xff] }
  0x69   :  { %7734 = vmatprep.mubr.msk.bf16.mxu1 %vm203_vm1, %v3109_v47  ;;  %v676_v47 = vld [vmem:[%s12322_s0 + $0x1a] sm:$0xff]  ;;  %v6557_v41 = vld [vmem:[%s12322_s0 + $0x1f2] sm:$0xff] }
  0x6a   :  { %v9224_v52 = vpack.c.bf16 %v676_v47, %v675_v46  ;;  %v695_v46 = vld [vmem:[%s12322_s0 + $0xb2] sm:$0xff]  ;;  %v696_v47 = vld [vmem:[%s12322_s0 + $0xba] sm:$0xff] }
  0x6f   :  { %7393 = vmatmul.mubr.msk.bf16.gmra.mrb[16].mxu0 %vm203_vm1, %v137_v56  ;;  %v1110_v56 = vsel %vm258_vm0, %v8971_v13, 0  ;;  %v680_v13 = vld [vmem:[%s12322_s0 + $0x3a] sm:$0xff] }
  0x70   :  { %7735 = vmatmul.mubr.msk.bf16.gmra.mrb[16].mxu1 %vm203_vm1, %v3110_v57  ;;  %7396 = vmatprep.mubr.msk.bf16.mxu0 %vm203_vm1, %v138_v58  ;;  %v9236_v57 = vpack.c.bf16 %v678_v51, %v677_v50  ;;  %v4078_v58 = vsel %vm258_vm0, %v8983_v14, 0  ;;  %v6542_v14 = vld [vmem:[%s12322_s0 + $0x17a] sm:$0xff]  ;;  %v697_v50 = vld [vmem:[%s12322_s0 + $0xc2] sm:$0xff]  ;;  %v698_v51 = vld [vmem:[%s12322_s0 + $0xca] sm:$0xff] }
  0x71   :  { %7738 = vmatprep.mubr.msk.bf16.mxu1 %vm203_vm1, %v3111_v59  ;;  %v9240_v59 = vpack.c.bf16 %v6541_v54, %v6540_v53  ;;  %v6560_v53 = vld [vmem:[%s12322_s0 + $0x20a] sm:$0xff]  ;;  %v6561_v54 = vld [vmem:[%s12322_s0 + $0x212] sm:$0xff] }
  0x77   :  { %7397 = vmatmul.mubr.msk.bf16.gmra.mrb[20].mxu0 %vm203_vm1, %v139_v6  ;;  %v9286_v6 = vpack.c.bf16 %v680_v13, %v679_v60  ;;  %v9452_v60 = vpack.c.bf16 %v698_v51, %v697_v50  ;;  %v9454_v13 = vpack.c.bf16 %v6561_v54, %v6560_v53 }
  0x78   :  { %7739 = vmatmul.mubr.msk.bf16.gmra.mrb[20].mxu1 %vm203_vm1, %v3112_v7  ;;  %7400 = vmatprep.mubr.msk.bf16.mxu0 %vm203_vm1, %v140_v8  ;;  %v9290_v7 = vpack.c.bf16 %v6543_v1, %v6542_v14  ;;  %v9292_v8 = vpack.c.bf16 %v682_v3, %v681_v2  ;;  %v699_v14 = vld [vmem:[%s12322_s0 + $0xd2] sm:$0xff]  ;;  %v700_v1 = vld [vmem:[%s12322_s0 + $0xda] sm:$0xff]  ;;  %v6563_v3 = vld [vmem:[%s12322_s0 + $0x222] sm:$0xff] }
  0x79   :  { %7742 = vmatprep.mubr.msk.bf16.mxu1 %vm203_vm1, %v3113_v9  ;;  %v9294_v9 = vpack.c.bf16 %v6545_v5, %v6544_v4  ;;  %v6562_v2 = vld [vmem:[%s12322_s0 + $0x21a] sm:$0xff]  ;;  %v701_v4 = vld [vmem:[%s12322_s0 + $0xe2] sm:$0xff]  ;;  %v702_v5 = vld [vmem:[%s12322_s0 + $0xea] sm:$0xff] }
  0x7f   :  { %7401 = vmatmul.mubr.msk.bf16.gmra.mrb[24].mxu0 %vm203_vm1, %v141_v18  ;;  %v9328_v18 = vpack.c.bf16 %v684_v11, %v683_v10  ;;  %v6564_v10 = vld [vmem:[%s12322_s0 + $0x22a] sm:$0xff]  ;;  %v6565_v11 = vld [vmem:[%s12322_s0 + $0x232] sm:$0xff] }
  0x80   :  { %7743 = vmatmul.mubr.msk.bf16.gmra.mrb[24].mxu1 %vm203_vm1, %v3114_v19  ;;  %7404 = vmatprep.mubr.msk.bf16.mxu0 %vm203_vm1, %v142_v20  ;;  %v9330_v19 = vpack.c.bf16 %v6547_v62, %v6546_v12  ;;  %v9332_v20 = vpack.c.bf16 %v686_v15, %v685_v63  ;;  %v9488_v12 = vpack.c.bf16 %v700_v1, %v699_v14  ;;  %v9697_v14 = vld [vmem:[%s12321_s1 + $0xc] sm:$0x3]  ;;  %v6653_v1 = vld [vmem:[%s12322_s0 + $0x193] sm:$0xff] }
  0x81   :  { %7746 = vmatprep.mubr.msk.bf16.mxu1 %vm203_vm1, %v3115_v21  ;;  %v9334_v21 = vpack.c.bf16 %v6549_v17, %v6548_v16  ;;  %v9490_v62 = vpack.c.bf16 %v6563_v3, %v6562_v2  ;;  %v9492_v63 = vpack.c.bf16 %v702_v5, %v701_v4  ;;  %v9494_v15 = vpack.c.bf16 %v6565_v11, %v6564_v10  ;;  %v703_v16 = vld [vmem:[%s12322_s0 + $0xf2] sm:$0xff]  ;;  %v704_v17 = vld [vmem:[%s12322_s0 + $0xfa] sm:$0xff]  ;;  %v6655_v5 = vld [vmem:[%s12322_s0 + $0x1a3] sm:$0xff] }
  0x82   :  { %v1333_v2 = vld [vmem:[%s12322_s0 + $0x53] sm:$0xff]  ;;  %v1334_v3 = vld [vmem:[%s12322_s0 + $0x5b] sm:$0xff] }
  0x83   :  { %v6654_v4 = vld [vmem:[%s12322_s0 + $0x19b] sm:$0xff] }
  0x87   :  { %7405 = vmatmul.mubr.msk.bf16.gmra.mrb[28].mxu0 %vm203_vm1, %v143_v30  ;;  %v9368_v30 = vpack.c.bf16 %v688_v23, %v687_v22  ;;  %v6566_v22 = vld [vmem:[%s12322_s0 + $0x23a] sm:$0xff]  ;;  %v6567_v23 = vld [vmem:[%s12322_s0 + $0x242] sm:$0xff] }
  0x88   :  { %7747 = vmatmul.mubr.msk.bf16.gmra.mrb[28].mxu1 %vm203_vm1, %v3116_v31  ;;  %7408 = vmatprep.mubr.msk.bf16.mxu0 %vm203_vm1, %v144_v32  ;;  %v9370_v31 = vpack.c.bf16 %v6551_v25, %v6550_v24  ;;  %v9372_v32 = vpack.c.bf16 %v690_v27, %v689_v26  ;;  %v705_v24 = vld [vmem:[%s12322_s0 + $0x102] sm:$0xff]  ;;  %v706_v25 = vld [vmem:[%s12322_s0 + $0x10a] sm:$0xff]  ;;  %v6569_v27 = vld [vmem:[%s12322_s0 + $0x252] sm:$0xff] }
  0x89   :  { %7750 = vmatprep.mubr.msk.bf16.mxu1 %vm203_vm1, %v3117_v33  ;;  %v9374_v33 = vpack.c.bf16 %v6553_v29, %v6552_v28  ;;  %v6568_v26 = vld [vmem:[%s12322_s0 + $0x24a] sm:$0xff]  ;;  %v724_v28 = vpack.c.bf16 %v704_v17, %v703_v16  ;;  %v3694_v29 = vpack.c.bf16 %v6567_v23, %v6566_v22  ;;  %v6657_v17 = vld [vmem:[%s12322_s0 + $0x1b3] sm:$0xff]  ;;  %v1338_v23 = vld [vmem:[%s12322_s0 + $0x7b] sm:$0xff] }
  0x8a   :  { %v6656_v16 = vld [vmem:[%s12322_s0 + $0x1ab] sm:$0xff]  ;;  %v1337_v22 = vld [vmem:[%s12322_s0 + $0x73] sm:$0xff] }
  0x8f   :  { %7409 = vmatmul.mubr.msk.bf16.gmra.mrb[32].mxu0 %vm203_vm1, %v145_v42  ;;  %v9408_v42 = vpack.c.bf16 %v692_v35, %v691_v34  ;;  %v725_v34 = vpack.c.bf16 %v706_v25, %v705_v24  ;;  %v3695_v35 = vpack.c.bf16 %v6569_v27, %v6568_v26  ;;  %v6658_v24 = vld [vmem:[%s12322_s0 + $0x1bb] sm:$0xff]  ;;  %v6659_v25 = vld [vmem:[%s12322_s0 + $0x1c3] sm:$0xff]  ;;  %v4334_v27 = vpack.c.bf16 %v6657_v17, %v6656_v16  ;;  %v1357_v16 = vld [vmem:[%s12322_s0 + $0x113] sm:$0xff] }
  0x90   :  { %7751 = vmatmul.mubr.msk.bf16.gmra.mrb[32].mxu1 %vm203_vm1, %v3118_v43  ;;  %7414 = vmatprep.mubr.msk.bf16.mxu0 %vm203_vm1, %v709_v44  ;;  %v9410_v43 = vpack.c.bf16 %v6555_v37, %v6554_v36  ;;  %v9412_v44 = vpack.c.bf16 %v694_v39, %v693_v38  ;;  %v707_v36 = vld [vmem:[%s12322_s0 + $0x112] sm:$0xff]  ;;  %v708_v37 = vld [vmem:[%s12322_s0 + $0x11a] sm:$0xff]  ;;  %v6571_v39 = vld [vmem:[%s12322_s0 + $0x262] sm:$0xff] }
  0x91   :  { %7756 = vmatprep.mubr.msk.bf16.mxu1 %vm203_vm1, %v3679_v45  ;;  %v9414_v45 = vpack.c.bf16 %v6557_v41, %v6556_v40  ;;  %v6570_v38 = vld [vmem:[%s12322_s0 + $0x25a] sm:$0xff]  ;;  %v726_v40 = vpack.c.bf16 %v708_v37, %v707_v36  ;;  %v6660_v36 = vld [vmem:[%s12322_s0 + $0x1cb] sm:$0xff] }
  0x92   :  { %v3696_v41 = vpack.c.bf16 %v6571_v39, %v6570_v38  ;;  %v6661_v37 = vld [vmem:[%s12322_s0 + $0x1d3] sm:$0xff]  ;;  %v1342_v39 = vld [vmem:[%s12322_s0 + $0x9b] sm:$0xff] }
  0x93   :  { %v1341_v38 = vld [vmem:[%s12322_s0 + $0x93] sm:$0xff]  ;;  %v1358_v17 = vld [vmem:[%s12322_s0 + $0x11b] sm:$0xff] }
  0x97   :  { %7415 = vmatmul.mubr.msk.bf16.vlgmr.msra.gmra.mrb[0].mxu0 %vm203_vm1, %v9224_v52 }
  0x98   :  { %7757 = vmatmul.mubr.msk.bf16.vlgmr.msra.gmra.mrb[0].mxu1 %vm203_vm1, %v9232_v55  ;;  %7451 = vmatpush3.bf16.msra.mxu0 %v1110_v56  ;;  %v9448_v56 = vpack.c.bf16 %v696_v47, %v695_v46  ;;  %v1436_v46 = vsel %vm258_vm0, %v9250_v61, 0  ;;  %v4403_v47 = vsel %vm258_vm0, %v9263_v0, 0 }
  0x99   :  { %7793 = vmatpush3.bf16.msra.mxu1 %v4078_v58  ;;  %7418 = vmatprep.mubr.msk.bf16.mxu0 %vm203_vm1, %v9236_v57  ;;  %v9450_v58 = vpack.c.bf16 %v6559_v49, %v6558_v48  ;;  %v9559_v48 = vld [vmem:[%s12321_s1 + $0xa] sm:$0x3] }
  0x9a   :  { %7760 = vmatprep.mubr.msk.bf16.mxu1 %vm203_vm1, %v9240_v59  ;;  %8600 = vmatprep.subr.msk.bf16.mxu0 %vm258_vm0, %v9250_v61  ;;  %v6626_v61 = vld [vmem:[%s12322_s0 + $0x272] sm:$0xff]  ;;  %v1762_v50 = vsel %vm258_vm0, %v9559_v48, 0 }
  0x9b   :  { %8609 = vmatprep.subr.msk.bf16.mxu1 %vm258_vm0, %v9263_v0  ;;  %v1325_v0 = vld [vmem:[%s12322_s0 + $0x13] sm:$0xff] }
  0x9f   :  { %7419 = vmatmul.mubr.msk.bf16.gmra.mrb[4].mxu0 %vm203_vm1, %v9286_v6 }
  0xa0   :  { %7761 = vmatmul.mubr.msk.bf16.gmra.mrb[4].mxu1 %vm203_vm1, %v9290_v7  ;;  %7422 = vmatprep.mubr.msk.bf16.mxu0 %vm203_vm1, %v9292_v8 }
  0xa1   :  { %7764 = vmatprep.mubr.msk.bf16.mxu1 %vm203_vm1, %v9294_v9 }
  0xa7   :  { %7423 = vmatmul.mubr.msk.bf16.gmra.mrb[8].mxu0 %vm203_vm1, %v9328_v18 }
  0xa8   :  { %7765 = vmatmul.mubr.msk.bf16.gmra.mrb[8].mxu1 %vm203_vm1, %v9330_v19  ;;  %7426 = vmatprep.mubr.msk.bf16.mxu0 %vm203_vm1, %v9332_v20 }
  0xa9   :  { %7768 = vmatprep.mubr.msk.bf16.mxu1 %vm203_vm1, %v9334_v21 }
  0xaf   :  { %7427 = vmatmul.mubr.msk.bf16.gmra.mrb[12].mxu0 %vm203_vm1, %v9368_v30 }
  0xb0   :  { %7769 = vmatmul.mubr.msk.bf16.gmra.mrb[12].mxu1 %vm203_vm1, %v9370_v31  ;;  %7430 = vmatprep.mubr.msk.bf16.mxu0 %vm203_vm1, %v9372_v32 }
  0xb1   :  { %7772 = vmatprep.mubr.msk.bf16.mxu1 %vm203_vm1, %v9374_v33 }
  0xb7   :  { %7431 = vmatmul.mubr.msk.bf16.gmra.mrb[16].mxu0 %vm203_vm1, %v9408_v42 }
  0xb8   :  { %7773 = vmatmul.mubr.msk.bf16.gmra.mrb[16].mxu1 %vm203_vm1, %v9410_v43  ;;  %7434 = vmatprep.mubr.msk.bf16.mxu0 %vm203_vm1, %v9412_v44 }
  0xb9   :  { %7776 = vmatprep.mubr.msk.bf16.mxu1 %vm203_vm1, %v9414_v45 }
  0xbf   :  { %7435 = vmatmul.mubr.msk.bf16.gmra.mrb[20].mxu0 %vm203_vm1, %v9448_v56 }
  0xc0   :  { %7777 = vmatmul.mubr.msk.bf16.gmra.mrb[20].mxu1 %vm203_vm1, %v9450_v58  ;;  %7438 = vmatprep.mubr.msk.bf16.mxu0 %vm203_vm1, %v9452_v60 }
  0xc1   :  { %7780 = vmatprep.mubr.msk.bf16.mxu1 %vm203_vm1, %v9454_v13 }
  0xc7   :  { %7439 = vmatmul.mubr.msk.bf16.gmra.mrb[24].mxu0 %vm203_vm1, %v9488_v12 }
  0xc8   :  { %7781 = vmatmul.mubr.msk.bf16.gmra.mrb[24].mxu1 %vm203_vm1, %v9490_v62  ;;  %7442 = vmatprep.mubr.msk.bf16.mxu0 %vm203_vm1, %v9492_v63 }
  0xc9   :  { %7784 = vmatprep.mubr.msk.bf16.mxu1 %vm203_vm1, %v9494_v15 }
  0xcf   :  { %7443 = vmatmul.mubr.msk.bf16.gmra.mrb[28].mxu0 %vm203_vm1, %v724_v28 }
  0xd0   :  { %7785 = vmatmul.mubr.msk.bf16.gmra.mrb[28].mxu1 %vm203_vm1, %v3694_v29  ;;  %7446 = vmatprep.mubr.msk.bf16.mxu0 %vm203_vm1, %v725_v34 }
  0xd1   :  { %7788 = vmatprep.mubr.msk.bf16.mxu1 %vm203_vm1, %v3695_v35 }
  0xd7   :  { %7447 = vmatmul.mubr.msk.bf16.gmra.mrb[32].mxu0 %vm203_vm1, %v726_v40 }
  0xd8   :  { %7789 = vmatmul.mubr.msk.bf16.gmra.mrb[32].mxu1 %vm203_vm1, %v3696_v41  ;;  %7452 = vmatprep.mubr.msk.bf16.mxu0 %vm203_vm1, %v9224_v52  ;;  %v6737_v52 = vld [vmem:[%s12321_s1 + $0xa] sm:$0x3] }
  0xd9   :  { %7794 = vmatprep.mubr.msk.bf16.mxu1 %vm203_vm1, %v9232_v55  ;;  %v1033_v55 = vld [vmem:[%s12322_s0 + $0x122] sm:$0xff]  ;;  %v4728_v53 = vsel %vm258_vm0, %v6737_v52, 0 }
  0xdf   :  { %7453 = vmatmul.mubr.msk.bf16.vlgmr.msra.gmra.mrb[0].mxu0 %vm203_vm1, %v9236_v57  ;;  %v1034_v57 = vld [vmem:[%s12322_s0 + $0x12a] sm:$0xff] }
  0xe0   :  { %7795 = vmatmul.mubr.msk.bf16.vlgmr.msra.gmra.mrb[0].mxu1 %vm203_vm1, %v9240_v59  ;;  %7489 = vmatpush3.bf16.msra.mxu0 %v1436_v46  ;;  %v6625_v59 = vld [vmem:[%s12322_s0 + $0x26a] sm:$0xff] }
  0xe1   :  { %7831 = vmatpush3.bf16.msra.mxu1 %v4403_v47  ;;  %7456 = vmatprep.mubr.msk.bf16.mxu0 %vm203_vm1, %v9286_v6  ;;  %v1326_v6 = vld [vmem:[%s12322_s0 + $0x1b] sm:$0xff]  ;;  %v4336_v47 = vpack.c.bf16 %v6661_v37, %v6660_v36 }
  0xe2   :  { %7798 = vmatprep.mubr.msk.bf16.mxu1 %vm203_vm1, %v9290_v7  ;;  %8601 = vmatprep.subr.msk.bf16.mxu0 %vm258_vm0, %v9559_v48  ;;  %v6646_v7 = vld [vmem:[%s12322_s0 + $0x15b] sm:$0xff]  ;;  %v1369_v48 = vpack.c.bf16 %v1342_v39, %v1341_v38  ;;  %v6702_v39 = vld [vmem:[%s12322_s0 + $0x164] sm:$0xff] }
  0xe3   :  { %8610 = vmatprep.subr.msk.bf16.mxu1 %vm258_vm0, %v6737_v52  ;;  %v1651_v36 = vld [vmem:[%s12322_s0 + $0x14] sm:$0xff]  ;;  %v1652_v37 = vld [vmem:[%s12322_s0 + $0x1c] sm:$0xff] }
  0xe4   :  { %v6701_v38 = vld [vmem:[%s12322_s0 + $0x15c] sm:$0xff] }
  0xe7   :  { %7457 = vmatmul.mubr.msk.bf16.gmra.mrb[4].mxu0 %vm203_vm1, %v9292_v8  ;;  %v6647_v8 = vld [vmem:[%s12322_s0 + $0x163] sm:$0xff] }
  0xe8   :  { %7799 = vmatmul.mubr.msk.bf16.gmra.mrb[4].mxu1 %vm203_vm1, %v9294_v9  ;;  %7460 = vmatprep.mubr.msk.bf16.mxu0 %vm203_vm1, %v9328_v18  ;;  %v1052_v9 = vpack.c.bf16 %v1034_v57, %v1033_v55  ;;  %v4021_v18 = vpack.c.bf16 %v6626_v61, %v6625_v59  ;;  %v1343_v55 = vld [vmem:[%s12322_s0 + $0xa3] sm:$0xff]  ;;  %v1344_v57 = vld [vmem:[%s12322_s0 + $0xab] sm:$0xff]  ;;  %v6665_v61 = vld [vmem:[%s12322_s0 + $0x1f3] sm:$0xff] }
  0xe9   :  { %7802 = vmatprep.mubr.msk.bf16.mxu1 %vm203_vm1, %v9330_v19  ;;  %v1361_v19 = vpack.c.bf16 %v1326_v6, %v1325_v0  ;;  %v6664_v59 = vld [vmem:[%s12322_s0 + $0x1eb] sm:$0xff]  ;;  %v1345_v0 = vld [vmem:[%s12322_s0 + $0xb3] sm:$0xff]  ;;  %v1346_v6 = vld [vmem:[%s12322_s0 + $0xbb] sm:$0xff] }
  0xef   :  { %7461 = vmatmul.mubr.msk.bf16.gmra.mrb[8].mxu0 %vm203_vm1, %v9332_v20  ;;  %v4329_v20 = vpack.c.bf16 %v6647_v8, %v6646_v7  ;;  %v6666_v7 = vld [vmem:[%s12322_s0 + $0x1fb] sm:$0xff]  ;;  %v6667_v8 = vld [vmem:[%s12322_s0 + $0x203] sm:$0xff] }
  0xf0   :  { %7803 = vmatmul.mubr.msk.bf16.gmra.mrb[8].mxu1 %vm203_vm1, %v9334_v21  ;;  %7464 = vmatprep.mubr.msk.bf16.mxu0 %vm203_vm1, %v9368_v30  ;;  %v1327_v21 = vld [vmem:[%s12322_s0 + $0x23] sm:$0xff]  ;;  %v1328_v30 = vld [vmem:[%s12322_s0 + $0x2b] sm:$0xff] }
  0xf1   :  { %7806 = vmatprep.mubr.msk.bf16.mxu1 %vm203_vm1, %v9370_v31  ;;  %v6648_v31 = vld [vmem:[%s12322_s0 + $0x16b] sm:$0xff] }
  0xf7   :  { %7465 = vmatmul.mubr.msk.bf16.gmra.mrb[12].mxu0 %vm203_vm1, %v9372_v32  ;;  %v6649_v32 = vld [vmem:[%s12322_s0 + $0x173] sm:$0xff] }
  0xf8   :  { %7807 = vmatmul.mubr.msk.bf16.gmra.mrb[12].mxu1 %vm203_vm1, %v9374_v33  ;;  %7468 = vmatprep.mubr.msk.bf16.mxu0 %vm203_vm1, %v9408_v42  ;;  %v1329_v33 = vld [vmem:[%s12322_s0 + $0x33] sm:$0xff]  ;;  %v1330_v42 = vld [vmem:[%s12322_s0 + $0x3b] sm:$0xff]  ;;  %v4330_v49 = vpack.c.bf16 %v6649_v32, %v6648_v31  ;;  %v6668_v31 = vld [vmem:[%s12322_s0 + $0x20b] sm:$0xff] }
  0xf9   :  { %7810 = vmatprep.mubr.msk.bf16.mxu1 %vm203_vm1, %v9410_v43  ;;  %v1362_v43 = vpack.c.bf16 %v1328_v30, %v1327_v21  ;;  %v1363_v51 = vpack.c.bf16 %v1330_v42, %v1329_v33  ;;  %v1347_v21 = vld [vmem:[%s12322_s0 + $0xc3] sm:$0xff]  ;;  %v1348_v30 = vld [vmem:[%s12322_s0 + $0xcb] sm:$0xff]  ;;  %v6669_v32 = vld [vmem:[%s12322_s0 + $0x213] sm:$0xff] }
  0xfa   :  { %v1349_v33 = vld [vmem:[%s12322_s0 + $0xd3] sm:$0xff]  ;;  %v1350_v42 = vld [vmem:[%s12322_s0 + $0xdb] sm:$0xff] }
  0xff   :  { %7469 = vmatmul.mubr.msk.bf16.gmra.mrb[16].mxu0 %vm203_vm1, %v9412_v44  ;;  %v6650_v44 = vld [vmem:[%s12322_s0 + $0x17b] sm:$0xff] }
 0x100   :  { %7811 = vmatmul.mubr.msk.bf16.gmra.mrb[16].mxu1 %vm203_vm1, %v9414_v45  ;;  %7472 = vmatprep.mubr.msk.bf16.mxu0 %vm203_vm1, %v9448_v56  ;;  %v6651_v45 = vld [vmem:[%s12322_s0 + $0x183] sm:$0xff] }
 0x101   :  { %7814 = vmatprep.mubr.msk.bf16.mxu1 %vm203_vm1, %v9450_v58  ;;  %v4331_v54 = vpack.c.bf16 %v6651_v45, %v6650_v44  ;;  %v1331_v56 = vld [vmem:[%s12322_s0 + $0x43] sm:$0xff]  ;;  %v9685_v58 = vld [vmem:[%s12321_s1 + $0xc] sm:$0x3]  ;;  %v1372_v45 = vpack.c.bf16 %v1348_v30, %v1347_v21  ;;  %v9964_v30 = vld [vmem:[%s12321_s1 + $0xe] sm:$0x3] }
 0x102   :  { %v6671_v44 = vld [vmem:[%s12322_s0 + $0x223] sm:$0xff] }
 0x103   :  { %v1657_v21 = vld [vmem:[%s12322_s0 + $0x44] sm:$0xff] }
 0x107   :  { %7473 = vmatmul.mubr.msk.bf16.gmra.mrb[20].mxu0 %vm203_vm1, %v9452_v60  ;;  %v1332_v60 = vld [vmem:[%s12322_s0 + $0x4b] sm:$0xff] }
 0x108   :  { %7815 = vmatmul.mubr.msk.bf16.gmra.mrb[20].mxu1 %vm203_vm1, %v9454_v13  ;;  %7476 = vmatprep.mubr.msk.bf16.mxu0 %vm203_vm1, %v9488_v12  ;;  %v6652_v13 = vld [vmem:[%s12322_s0 + $0x18b] sm:$0xff]  ;;  %v1364_v10 = vpack.c.bf16 %v1332_v60, %v1331_v56  ;;  %v1365_v12 = vpack.c.bf16 %v1334_v3, %v1333_v2  ;;  %v6673_v60 = vld [vmem:[%s12322_s0 + $0x233] sm:$0xff]  ;;  %v6674_v2 = vld [vmem:[%s12322_s0 + $0x23b] sm:$0xff] }
 0x109   :  { %7818 = vmatprep.mubr.msk.bf16.mxu1 %vm203_vm1, %v9490_v62  ;;  %v4332_v11 = vpack.c.bf16 %v6653_v1, %v6652_v13  ;;  %v4333_v62 = vpack.c.bf16 %v6655_v5, %v6654_v4  ;;  %v6672_v56 = vld [vmem:[%s12322_s0 + $0x22b] sm:$0xff]  ;;  %v1353_v13 = vld [vmem:[%s12322_s0 + $0xf3] sm:$0xff]  ;;  %v1354_v1 = vld [vmem:[%s12322_s0 + $0xfb] sm:$0xff] }
 0x10a   :  { %v6675_v3 = vld [vmem:[%s12322_s0 + $0x243] sm:$0xff]  ;;  %v4342_v5 = vpack.c.bf16 %v6673_v60, %v6672_v56  ;;  %v6711_v56 = vld [vmem:[%s12322_s0 + $0x1ac] sm:$0xff]  ;;  %v6712_v60 = vld [vmem:[%s12322_s0 + $0x1b4] sm:$0xff] }
 0x10f   :  { %7477 = vmatmul.mubr.msk.bf16.gmra.mrb[24].mxu0 %vm203_vm1, %v9492_v63  ;;  %v1335_v63 = vld [vmem:[%s12322_s0 + $0x63] sm:$0xff] }
 0x110   :  { %7819 = vmatmul.mubr.msk.bf16.gmra.mrb[24].mxu1 %vm203_vm1, %v9494_v15  ;;  %7480 = vmatprep.mubr.msk.bf16.mxu0 %vm203_vm1, %v724_v28  ;;  %v1336_v15 = vld [vmem:[%s12322_s0 + $0x6b] sm:$0xff]  ;;  %v1367_v28 = vpack.c.bf16 %v1338_v23, %v1337_v22  ;;  %v6678_v22 = vld [vmem:[%s12322_s0 + $0x25b] sm:$0xff]  ;;  %v6679_v23 = vld [vmem:[%s12322_s0 + $0x263] sm:$0xff] }
 0x111   :  { %7822 = vmatprep.mubr.msk.bf16.mxu1 %vm203_vm1, %v3694_v29  ;;  %v1366_v26 = vpack.c.bf16 %v1336_v15, %v1335_v63  ;;  %v4335_v29 = vpack.c.bf16 %v6659_v25, %v6658_v24  ;;  %v6676_v63 = vld [vmem:[%s12322_s0 + $0x24b] sm:$0xff]  ;;  %v6677_v15 = vld [vmem:[%s12322_s0 + $0x253] sm:$0xff] }
 0x112   :  { %v4344_v25 = vpack.c.bf16 %v6677_v15, %v6676_v63  ;;  %v6715_v63 = vld [vmem:[%s12322_s0 + $0x1cc] sm:$0xff]  ;;  %v6716_v15 = vld [vmem:[%s12322_s0 + $0x1d4] sm:$0xff] }
 0x117   :  { %7481 = vmatmul.mubr.msk.bf16.gmra.mrb[28].mxu0 %vm203_vm1, %v725_v34  ;;  %v1339_v34 = vld [vmem:[%s12322_s0 + $0x83] sm:$0xff] }
 0x118   :  { %7823 = vmatmul.mubr.msk.bf16.gmra.mrb[28].mxu1 %vm203_vm1, %v3695_v35  ;;  %7484 = vmatprep.mubr.msk.bf16.mxu0 %vm203_vm1, %v726_v40  ;;  %v1340_v35 = vld [vmem:[%s12322_s0 + $0x8b] sm:$0xff]  ;;  %v6662_v40 = vld [vmem:[%s12322_s0 + $0x1db] sm:$0xff] }
 0x119   :  { %7826 = vmatprep.mubr.msk.bf16.mxu1 %vm203_vm1, %v3696_v41  ;;  %v6663_v41 = vld [vmem:[%s12322_s0 + $0x1e3] sm:$0xff]  ;;  %v1368_v46 = vpack.c.bf16 %v1340_v35, %v1339_v34  ;;  %v6680_v34 = vld [vmem:[%s12322_s0 + $0x26b] sm:$0xff]  ;;  %v6681_v35 = vld [vmem:[%s12322_s0 + $0x273] sm:$0xff] }
 0x11a   :  { %v4337_v52 = vpack.c.bf16 %v6663_v41, %v6662_v40  ;;  %v4346_v41 = vpack.c.bf16 %v6681_v35, %v6680_v34  ;;  %v6719_v34 = vld [vmem:[%s12322_s0 + $0x1ec] sm:$0xff]  ;;  %v6720_v35 = vld [vmem:[%s12322_s0 + $0x1f4] sm:$0xff] }
 0x11f   :  { %7485 = vmatmul.mubr.msk.bf16.gmra.mrb[32].mxu0 %vm203_vm1, %v1052_v9  ;;  %v1370_v9 = vpack.c.bf16 %v1344_v57, %v1343_v55  ;;  %v6703_v55 = vld [vmem:[%s12322_s0 + $0x16c] sm:$0xff]  ;;  %v6704_v57 = vld [vmem:[%s12322_s0 + $0x174] sm:$0xff] }
 0x120   :  { %7827 = vmatmul.mubr.msk.bf16.gmra.mrb[32].mxu1 %vm203_vm1, %v4021_v18  ;;  %7490 = vmatprep.mubr.msk.bf16.mxu0 %vm203_vm1, %v1361_v19  ;;  %v4338_v18 = vpack.c.bf16 %v6665_v61, %v6664_v59  ;;  %v1371_v19 = vpack.c.bf16 %v1346_v6, %v1345_v0  ;;  %v1655_v59 = vld [vmem:[%s12322_s0 + $0x34] sm:$0xff]  ;;  %v1656_v61 = vld [vmem:[%s12322_s0 + $0x3c] sm:$0xff] }
 0x121   :  { %7832 = vmatprep.mubr.msk.bf16.mxu1 %vm203_vm1, %v4329_v20  ;;  %v4339_v20 = vpack.c.bf16 %v6667_v8, %v6666_v7  ;;  %v6705_v6 = vld [vmem:[%s12322_s0 + $0x17c] sm:$0xff]  ;;  %v6706_v7 = vld [vmem:[%s12322_s0 + $0x184] sm:$0xff]  ;;  %v9946_v8 = vpack.c.bf16 %v6704_v57, %v6703_v55  ;;  %v6723_v55 = vld [vmem:[%s12322_s0 + $0x20c] sm:$0xff] }
 0x122   :  { %v6724_v57 = vld [vmem:[%s12322_s0 + $0x214] sm:$0xff] }
 0x127   :  { %7491 = vmatmul.mubr.msk.bf16.vlgmr.msra.gmra.mrb[0].mxu0 %vm203_vm1, %v1362_v43  ;;  %v6670_v43 = vld [vmem:[%s12322_s0 + $0x21b] sm:$0xff] }
 0x128   :  { %7833 = vmatmul.mubr.msk.bf16.vlgmr.msra.gmra.mrb[0].mxu1 %vm203_vm1, %v4330_v49  ;;  %7527 = vmatpush3.bf16.msra.mxu0 %v1762_v50  ;;  %v4340_v49 = vpack.c.bf16 %v6669_v32, %v6668_v31  ;;  %v1373_v50 = vpack.c.bf16 %v1350_v42, %v1349_v33  ;;  %v9977_v31 = vld [vmem:[%s12321_s1 + $0xe] sm:$0x3]  ;;  %v6708_v32 = vld [vmem:[%s12322_s0 + $0x194] sm:$0xff]  ;;  %v1660_v42 = vld [vmem:[%s12322_s0 + $0x5c] sm:$0xff] }
 0x129   :  { %7869 = vmatpush3.bf16.msra.mxu1 %v4728_v53  ;;  %7494 = vmatprep.mubr.msk.bf16.mxu0 %vm203_vm1, %v1363_v51  ;;  %v4341_v51 = vpack.c.bf16 %v6671_v44, %v6670_v43  ;;  %v1351_v53 = vld [vmem:[%s12322_s0 + $0xe3] sm:$0xff]  ;;  %v1659_v33 = vld [vmem:[%s12322_s0 + $0x54] sm:$0xff] }
 0x12a   :  { %7836 = vmatprep.mubr.msk.bf16.mxu1 %vm203_vm1, %v4331_v54  ;;  %8602 = vmatprep.subr.msk.bf16.mxu0 %vm258_vm0, %v9685_v58  ;;  %v1352_v54 = vld [vmem:[%s12322_s0 + $0xeb] sm:$0xff]  ;;  %v6709_v43 = vld [vmem:[%s12322_s0 + $0x19c] sm:$0xff] }
 0x12b   :  { %8611 = vmatprep.subr.msk.bf16.mxu1 %vm258_vm0, %v9697_v14  ;;  %v1374_v4 = vpack.c.bf16 %v1352_v54, %v1351_v53  ;;  %v6710_v44 = vld [vmem:[%s12322_s0 + $0x1a4] sm:$0xff]  ;;  %v1662_v54 = vld [vmem:[%s12322_s0 + $0x6c] sm:$0xff] }
 0x12c   :  { %v1661_v53 = vld [vmem:[%s12322_s0 + $0x64] sm:$0xff] }
 0x12f   :  { %7495 = vmatmul.mubr.msk.bf16.gmra.mrb[4].mxu0 %vm203_vm1, %v1364_v10  ;;  %v1375_v10 = vpack.c.bf16 %v1354_v1, %v1353_v13  ;;  %v1663_v13 = vld [vmem:[%s12322_s0 + $0x74] sm:$0xff]  ;;  %v1664_v1 = vld [vmem:[%s12322_s0 + $0x7c] sm:$0xff] }
 0x130   :  { %7837 = vmatmul.mubr.msk.bf16.gmra.mrb[4].mxu1 %vm203_vm1, %v4332_v11  ;;  %7498 = vmatprep.mubr.msk.bf16.mxu0 %vm203_vm1, %v1365_v12  ;;  %v4343_v11 = vpack.c.bf16 %v6675_v3, %v6674_v2  ;;  %v1355_v12 = vld [vmem:[%s12322_s0 + $0x103] sm:$0xff] }
 0x131   :  { %7840 = vmatprep.mubr.msk.bf16.mxu1 %vm203_vm1, %v4333_v62  ;;  %v1356_v62 = vld [vmem:[%s12322_s0 + $0x10b] sm:$0xff]  ;;  %v6713_v2 = vld [vmem:[%s12322_s0 + $0x1bc] sm:$0xff] }
 0x132   :  { %v1376_v24 = vpack.c.bf16 %v1356_v62, %v1355_v12  ;;  %v6714_v3 = vld [vmem:[%s12322_s0 + $0x1c4] sm:$0xff]  ;;  %v1666_v62 = vld [vmem:[%s12322_s0 + $0x8c] sm:$0xff] }
 0x133   :  { %v1665_v12 = vld [vmem:[%s12322_s0 + $0x84] sm:$0xff] }
 0x137   :  { %7499 = vmatmul.mubr.msk.bf16.gmra.mrb[8].mxu0 %vm203_vm1, %v1366_v26  ;;  %v1377_v26 = vpack.c.bf16 %v1358_v17, %v1357_v16  ;;  %v1667_v16 = vld [vmem:[%s12322_s0 + $0x94] sm:$0xff]  ;;  %v1668_v17 = vld [vmem:[%s12322_s0 + $0x9c] sm:$0xff] }
 0x138   :  { %7841 = vmatmul.mubr.msk.bf16.gmra.mrb[8].mxu1 %vm203_vm1, %v4334_v27  ;;  %7502 = vmatprep.mubr.msk.bf16.mxu0 %vm203_vm1, %v1367_v28  ;;  %v4345_v27 = vpack.c.bf16 %v6679_v23, %v6678_v22  ;;  %v1359_v28 = vld [vmem:[%s12322_s0 + $0x123] sm:$0xff] }
 0x139   :  { %7844 = vmatprep.mubr.msk.bf16.mxu1 %vm203_vm1, %v4335_v29  ;;  %v1360_v29 = vld [vmem:[%s12322_s0 + $0x12b] sm:$0xff]  ;;  %v6717_v22 = vld [vmem:[%s12322_s0 + $0x1dc] sm:$0xff] }
 0x13a   :  { %v1378_v40 = vpack.c.bf16 %v1360_v29, %v1359_v28  ;;  %v6718_v23 = vld [vmem:[%s12322_s0 + $0x1e4] sm:$0xff]  ;;  %v1670_v29 = vld [vmem:[%s12322_s0 + $0xac] sm:$0xff] }
 0x13b   :  { %v1669_v28 = vld [vmem:[%s12322_s0 + $0xa4] sm:$0xff] }
 0x13f   :  { %7503 = vmatmul.mubr.msk.bf16.gmra.mrb[12].mxu0 %vm203_vm1, %v1368_v46  ;;  %v1687_v46 = vpack.c.bf16 %v1652_v37, %v1651_v36  ;;  %v1671_v36 = vld [vmem:[%s12322_s0 + $0xb4] sm:$0xff]  ;;  %v1672_v37 = vld [vmem:[%s12322_s0 + $0xbc] sm:$0xff] }
 0x140   :  { %7845 = vmatmul.mubr.msk.bf16.gmra.mrb[12].mxu1 %vm203_vm1, %v4336_v47  ;;  %7506 = vmatprep.mubr.msk.bf16.mxu0 %vm203_vm1, %v1369_v48  ;;  %v4654_v47 = vpack.c.bf16 %v6702_v39, %v6701_v38  ;;  %v1653_v48 = vld [vmem:[%s12322_s0 + $0x24] sm:$0xff]  ;;  %v6721_v38 = vld [vmem:[%s12322_s0 + $0x1fc] sm:$0xff] }
 0x141   :  { %7848 = vmatprep.mubr.msk.bf16.mxu1 %vm203_vm1, %v4337_v52  ;;  %v1654_v52 = vld [vmem:[%s12322_s0 + $0x2c] sm:$0xff]  ;;  %v6722_v39 = vld [vmem:[%s12322_s0 + $0x204] sm:$0xff] }
 0x142   :  { %v9938_v0 = vpack.c.bf16 %v1654_v52, %v1653_v48  ;;  %v1673_v48 = vld [vmem:[%s12322_s0 + $0xc4] sm:$0xff]  ;;  %v1674_v52 = vld [vmem:[%s12322_s0 + $0xcc] sm:$0xff] }
 0x147   :  { %7507 = vmatmul.mubr.msk.bf16.gmra.mrb[16].mxu0 %vm203_vm1, %v1370_v9  ;;  %v2088_v9 = vsel %vm258_vm0, %v9685_v58, 0  ;;  %v1658_v58 = vld [vmem:[%s12322_s0 + $0x4c] sm:$0xff] }
 0x148   :  { %7849 = vmatmul.mubr.msk.bf16.gmra.mrb[16].mxu1 %vm203_vm1, %v4338_v18  ;;  %7510 = vmatprep.mubr.msk.bf16.mxu0 %vm203_vm1, %v1371_v19  ;;  %v9950_v18 = vpack.c.bf16 %v1656_v61, %v1655_v59  ;;  %v5053_v19 = vsel %vm258_vm0, %v9697_v14, 0  ;;  %v6707_v14 = vld [vmem:[%s12322_s0 + $0x18c] sm:$0xff]  ;;  %v1675_v59 = vld [vmem:[%s12322_s0 + $0xd4] sm:$0xff]  ;;  %v1676_v61 = vld [vmem:[%s12322_s0 + $0xdc] sm:$0xff] }
 0x149   :  { %7852 = vmatprep.mubr.msk.bf16.mxu1 %vm203_vm1, %v4339_v20  ;;  %v9954_v20 = vpack.c.bf16 %v6706_v7, %v6705_v6  ;;  %v6725_v6 = vld [vmem:[%s12322_s0 + $0x21c] sm:$0xff]  ;;  %v6726_v7 = vld [vmem:[%s12322_s0 + $0x224] sm:$0xff] }
 0x14f   :  { %7511 = vmatmul.mubr.msk.bf16.gmra.mrb[20].mxu0 %vm203_vm1, %v1372_v45  ;;  %v10000_v45 = vpack.c.bf16 %v1658_v58, %v1657_v21  ;;  %v10166_v21 = vpack.c.bf16 %v1676_v61, %v1675_v59  ;;  %v10168_v58 = vpack.c.bf16 %v6726_v7, %v6725_v6 }
 0x150   :  { %7853 = vmatmul.mubr.msk.bf16.gmra.mrb[20].mxu1 %vm203_vm1, %v4340_v49  ;;  %7514 = vmatprep.mubr.msk.bf16.mxu0 %vm203_vm1, %v1373_v50  ;;  %v10004_v49 = vpack.c.bf16 %v6708_v32, %v6707_v14  ;;  %v10006_v50 = vpack.c.bf16 %v1660_v42, %v1659_v33  ;;  %v1677_v14 = vld [vmem:[%s12322_s0 + $0xe4] sm:$0xff]  ;;  %v1678_v32 = vld [vmem:[%s12322_s0 + $0xec] sm:$0xff]  ;;  %v6728_v42 = vld [vmem:[%s12322_s0 + $0x234] sm:$0xff] }
 0x151   :  { %7856 = vmatprep.mubr.msk.bf16.mxu1 %vm203_vm1, %v4341_v51  ;;  %v10008_v51 = vpack.c.bf16 %v6710_v44, %v6709_v43  ;;  %v6727_v33 = vld [vmem:[%s12322_s0 + $0x22c] sm:$0xff]  ;;  %v1679_v43 = vld [vmem:[%s12322_s0 + $0xf4] sm:$0xff]  ;;  %v1680_v44 = vld [vmem:[%s12322_s0 + $0xfc] sm:$0xff] }
 0x157   :  { %7515 = vmatmul.mubr.msk.bf16.gmra.mrb[24].mxu0 %vm203_vm1, %v1374_v4  ;;  %v10042_v4 = vpack.c.bf16 %v1662_v54, %v1661_v53  ;;  %v6729_v53 = vld [vmem:[%s12322_s0 + $0x23c] sm:$0xff]  ;;  %v6730_v54 = vld [vmem:[%s12322_s0 + $0x244] sm:$0xff] }
 0x158   :  { %7857 = vmatmul.mubr.msk.bf16.gmra.mrb[24].mxu1 %vm203_vm1, %v4342_v5  ;;  %7518 = vmatprep.mubr.msk.bf16.mxu0 %vm203_vm1, %v1375_v10  ;;  %v10044_v5 = vpack.c.bf16 %v6712_v60, %v6711_v56  ;;  %v10046_v10 = vpack.c.bf16 %v1664_v1, %v1663_v13  ;;  %v10202_v56 = vpack.c.bf16 %v1678_v32, %v1677_v14  ;;  %v2311_v14 = vld [vmem:[%s12322_s0 + $0x65] sm:$0xff]  ;;  %v2312_v32 = vld [vmem:[%s12322_s0 + $0x6d] sm:$0xff] }
 0x159   :  { %7860 = vmatprep.mubr.msk.bf16.mxu1 %vm203_vm1, %v4343_v11  ;;  %v10048_v11 = vpack.c.bf16 %v6714_v3, %v6713_v2  ;;  %v10204_v60 = vpack.c.bf16 %v6728_v42, %v6727_v33  ;;  %v10206_v13 = vpack.c.bf16 %v1680_v44, %v1679_v43  ;;  %v10208_v1 = vpack.c.bf16 %v6730_v54, %v6729_v53  ;;  %v1681_v2 = vld [vmem:[%s12322_s0 + $0x104] sm:$0xff]  ;;  %v1682_v3 = vld [vmem:[%s12322_s0 + $0x10c] sm:$0xff]  ;;  %v6820_v42 = vld [vmem:[%s12322_s0 + $0x1b5] sm:$0xff] }
 0x15a   :  { %v6819_v33 = vld [vmem:[%s12322_s0 + $0x1ad] sm:$0xff]  ;;  %v2343_v53 = vpack.c.bf16 %v2312_v32, %v2311_v14  ;;  %v6840_v14 = vld [vmem:[%s12322_s0 + $0x255] sm:$0xff] }
 0x15b   :  { %v5308_v54 = vpack.c.bf16 %v6820_v42, %v6819_v33 }
 0x15f   :  { %7519 = vmatmul.mubr.msk.bf16.gmra.mrb[28].mxu0 %vm203_vm1, %v1376_v24  ;;  %v10082_v24 = vpack.c.bf16 %v1666_v62, %v1665_v12  ;;  %v6731_v12 = vld [vmem:[%s12322_s0 + $0x24c] sm:$0xff]  ;;  %v6732_v62 = vld [vmem:[%s12322_s0 + $0x254] sm:$0xff] }
 0x160   :  { %7861 = vmatmul.mubr.msk.bf16.gmra.mrb[28].mxu1 %vm203_vm1, %v4344_v25  ;;  %7522 = vmatprep.mubr.msk.bf16.mxu0 %vm203_vm1, %v1377_v26  ;;  %v10084_v25 = vpack.c.bf16 %v6716_v15, %v6715_v63  ;;  %v10086_v26 = vpack.c.bf16 %v1668_v17, %v1667_v16  ;;  %v1683_v63 = vld [vmem:[%s12322_s0 + $0x114] sm:$0xff]  ;;  %v1684_v15 = vld [vmem:[%s12322_s0 + $0x11c] sm:$0xff]  ;;  %v6734_v17 = vld [vmem:[%s12322_s0 + $0x264] sm:$0xff] }
 0x161   :  { %7864 = vmatprep.mubr.msk.bf16.mxu1 %vm203_vm1, %v4345_v27  ;;  %v10088_v27 = vpack.c.bf16 %v6718_v23, %v6717_v22  ;;  %v6733_v16 = vld [vmem:[%s12322_s0 + $0x25c] sm:$0xff]  ;;  %v1702_v22 = vpack.c.bf16 %v1682_v3, %v1681_v2  ;;  %v4669_v23 = vpack.c.bf16 %v6732_v62, %v6731_v12  ;;  %v10447_v2 = vld [vmem:[%s12322_s0 + $0x85] sm:$0xff]  ;;  %v10452_v3 = vld [vmem:[%s12322_s0 + $0x8d] sm:$0xff]  ;;  %v8615_v12 = vmov 0.0  }
 0x162   :  { %22 = vst.msk [vmem:[%s12323_s3 + $0x10] sm:$0xff] %vm19_vm2, %v8615_v12  ;;  %20 = vst.msk [vmem:[%s12323_s3] sm:$0xff] %vm19_vm2, %v8615_v12  ;;  %v6823_v62 = vld [vmem:[%s12322_s0 + $0x1cd] sm:$0xff] }
 0x163   :  { %21 = vst.msk [vmem:[%s12323_s3 + $0x8] sm:$0xff] %vm19_vm2, %v8615_v12  ;;  %23 = vst.msk [vmem:[%s12323_s3 + $0x18] sm:$0xff] %vm19_vm2, %v8615_v12 }
 0x164   :  { %24 = vst.msk [vmem:[%s12323_s3 + $0x20] sm:$0xff] %vm19_vm2, %v8615_v12  ;;  %25 = vst.msk [vmem:[%s12323_s3 + $0x28] sm:$0xff] %vm19_vm2, %v8615_v12 }
 0x165   :  { %26 = vst.msk [vmem:[%s12323_s3 + $0x30] sm:$0xff] %vm19_vm2, %v8615_v12  ;;  %27 = vst.msk [vmem:[%s12323_s3 + $0x38] sm:$0xff] %vm19_vm2, %v8615_v12 }
 0x166   :  { %28 = vst.msk [vmem:[%s12323_s3 + $0x40] sm:$0xff] %vm19_vm2, %v8615_v12  ;;  %29 = vst.msk [vmem:[%s12323_s3 + $0x48] sm:$0xff] %vm19_vm2, %v8615_v12 }
 0x167   :  { %7523 = vmatmul.mubr.msk.bf16.gmra.mrb[32].mxu0 %vm203_vm1, %v1378_v40  ;;  %v10122_v40 = vpack.c.bf16 %v1670_v29, %v1669_v28  ;;  %v1703_v28 = vpack.c.bf16 %v1684_v15, %v1683_v63  ;;  %v4670_v29 = vpack.c.bf16 %v6734_v17, %v6733_v16  ;;  %30 = vst.msk [vmem:[%s12323_s3 + $0x50] sm:$0xff] %vm19_vm2, %v8615_v12  ;;  %31 = vst.msk [vmem:[%s12323_s3 + $0x58] sm:$0xff] %vm19_vm2, %v8615_v12  ;;  %v6824_v63 = vld [vmem:[%s12322_s0 + $0x1d5] sm:$0xff] }
 0x168   :  { %7865 = vmatmul.mubr.msk.bf16.gmra.mrb[32].mxu1 %vm203_vm1, %v4346_v41  ;;  %7528 = vmatprep.mubr.msk.bf16.mxu0 %vm203_vm1, %v1687_v46  ;;  %v10124_v41 = vpack.c.bf16 %v6720_v35, %v6719_v34  ;;  %v10126_v46 = vpack.c.bf16 %v1672_v37, %v1671_v36  ;;  %v1685_v34 = vld [vmem:[%s12322_s0 + $0x124] sm:$0xff]  ;;  %v1686_v35 = vld [vmem:[%s12322_s0 + $0x12c] sm:$0xff]  ;;  %v6736_v37 = vld [vmem:[%s12322_s0 + $0x274] sm:$0xff]  ;;  %32 = vst.msk [vmem:[%s12323_s3 + $0x60] sm:$0xff] %vm19_vm2, %v8615_v12 }
 0x169   :  { %7870 = vmatprep.mubr.msk.bf16.mxu1 %vm203_vm1, %v4654_v47  ;;  %v10128_v47 = vpack.c.bf16 %v6722_v39, %v6721_v38  ;;  %v6735_v36 = vld [vmem:[%s12322_s0 + $0x26c] sm:$0xff]  ;;  %v1704_v38 = vpack.c.bf16 %v1686_v35, %v1685_v34  ;;  %33 = vst.msk [vmem:[%s12323_s3 + $0x68] sm:$0xff] %vm19_vm2, %v8615_v12  ;;  %34 = vst.msk [vmem:[%s12323_s3 + $0x70] sm:$0xff] %vm19_vm2, %v8615_v12  ;;  %v2345_v17 = vpack.c.bf16 %v10452_v3, %v10447_v2  ;;  %v6844_v2 = vld [vmem:[%s12322_s0 + $0x275] sm:$0xff] }
 0x16a   :  { %v4671_v39 = vpack.c.bf16 %v6736_v37, %v6735_v36  ;;  %35 = vst.msk [vmem:[%s12323_s3 + $0x78] sm:$0xff] %vm19_vm2, %v8615_v12  ;;  %36 = vst.msk [vmem:[%s12323_s3 + $0x80] sm:$0xff] %vm19_vm2, %v8615_v12  ;;  %v6826_v34 = vld [vmem:[%s12322_s0 + $0x1e5] sm:$0xff]  ;;  %v2320_v36 = vld [vmem:[%s12322_s0 + $0xad] sm:$0xff] }
 0x16b   :  { %37 = vst.msk [vmem:[%s12323_s3 + $0x88] sm:$0xff] %vm19_vm2, %v8615_v12  ;;  %38 = vst.msk [vmem:[%s12323_s3 + $0x90] sm:$0xff] %vm19_vm2, %v8615_v12  ;;  %v2319_v35 = vld [vmem:[%s12322_s0 + $0xa5] sm:$0xff]  ;;  %v6827_v37 = vld [vmem:[%s12322_s0 + $0x1ed] sm:$0xff] }
 0x16c   :  { %39 = vst.msk [vmem:[%s12323_s3 + $0x98] sm:$0xff] %vm19_vm2, %v8615_v12  ;;  %40 = vst.msk [vmem:[%s12323_s3 + $0xa0] sm:$0xff] %vm19_vm2, %v8615_v12 }
 0x16d   :  { %41 = vst.msk [vmem:[%s12323_s3 + $0xa8] sm:$0xff] %vm19_vm2, %v8615_v12  ;;  %42 = vst.msk [vmem:[%s12323_s3 + $0xb0] sm:$0xff] %vm19_vm2, %v8615_v12 }
 0x16e   :  { %43 = vst.msk [vmem:[%s12323_s3 + $0xb8] sm:$0xff] %vm19_vm2, %v8615_v12  ;;  %44 = vst.msk [vmem:[%s12323_s3 + $0xc0] sm:$0xff] %vm19_vm2, %v8615_v12 }
 0x16f   :  { %7529 = vmatmul.mubr.msk.bf16.vlgmr.msra.gmra.mrb[0].mxu0 %vm203_vm1, %v9938_v0  ;;  %45 = vst.msk [vmem:[%s12323_s3 + $0xc8] sm:$0xff] %vm19_vm2, %v8615_v12  ;;  %46 = vst.msk [vmem:[%s12323_s3 + $0xd0] sm:$0xff] %vm19_vm2, %v8615_v12 }
 0x170   :  { %7871 = vmatmul.mubr.msk.bf16.vlgmr.msra.gmra.mrb[0].mxu1 %vm203_vm1, %v9946_v8  ;;  %7565 = vmatpush3.bf16.msra.mxu0 %v2088_v9  ;;  %v10162_v9 = vpack.c.bf16 %v1674_v52, %v1673_v48  ;;  %v2414_v48 = vsel %vm258_vm0, %v9964_v30, 0  ;;  %v5378_v52 = vsel %vm258_vm0, %v9977_v31, 0  ;;  %47 = vst.msk [vmem:[%s12323_s3 + $0xd8] sm:$0xff] %vm19_vm2, %v8615_v12  ;;  %48 = vst.msk [vmem:[%s12323_s3 + $0xe0] sm:$0xff] %vm19_vm2, %v8615_v12 }
 0x171   :  { %7907 = vmatpush3.bf16.msra.mxu1 %v5053_v19  ;;  %7532 = vmatprep.mubr.msk.bf16.mxu0 %vm203_vm1, %v9950_v18  ;;  %v10164_v19 = vpack.c.bf16 %v6724_v57, %v6723_v55  ;;  %v10273_v55 = vld [vmem:[%s12321_s1 + $0x10] sm:$0x3]  ;;  %49 = vst.msk [vmem:[%s12323_s3 + $0xe8] sm:$0xff] %vm19_vm2, %v8615_v12  ;;  %50 = vst.msk [vmem:[%s12323_s3 + $0xf0] sm:$0xff] %vm19_vm2, %v8615_v12 }
 0x172   :  { %7874 = vmatprep.mubr.msk.bf16.mxu1 %vm203_vm1, %v9954_v20  ;;  %8603 = vmatprep.subr.msk.bf16.mxu0 %vm258_vm0, %v9964_v30  ;;  %v6791_v30 = vld [vmem:[%s12322_s0 + $0x284] sm:$0xff]  ;;  %v2740_v59 = vsel %vm258_vm0, %v10273_v55, 0  ;;  %51 = vst.msk [vmem:[%s12323_s3 + $0xf8] sm:$0xff] %vm19_vm2, %v8615_v12  ;;  %52 = vst.msk [vmem:[%s12323_s3 + $0x100] sm:$0xff] %vm19_vm2, %v8615_v12 }
 0x173   :  { %8612 = vmatprep.subr.msk.bf16.mxu1 %vm258_vm0, %v9977_v31  ;;  %v2303_v31 = vld [vmem:[%s12322_s0 + $0x25] sm:$0xff]  ;;  %53 = vst.msk [vmem:[%s12323_s3 + $0x108] sm:$0xff] %vm19_vm2, %v8615_v12  ;;  %54 = vst.msk [vmem:[%s12323_s3 + $0x110] sm:$0xff] %vm19_vm2, %v8615_v12 }
 0x174   :  { %55 = vst.msk [vmem:[%s12323_s3 + $0x118] sm:$0xff] %vm19_vm2, %v8615_v12  ;;  %56 = vst.msk [vmem:[%s12323_s3 + $0x120] sm:$0xff] %vm19_vm2, %v8615_v12 }
 0x175   :  { %57 = vst.msk [vmem:[%s12323_s3 + $0x128] sm:$0xff] %vm19_vm2, %v8615_v12  ;;  %58 = vst.msk [vmem:[%s12323_s3 + $0x130] sm:$0xff] %vm19_vm2, %v8615_v12 }
 0x176   :  { %59 = vst.msk [vmem:[%s12323_s3 + $0x138] sm:$0xff] %vm19_vm2, %v8615_v12  ;;  %60 = vst.msk [vmem:[%s12323_s3 + $0x140] sm:$0xff] %vm19_vm2, %v8615_v12 }
 0x177   :  { %7533 = vmatmul.mubr.msk.bf16.gmra.mrb[4].mxu0 %vm203_vm1, %v10000_v45  ;;  %61 = vst.msk [vmem:[%s12323_s3 + $0x148] sm:$0xff] %vm19_vm2, %v8615_v12  ;;  %62 = vst.msk [vmem:[%s12323_s3 + $0x150] sm:$0xff] %vm19_vm2, %v8615_v12 }
 0x178   :  { %7875 = vmatmul.mubr.msk.bf16.gmra.mrb[4].mxu1 %vm203_vm1, %v10004_v49  ;;  %7536 = vmatprep.mubr.msk.bf16.mxu0 %vm203_vm1, %v10006_v50  ;;  %63 = vst.msk [vmem:[%s12323_s3 + $0x158] sm:$0xff] %vm19_vm2, %v8615_v12  ;;  %64 = vst.msk [vmem:[%s12323_s3 + $0x160] sm:$0xff] %vm19_vm2, %v8615_v12 }
 0x179   :  { %7878 = vmatprep.mubr.msk.bf16.mxu1 %vm203_vm1, %v10008_v51  ;;  %65 = vst.msk [vmem:[%s12323_s3 + $0x168] sm:$0xff] %vm19_vm2, %v8615_v12  ;;  %66 = vst.msk [vmem:[%s12323_s3 + $0x170] sm:$0xff] %vm19_vm2, %v8615_v12 }
 0x17a   :  { %67 = vst.msk [vmem:[%s12323_s3 + $0x178] sm:$0xff] %vm19_vm2, %v8615_v12  ;;  %68 = vst.msk [vmem:[%s12323_s3 + $0x180] sm:$0xff] %vm19_vm2, %v8615_v12 }
 0x17b   :  { %69 = vst.msk [vmem:[%s12323_s3 + $0x188] sm:$0xff] %vm19_vm2, %v8615_v12  ;;  %70 = vst.msk [vmem:[%s12323_s3 + $0x190] sm:$0xff] %vm19_vm2, %v8615_v12 }
 0x17c   :  { %71 = vst.msk [vmem:[%s12323_s3 + $0x198] sm:$0xff] %vm19_vm2, %v8615_v12  ;;  %72 = vst.msk [vmem:[%s12323_s3 + $0x1a0] sm:$0xff] %vm19_vm2, %v8615_v12 }
 0x17d   :  { %73 = vst.msk [vmem:[%s12323_s3 + $0x1a8] sm:$0xff] %vm19_vm2, %v8615_v12  ;;  %74 = vst.msk [vmem:[%s12323_s3 + $0x1b0] sm:$0xff] %vm19_vm2, %v8615_v12 }
 0x17e   :  { %75 = vst.msk [vmem:[%s12323_s3 + $0x1b8] sm:$0xff] %vm19_vm2, %v8615_v12  ;;  %76 = vst.msk [vmem:[%s12323_s3 + $0x1c0] sm:$0xff] %vm19_vm2, %v8615_v12 }
 0x17f   :  { %7537 = vmatmul.mubr.msk.bf16.gmra.mrb[8].mxu0 %vm203_vm1, %v10042_v4  ;;  %77 = vst.msk [vmem:[%s12323_s3 + $0x1c8] sm:$0xff] %vm19_vm2, %v8615_v12  ;;  %78 = vst.msk [vmem:[%s12323_s3 + $0x1d0] sm:$0xff] %vm19_vm2, %v8615_v12 }
 0x180   :  { %7879 = vmatmul.mubr.msk.bf16.gmra.mrb[8].mxu1 %vm203_vm1, %v10044_v5  ;;  %7540 = vmatprep.mubr.msk.bf16.mxu0 %vm203_vm1, %v10046_v10  ;;  %79 = vst.msk [vmem:[%s12323_s3 + $0x1d8] sm:$0xff] %vm19_vm2, %v8615_v12  ;;  %80 = vst.msk [vmem:[%s12323_s3 + $0x1e0] sm:$0xff] %vm19_vm2, %v8615_v12 }
 0x181   :  { %7882 = vmatprep.mubr.msk.bf16.mxu1 %vm203_vm1, %v10048_v11  ;;  %81 = vst.msk [vmem:[%s12323_s3 + $0x1e8] sm:$0xff] %vm19_vm2, %v8615_v12  ;;  %82 = vst.msk [vmem:[%s12323_s3 + $0x1f0] sm:$0xff] %vm19_vm2, %v8615_v12 }
 0x182   :  { %83 = vst.msk [vmem:[%s12323_s3 + $0x1f8] sm:$0xff] %vm19_vm2, %v8615_v12  ;;  %84 = vst.msk [vmem:[%s12323_s3 + $0x200] sm:$0xff] %vm19_vm2, %v8615_v12 }
 0x183   :  { %85 = vst.msk [vmem:[%s12323_s3 + $0x208] sm:$0xff] %vm19_vm2, %v8615_v12  ;;  %86 = vst.msk [vmem:[%s12323_s3 + $0x210] sm:$0xff] %vm19_vm2, %v8615_v12 }
 0x184   :  { %87 = vst.msk [vmem:[%s12323_s3 + $0x218] sm:$0xff] %vm19_vm2, %v8615_v12  ;;  %88 = vst.msk [vmem:[%s12323_s3 + $0x220] sm:$0xff] %vm19_vm2, %v8615_v12 }
 0x185   :  { %89 = vst.msk [vmem:[%s12323_s3 + $0x228] sm:$0xff] %vm19_vm2, %v8615_v12  ;;  %90 = vst.msk [vmem:[%s12323_s3 + $0x230] sm:$0xff] %vm19_vm2, %v8615_v12 }
 0x186   :  { %91 = vst.msk [vmem:[%s12323_s3 + $0x238] sm:$0xff] %vm19_vm2, %v8615_v12 }
 0x187   :  { %7541 = vmatmul.mubr.msk.bf16.gmra.mrb[12].mxu0 %vm203_vm1, %v10082_v24 }
 0x188   :  { %7883 = vmatmul.mubr.msk.bf16.gmra.mrb[12].mxu1 %vm203_vm1, %v10084_v25  ;;  %7544 = vmatprep.mubr.msk.bf16.mxu0 %vm203_vm1, %v10086_v26 }
 0x189   :  { %7886 = vmatprep.mubr.msk.bf16.mxu1 %vm203_vm1, %v10088_v27 }
 0x18f   :  { %7545 = vmatmul.mubr.msk.bf16.gmra.mrb[16].mxu0 %vm203_vm1, %v10122_v40 }
 0x190   :  { %7887 = vmatmul.mubr.msk.bf16.gmra.mrb[16].mxu1 %vm203_vm1, %v10124_v41  ;;  %7548 = vmatprep.mubr.msk.bf16.mxu0 %vm203_vm1, %v10126_v46 }
 0x191   :  { %7890 = vmatprep.mubr.msk.bf16.mxu1 %vm203_vm1, %v10128_v47 }
 0x197   :  { %7549 = vmatmul.mubr.msk.bf16.gmra.mrb[20].mxu0 %vm203_vm1, %v10162_v9 }
 0x198   :  { %7891 = vmatmul.mubr.msk.bf16.gmra.mrb[20].mxu1 %vm203_vm1, %v10164_v19  ;;  %7552 = vmatprep.mubr.msk.bf16.mxu0 %vm203_vm1, %v10166_v21 }
 0x199   :  { %7894 = vmatprep.mubr.msk.bf16.mxu1 %vm203_vm1, %v10168_v58 }
 0x19f   :  { %7553 = vmatmul.mubr.msk.bf16.gmra.mrb[24].mxu0 %vm203_vm1, %v10202_v56 }
 0x1a0   :  { %7895 = vmatmul.mubr.msk.bf16.gmra.mrb[24].mxu1 %vm203_vm1, %v10204_v60  ;;  %7556 = vmatprep.mubr.msk.bf16.mxu0 %vm203_vm1, %v10206_v13 }
 0x1a1   :  { %7898 = vmatprep.mubr.msk.bf16.mxu1 %vm203_vm1, %v10208_v1 }
 0x1a7   :  { %7557 = vmatmul.mubr.msk.bf16.gmra.mrb[28].mxu0 %vm203_vm1, %v1702_v22 }
 0x1a8   :  { %7899 = vmatmul.mubr.msk.bf16.gmra.mrb[28].mxu1 %vm203_vm1, %v4669_v23  ;;  %7560 = vmatprep.mubr.msk.bf16.mxu0 %vm203_vm1, %v1703_v28 }
 0x1a9   :  { %7902 = vmatprep.mubr.msk.bf16.mxu1 %vm203_vm1, %v4670_v29 }
 0x1af   :  { %7561 = vmatmul.mubr.msk.bf16.gmra.mrb[32].mxu0 %vm203_vm1, %v1704_v38 }
 0x1b0   :  { %7903 = vmatmul.mubr.msk.bf16.gmra.mrb[32].mxu1 %vm203_vm1, %v4671_v39  ;;  %7566 = vmatprep.mubr.msk.bf16.mxu0 %vm203_vm1, %v9938_v0  ;;  %v6902_v0 = vld [vmem:[%s12321_s1 + $0x10] sm:$0x3] }
 0x1b1   :  { %7908 = vmatprep.mubr.msk.bf16.mxu1 %vm203_vm1, %v9946_v8  ;;  %v2011_v8 = vld [vmem:[%s12322_s0 + $0x134] sm:$0xff]  ;;  %v5703_v6 = vsel %vm258_vm0, %v6902_v0, 0 }
 0x1b7   :  { %7567 = vmatmul.mubr.msk.bf16.vlgmr.msra.gmra.mrb[0].mxu0 %vm203_vm1, %v9950_v18  ;;  %v2012_v18 = vld [vmem:[%s12322_s0 + $0x13c] sm:$0xff] }
 0x1b8   :  { %7909 = vmatmul.mubr.msk.bf16.vlgmr.msra.gmra.mrb[0].mxu1 %vm203_vm1, %v9954_v20  ;;  %7603 = vmatpush3.bf16.msra.mxu0 %v2414_v48  ;;  %v6790_v20 = vld [vmem:[%s12322_s0 + $0x27c] sm:$0xff] }
 0x1b9   :  { %7945 = vmatpush3.bf16.msra.mxu1 %v5378_v52  ;;  %7570 = vmatprep.mubr.msk.bf16.mxu0 %vm203_vm1, %v10000_v45  ;;  %v2304_v45 = vld [vmem:[%s12322_s0 + $0x2d] sm:$0xff]  ;;  %v2347_v52 = vpack.c.bf16 %v2320_v36, %v2319_v35 }
 0x1ba   :  { %7912 = vmatprep.mubr.msk.bf16.mxu1 %vm203_vm1, %v10004_v49  ;;  %8604 = vmatprep.subr.msk.bf16.mxu0 %vm258_vm0, %v10273_v55  ;;  %v6811_v49 = vld [vmem:[%s12322_s0 + $0x16d] sm:$0xff] }
 0x1bb   :  { %8613 = vmatprep.subr.msk.bf16.mxu1 %vm258_vm0, %v6902_v0  ;;  %v2321_v0 = vld [vmem:[%s12322_s0 + $0xb5] sm:$0xff] }
 0x1bf   :  { %7571 = vmatmul.mubr.msk.bf16.gmra.mrb[4].mxu0 %vm203_vm1, %v10006_v50  ;;  %v6812_v50 = vld [vmem:[%s12322_s0 + $0x175] sm:$0xff] }
 0x1c0   :  { %7913 = vmatmul.mubr.msk.bf16.gmra.mrb[4].mxu1 %vm203_vm1, %v10008_v51  ;;  %7574 = vmatprep.mubr.msk.bf16.mxu0 %vm203_vm1, %v10042_v4  ;;  %v2030_v51 = vpack.c.bf16 %v2012_v18, %v2011_v8  ;;  %v4996_v4 = vpack.c.bf16 %v6791_v30, %v6790_v20  ;;  %v2322_v8 = vld [vmem:[%s12322_s0 + $0xbd] sm:$0xff]  ;;  %v6830_v20 = vld [vmem:[%s12322_s0 + $0x205] sm:$0xff] }
 0x1c1   :  { %7916 = vmatprep.mubr.msk.bf16.mxu1 %vm203_vm1, %v10044_v5  ;;  %v2339_v5 = vpack.c.bf16 %v2304_v45, %v2303_v31  ;;  %v6829_v18 = vld [vmem:[%s12322_s0 + $0x1fd] sm:$0xff]  ;;  %v2323_v30 = vld [vmem:[%s12322_s0 + $0xc5] sm:$0xff]  ;;  %v2324_v31 = vld [vmem:[%s12322_s0 + $0xcd] sm:$0xff] }
 0x1c2   :  { %v6831_v45 = vld [vmem:[%s12322_s0 + $0x20d] sm:$0xff] }
 0x1c7   :  { %7575 = vmatmul.mubr.msk.bf16.gmra.mrb[8].mxu0 %vm203_vm1, %v10046_v10  ;;  %v5304_v10 = vpack.c.bf16 %v6812_v50, %v6811_v49  ;;  %v6832_v49 = vld [vmem:[%s12322_s0 + $0x215] sm:$0xff]  ;;  %v2348_v50 = vpack.c.bf16 %v2322_v8, %v2321_v0  ;;  %v2633_v0 = vld [vmem:[%s12322_s0 + $0x46] sm:$0xff] }
 0x1c8   :  { %7917 = vmatmul.mubr.msk.bf16.gmra.mrb[8].mxu1 %vm203_vm1, %v10048_v11  ;;  %7578 = vmatprep.mubr.msk.bf16.mxu0 %vm203_vm1, %v10082_v24  ;;  %v2305_v11 = vld [vmem:[%s12322_s0 + $0x35] sm:$0xff]  ;;  %v2306_v24 = vld [vmem:[%s12322_s0 + $0x3d] sm:$0xff] }
 0x1c9   :  { %7920 = vmatprep.mubr.msk.bf16.mxu1 %vm203_vm1, %v10084_v25  ;;  %v6813_v25 = vld [vmem:[%s12322_s0 + $0x17d] sm:$0xff]  ;;  %v2634_v8 = vld [vmem:[%s12322_s0 + $0x4e] sm:$0xff] }
 0x1cf   :  { %7579 = vmatmul.mubr.msk.bf16.gmra.mrb[12].mxu0 %vm203_vm1, %v10086_v26  ;;  %v6814_v26 = vld [vmem:[%s12322_s0 + $0x185] sm:$0xff] }
 0x1d0   :  { %7921 = vmatmul.mubr.msk.bf16.gmra.mrb[12].mxu1 %vm203_vm1, %v10088_v27  ;;  %7582 = vmatprep.mubr.msk.bf16.mxu0 %vm203_vm1, %v10122_v40  ;;  %v2307_v27 = vld [vmem:[%s12322_s0 + $0x45] sm:$0xff]  ;;  %v2308_v40 = vld [vmem:[%s12322_s0 + $0x4d] sm:$0xff]  ;;  %v5305_v57 = vpack.c.bf16 %v6814_v26, %v6813_v25 }
 0x1d1   :  { %7924 = vmatprep.mubr.msk.bf16.mxu1 %vm203_vm1, %v10124_v41  ;;  %v2340_v41 = vpack.c.bf16 %v2306_v24, %v2305_v11  ;;  %v2341_v61 = vpack.c.bf16 %v2308_v40, %v2307_v27  ;;  %v2326_v11 = vld [vmem:[%s12322_s0 + $0xdd] sm:$0xff]  ;;  %v6834_v25 = vld [vmem:[%s12322_s0 + $0x225] sm:$0xff]  ;;  %v2328_v27 = vld [vmem:[%s12322_s0 + $0xed] sm:$0xff] }
 0x1d2   :  { %v6833_v24 = vld [vmem:[%s12322_s0 + $0x21d] sm:$0xff]  ;;  %v2327_v26 = vld [vmem:[%s12322_s0 + $0xe5] sm:$0xff]  ;;  %v6835_v40 = vld [vmem:[%s12322_s0 + $0x22d] sm:$0xff] }
 0x1d7   :  { %7583 = vmatmul.mubr.msk.bf16.gmra.mrb[16].mxu0 %vm203_vm1, %v10126_v46  ;;  %v6815_v46 = vld [vmem:[%s12322_s0 + $0x18d] sm:$0xff] }
 0x1d8   :  { %7925 = vmatmul.mubr.msk.bf16.gmra.mrb[16].mxu1 %vm203_vm1, %v10128_v47  ;;  %7586 = vmatprep.mubr.msk.bf16.mxu0 %vm203_vm1, %v10162_v9  ;;  %v6816_v47 = vld [vmem:[%s12322_s0 + $0x195] sm:$0xff] }
 0x1d9   :  { %7928 = vmatprep.mubr.msk.bf16.mxu1 %vm203_vm1, %v10164_v19  ;;  %v5306_v7 = vpack.c.bf16 %v6816_v47, %v6815_v46  ;;  %v2309_v9 = vld [vmem:[%s12322_s0 + $0x55] sm:$0xff]  ;;  %v2310_v19 = vld [vmem:[%s12322_s0 + $0x5d] sm:$0xff]  ;;  %v5315_v47 = vpack.c.bf16 %v6834_v25, %v6833_v24 }
 0x1da   :  { %v2342_v43 = vpack.c.bf16 %v2310_v19, %v2309_v9  ;;  %v6838_v9 = vld [vmem:[%s12322_s0 + $0x245] sm:$0xff]  ;;  %v6874_v24 = vld [vmem:[%s12322_s0 + $0x1ae] sm:$0xff]  ;;  %v6875_v25 = vld [vmem:[%s12322_s0 + $0x1b6] sm:$0xff] }
 0x1db   :  { %v2331_v19 = vld [vmem:[%s12322_s0 + $0x105] sm:$0xff] }
 0x1df   :  { %7587 = vmatmul.mubr.msk.bf16.gmra.mrb[20].mxu0 %vm203_vm1, %v10166_v21  ;;  %v6817_v21 = vld [vmem:[%s12322_s0 + $0x19d] sm:$0xff] }
 0x1e0   :  { %7929 = vmatmul.mubr.msk.bf16.gmra.mrb[20].mxu1 %vm203_vm1, %v10168_v58  ;;  %7590 = vmatprep.mubr.msk.bf16.mxu0 %vm203_vm1, %v10202_v56  ;;  %v6818_v58 = vld [vmem:[%s12322_s0 + $0x1a5] sm:$0xff]  ;;  %v10426_v56 = vld [vmem:[%s12322_s0 + $0x75] sm:$0xff] }
 0x1e1   :  { %7932 = vmatprep.mubr.msk.bf16.mxu1 %vm203_vm1, %v10204_v60  ;;  %v5307_v44 = vpack.c.bf16 %v6818_v58, %v6817_v21  ;;  %v10431_v60 = vld [vmem:[%s12322_s0 + $0x7d] sm:$0xff]  ;;  %v2332_v21 = vld [vmem:[%s12322_s0 + $0x10d] sm:$0xff] }
 0x1e2   :  { %v2344_v15 = vpack.c.bf16 %v10431_v60, %v10426_v56  ;;  %v6839_v58 = vld [vmem:[%s12322_s0 + $0x24d] sm:$0xff]  ;;  %v2353_v42 = vpack.c.bf16 %v2332_v21, %v2331_v19  ;;  %v6842_v56 = vld [vmem:[%s12322_s0 + $0x265] sm:$0xff] }
 0x1e3   :  { %v2335_v60 = vld [vmem:[%s12322_s0 + $0x125] sm:$0xff] }
 0x1e7   :  { %7591 = vmatmul.mubr.msk.bf16.gmra.mrb[24].mxu0 %vm203_vm1, %v10206_v13  ;;  %v10436_v13 = vld [vmem:[%s12322_s0 + $0x1bd] sm:$0xff] }
 0x1e8   :  { %7933 = vmatmul.mubr.msk.bf16.gmra.mrb[24].mxu1 %vm203_vm1, %v10208_v1  ;;  %7594 = vmatprep.mubr.msk.bf16.mxu0 %vm203_vm1, %v1702_v22  ;;  %v10442_v1 = vld [vmem:[%s12322_s0 + $0x1c5] sm:$0xff]  ;;  %v5310_v22 = vpack.c.bf16 %v6824_v63, %v6823_v62 }
 0x1e9   :  { %7936 = vmatprep.mubr.msk.bf16.mxu1 %vm203_vm1, %v4669_v23  ;;  %v5309_v16 = vpack.c.bf16 %v10442_v1, %v10436_v13  ;;  %v2317_v23 = vld [vmem:[%s12322_s0 + $0x95] sm:$0xff]  ;;  %v2336_v13 = vld [vmem:[%s12322_s0 + $0x12d] sm:$0xff] }
 0x1ea   :  { %v6843_v1 = vld [vmem:[%s12322_s0 + $0x26d] sm:$0xff]  ;;  %v2355_v62 = vpack.c.bf16 %v2336_v13, %v2335_v60 }
 0x1eb   :  { %v5320_v63 = vpack.c.bf16 %v6844_v2, %v6843_v1 }
 0x1ef   :  { %7595 = vmatmul.mubr.msk.bf16.gmra.mrb[28].mxu0 %vm203_vm1, %v1703_v28  ;;  %v2318_v28 = vld [vmem:[%s12322_s0 + $0x9d] sm:$0xff] }
 0x1f0   :  { %7937 = vmatmul.mubr.msk.bf16.gmra.mrb[28].mxu1 %vm203_vm1, %v4670_v29  ;;  %7598 = vmatprep.mubr.msk.bf16.mxu0 %vm203_vm1, %v1704_v38  ;;  %v6825_v29 = vld [vmem:[%s12322_s0 + $0x1dd] sm:$0xff]  ;;  %v6828_v38 = vld [vmem:[%s12322_s0 + $0x1f5] sm:$0xff] }
 0x1f1   :  { %7940 = vmatprep.mubr.msk.bf16.mxu1 %vm203_vm1, %v4671_v39  ;;  %v2346_v39 = vpack.c.bf16 %v2318_v28, %v2317_v23  ;;  %v5311_v48 = vpack.c.bf16 %v6826_v34, %v6825_v29  ;;  %v5312_v55 = vpack.c.bf16 %v6828_v38, %v6827_v37  ;;  %v2629_v23 = vld [vmem:[%s12322_s0 + $0x26] sm:$0xff]  ;;  %v2630_v28 = vld [vmem:[%s12322_s0 + $0x2e] sm:$0xff]  ;;  %v6867_v34 = vld [vmem:[%s12322_s0 + $0x176] sm:$0xff] }
 0x1f2   :  { %v6866_v29 = vld [vmem:[%s12322_s0 + $0x16e] sm:$0xff]  ;;  %v2665_v37 = vpack.c.bf16 %v2630_v28, %v2629_v23 }
 0x1f3   :  { %v5629_v38 = vpack.c.bf16 %v6867_v34, %v6866_v29 }
 0x1f7   :  { %7599 = vmatmul.mubr.msk.bf16.gmra.mrb[32].mxu0 %vm203_vm1, %v2030_v51  ;;  %v5313_v51 = vpack.c.bf16 %v6830_v20, %v6829_v18  ;;  %v6870_v18 = vld [vmem:[%s12322_s0 + $0x18e] sm:$0xff]  ;;  %v6871_v20 = vld [vmem:[%s12322_s0 + $0x196] sm:$0xff] }
 0x1f8   :  { %7941 = vmatmul.mubr.msk.bf16.gmra.mrb[32].mxu1 %vm203_vm1, %v4996_v4  ;;  %7604 = vmatprep.mubr.msk.bf16.mxu0 %vm203_vm1, %v2339_v5  ;;  %v2349_v4 = vpack.c.bf16 %v2324_v31, %v2323_v30  ;;  %v5314_v5 = vpack.c.bf16 %v6832_v49, %v6831_v45  ;;  %v2667_v45 = vpack.c.bf16 %v2634_v8, %v2633_v0 }
 0x1f9   :  { %7946 = vmatprep.mubr.msk.bf16.mxu1 %vm203_vm1, %v5304_v10  ;;  %v2325_v10 = vld [vmem:[%s12322_s0 + $0xd5] sm:$0xff]  ;;  %v5631_v49 = vpack.c.bf16 %v6871_v20, %v6870_v18 }
 0x1fa   :  { %v2350_v46 = vpack.c.bf16 %v2326_v11, %v2325_v10  ;;  %v2637_v10 = vld [vmem:[%s12322_s0 + $0x66] sm:$0xff]  ;;  %v2638_v11 = vld [vmem:[%s12322_s0 + $0x6e] sm:$0xff] }
 0x1ff   :  { %7605 = vmatmul.mubr.msk.bf16.vlgmr.msra.gmra.mrb[0].mxu0 %vm203_vm1, %v2340_v41  ;;  %v6836_v41 = vld [vmem:[%s12322_s0 + $0x235] sm:$0xff] }
 0x200   :  { %7947 = vmatmul.mubr.msk.bf16.vlgmr.msra.gmra.mrb[0].mxu1 %vm203_vm1, %v5305_v57  ;;  %7641 = vmatpush3.bf16.msra.mxu0 %v2740_v59  ;;  %v2351_v57 = vpack.c.bf16 %v2328_v27, %v2327_v26  ;;  %v5316_v59 = vpack.c.bf16 %v6836_v41, %v6835_v40  ;;  %v2669_v40 = vpack.c.bf16 %v2638_v11, %v2637_v10 }
 0x201   :  { %7983 = vmatpush3.bf16.msra.mxu1 %v5703_v6  ;;  %7608 = vmatprep.mubr.msk.bf16.mxu0 %vm203_vm1, %v2341_v61  ;;  %v2329_v61 = vld [vmem:[%s12322_s0 + $0xf5] sm:$0xff]  ;;  %v2330_v6 = vld [vmem:[%s12322_s0 + $0xfd] sm:$0xff]  ;;  %v5633_v41 = vpack.c.bf16 %v6875_v25, %v6874_v24 }
 0x202   :  { %7950 = vmatprep.mubr.msk.bf16.mxu1 %vm203_vm1, %v5306_v7  ;;  %v6837_v7 = vld [vmem:[%s12322_s0 + $0x23d] sm:$0xff]  ;;  %v2352_v32 = vpack.c.bf16 %v2330_v6, %v2329_v61  ;;  %v2641_v61 = vld [vmem:[%s12322_s0 + $0x86] sm:$0xff]  ;;  %v2642_v6 = vld [vmem:[%s12322_s0 + $0x8e] sm:$0xff] }
 0x203   :  { %v5317_v33 = vpack.c.bf16 %v6838_v9, %v6837_v7  ;;  %v6878_v7 = vld [vmem:[%s12322_s0 + $0x1ce] sm:$0xff]  ;;  %v6879_v9 = vld [vmem:[%s12322_s0 + $0x1d6] sm:$0xff] }
 0x207   :  { %7609 = vmatmul.mubr.msk.bf16.gmra.mrb[4].mxu0 %vm203_vm1, %v2342_v43  ;;  %v5318_v43 = vpack.c.bf16 %v6840_v14, %v6839_v58  ;;  %v2671_v58 = vpack.c.bf16 %v2642_v6, %v2641_v61  ;;  %v5635_v14 = vpack.c.bf16 %v6879_v9, %v6878_v7 }
 0x208   :  { %7951 = vmatmul.mubr.msk.bf16.gmra.mrb[4].mxu1 %vm203_vm1, %v5307_v44  ;;  %7612 = vmatprep.mubr.msk.bf16.mxu0 %vm203_vm1, %v2343_v53  ;;  %v2333_v44 = vld [vmem:[%s12322_s0 + $0x115] sm:$0xff]  ;;  %v2334_v53 = vld [vmem:[%s12322_s0 + $0x11d] sm:$0xff] }
 0x209   :  { %7954 = vmatprep.mubr.msk.bf16.mxu1 %vm203_vm1, %v5308_v54  ;;  %v6841_v54 = vld [vmem:[%s12322_s0 + $0x25d] sm:$0xff]  ;;  %v2354_v3 = vpack.c.bf16 %v2334_v53, %v2333_v44  ;;  %v2645_v44 = vld [vmem:[%s12322_s0 + $0xa6] sm:$0xff]  ;;  %v2646_v53 = vld [vmem:[%s12322_s0 + $0xae] sm:$0xff] }
 0x20a   :  { %v5319_v12 = vpack.c.bf16 %v6842_v56, %v6841_v54  ;;  %v6882_v54 = vld [vmem:[%s12322_s0 + $0x1ee] sm:$0xff]  ;;  %v6883_v56 = vld [vmem:[%s12322_s0 + $0x1f6] sm:$0xff]  ;;  %v2673_v1 = vpack.c.bf16 %v2646_v53, %v2645_v44  ;;  %v2955_v44 = vld [vmem:[%s12323_s3] sm:$0xff] }
 0x20b   :  { %v5637_v2 = vpack.c.bf16 %v6883_v56, %v6882_v54  ;;  %v6921_v54 = vld [vmem:[%s12323_s3 + $0x120] sm:$0xff]  ;;  %v2958_v56 = vld [vmem:[%s12323_s3 + $0x18] sm:$0xff] }
 0x20f   :  { %7613 = vmatmul.mubr.msk.bf16.gmra.mrb[8].mxu0 %vm203_vm1, %v2344_v15  ;;  %v2337_v15 = vld [vmem:[%s12322_s0 + $0x135] sm:$0xff] }
 0x210   :  { %7955 = vmatmul.mubr.msk.bf16.gmra.mrb[8].mxu1 %vm203_vm1, %v5309_v16  ;;  %7616 = vmatprep.mubr.msk.bf16.mxu0 %vm203_vm1, %v2345_v17  ;;  %v2338_v16 = vld [vmem:[%s12322_s0 + $0x13d] sm:$0xff] }
 0x211   :  { %7958 = vmatprep.mubr.msk.bf16.mxu1 %vm203_vm1, %v5310_v22  ;;  %v6845_v17 = vld [vmem:[%s12322_s0 + $0x27d] sm:$0xff]  ;;  %v6846_v22 = vld [vmem:[%s12322_s0 + $0x285] sm:$0xff]  ;;  %v2356_v35 = vpack.c.bf16 %v2338_v16, %v2337_v15  ;;  %v2650_v16 = vld [vmem:[%s12322_s0 + $0xce] sm:$0xff] }
 0x212   :  { %v5321_v36 = vpack.c.bf16 %v6846_v22, %v6845_v17  ;;  %v2649_v15 = vld [vmem:[%s12322_s0 + $0xc6] sm:$0xff]  ;;  %v6886_v17 = vld [vmem:[%s12322_s0 + $0x20e] sm:$0xff]  ;;  %v6887_v22 = vld [vmem:[%s12322_s0 + $0x216] sm:$0xff] }
 0x213   :  { %v2675_v29 = vpack.c.bf16 %v2650_v16, %v2649_v15  ;;  %v5639_v34 = vpack.c.bf16 %v6887_v22, %v6886_v17  ;;  %v6922_v16 = vld [vmem:[%s12323_s3 + $0x128] sm:$0xff] }
 0x217   :  { %7617 = vmatmul.mubr.msk.bf16.gmra.mrb[12].mxu0 %vm203_vm1, %v2346_v39  ;;  %v2631_v39 = vld [vmem:[%s12322_s0 + $0x36] sm:$0xff] }
 0x218   :  { %7959 = vmatmul.mubr.msk.bf16.gmra.mrb[12].mxu1 %vm203_vm1, %v5311_v48  ;;  %7620 = vmatprep.mubr.msk.bf16.mxu0 %vm203_vm1, %v2347_v52  ;;  %v2632_v48 = vld [vmem:[%s12322_s0 + $0x3e] sm:$0xff] }
 0x219   :  { %7962 = vmatprep.mubr.msk.bf16.mxu1 %vm203_vm1, %v5312_v55  ;;  %v6868_v52 = vld [vmem:[%s12322_s0 + $0x17e] sm:$0xff]  ;;  %v6869_v55 = vld [vmem:[%s12322_s0 + $0x186] sm:$0xff]  ;;  %v2666_v30 = vpack.c.bf16 %v2632_v48, %v2631_v39  ;;  %v2654_v48 = vld [vmem:[%s12322_s0 + $0xee] sm:$0xff] }
 0x21a   :  { %v5630_v31 = vpack.c.bf16 %v6869_v55, %v6868_v52  ;;  %v2653_v39 = vld [vmem:[%s12322_s0 + $0xe6] sm:$0xff]  ;;  %v6890_v52 = vld [vmem:[%s12322_s0 + $0x22e] sm:$0xff]  ;;  %v6891_v55 = vld [vmem:[%s12322_s0 + $0x236] sm:$0xff] }
 0x21b   :  { %v2677_v18 = vpack.c.bf16 %v2654_v48, %v2653_v39  ;;  %v5641_v20 = vpack.c.bf16 %v6891_v55, %v6890_v52  ;;  %v2959_v39 = vld [vmem:[%s12323_s3 + $0x20] sm:$0xff] }
 0x21c   :  { %v11304_v48 = vld [vmem:[%s12324_s2] ss:$0 sm:$0xff] }
 0x21d   :  { %v6925_v55 = vld [vmem:[%s12323_s3 + $0x140] sm:$0xff] }
 0x21f   :  { %7621 = vmatmul.mubr.msk.bf16.gmra.mrb[16].mxu0 %vm203_vm1, %v2348_v50  ;;  %v2635_v50 = vld [vmem:[%s12322_s0 + $0x56] sm:$0xff] }
 0x220   :  { %7963 = vmatmul.mubr.msk.bf16.gmra.mrb[16].mxu1 %vm203_vm1, %v5313_v51  ;;  %7624 = vmatprep.mubr.msk.bf16.mxu0 %vm203_vm1, %v2349_v4  ;;  %v2636_v51 = vld [vmem:[%s12322_s0 + $0x5e] sm:$0xff] }
 0x221   :  { %7966 = vmatprep.mubr.msk.bf16.mxu1 %vm203_vm1, %v5314_v5  ;;  %v6872_v4 = vld [vmem:[%s12322_s0 + $0x19e] sm:$0xff]  ;;  %v6873_v5 = vld [vmem:[%s12322_s0 + $0x1a6] sm:$0xff]  ;;  %v2668_v26 = vpack.c.bf16 %v2636_v51, %v2635_v50  ;;  %v2658_v51 = vld [vmem:[%s12322_s0 + $0x10e] sm:$0xff] }
 0x222   :  { %v5632_v27 = vpack.c.bf16 %v6873_v5, %v6872_v4  ;;  %v2657_v50 = vld [vmem:[%s12322_s0 + $0x106] sm:$0xff]  ;;  %v6894_v4 = vld [vmem:[%s12322_s0 + $0x24e] sm:$0xff]  ;;  %v6895_v5 = vld [vmem:[%s12322_s0 + $0x256] sm:$0xff] }
 0x223   :  { %v2679_v24 = vpack.c.bf16 %v2658_v51, %v2657_v50  ;;  %v5643_v25 = vpack.c.bf16 %v6895_v5, %v6894_v4  ;;  %v6926_v5 = vld [vmem:[%s12323_s3 + $0x148] sm:$0xff] }
 0x227   :  { %7625 = vmatmul.mubr.msk.bf16.gmra.mrb[20].mxu0 %vm203_vm1, %v2350_v46  ;;  %v2639_v46 = vld [vmem:[%s12322_s0 + $0x76] sm:$0xff] }
 0x228   :  { %7967 = vmatmul.mubr.msk.bf16.gmra.mrb[20].mxu1 %vm203_vm1, %v5315_v47  ;;  %7628 = vmatprep.mubr.msk.bf16.mxu0 %vm203_vm1, %v2351_v57  ;;  %v2640_v47 = vld [vmem:[%s12322_s0 + $0x7e] sm:$0xff] }
 0x229   :  { %7970 = vmatprep.mubr.msk.bf16.mxu1 %vm203_vm1, %v5316_v59  ;;  %v6876_v57 = vld [vmem:[%s12322_s0 + $0x1be] sm:$0xff]  ;;  %v6877_v59 = vld [vmem:[%s12322_s0 + $0x1c6] sm:$0xff]  ;;  %v2670_v19 = vpack.c.bf16 %v2640_v47, %v2639_v46  ;;  %v2662_v47 = vld [vmem:[%s12322_s0 + $0x12e] sm:$0xff] }
 0x22a   :  { %v5634_v21 = vpack.c.bf16 %v6877_v59, %v6876_v57  ;;  %v2661_v46 = vld [vmem:[%s12322_s0 + $0x126] sm:$0xff]  ;;  %v6898_v57 = vld [vmem:[%s12322_s0 + $0x26e] sm:$0xff]  ;;  %v6899_v59 = vld [vmem:[%s12322_s0 + $0x276] sm:$0xff] }
 0x22b   :  { %v2681_v7 = vpack.c.bf16 %v2662_v47, %v2661_v46  ;;  %v5645_v9 = vpack.c.bf16 %v6899_v59, %v6898_v57 }
 0x22f   :  { %7629 = vmatmul.mubr.msk.bf16.gmra.mrb[24].mxu0 %vm203_vm1, %v2352_v32  ;;  %v2643_v32 = vld [vmem:[%s12322_s0 + $0x96] sm:$0xff] }
 0x230   :  { %7971 = vmatmul.mubr.msk.bf16.gmra.mrb[24].mxu1 %vm203_vm1, %v5317_v33  ;;  %7632 = vmatprep.mubr.msk.bf16.mxu0 %vm203_vm1, %v2353_v42  ;;  %v2644_v33 = vld [vmem:[%s12322_s0 + $0x9e] sm:$0xff] }
 0x231   :  { %7974 = vmatprep.mubr.msk.bf16.mxu1 %vm203_vm1, %v5318_v43  ;;  %v6880_v42 = vld [vmem:[%s12322_s0 + $0x1de] sm:$0xff]  ;;  %v6881_v43 = vld [vmem:[%s12322_s0 + $0x1e6] sm:$0xff]  ;;  %v2672_v60 = vpack.c.bf16 %v2644_v33, %v2643_v32 }
 0x232   :  { %v5636_v13 = vpack.c.bf16 %v6881_v43, %v6880_v42  ;;  %v2957_v42 = vld [vmem:[%s12323_s3 + $0x10] sm:$0xff] }
 0x233   :  { %v6923_v43 = vld [vmem:[%s12323_s3 + $0x130] sm:$0xff] }
 0x237   :  { %7633 = vmatmul.mubr.msk.bf16.gmra.mrb[28].mxu0 %vm203_vm1, %v2354_v3  ;;  %v2647_v3 = vld [vmem:[%s12322_s0 + $0xb6] sm:$0xff] }
 0x238   :  { %7975 = vmatmul.mubr.msk.bf16.gmra.mrb[28].mxu1 %vm203_vm1, %v5319_v12  ;;  %7636 = vmatprep.mubr.msk.bf16.mxu0 %vm203_vm1, %v2355_v62  ;;  %v2648_v12 = vld [vmem:[%s12322_s0 + $0xbe] sm:$0xff] }
 0x239   :  { %7978 = vmatprep.mubr.msk.bf16.mxu1 %vm203_vm1, %v5320_v63  ;;  %v6884_v62 = vld [vmem:[%s12322_s0 + $0x1fe] sm:$0xff]  ;;  %v6885_v63 = vld [vmem:[%s12322_s0 + $0x206] sm:$0xff]  ;;  %v2674_v23 = vpack.c.bf16 %v2648_v12, %v2647_v3 }
 0x23a   :  { %v5638_v28 = vpack.c.bf16 %v6885_v63, %v6884_v62  ;;  %v2956_v3 = vld [vmem:[%s12323_s3 + $0x8] sm:$0xff] }
 0x23f   :  { %7637 = vmatmul.mubr.msk.bf16.gmra.mrb[32].mxu0 %vm203_vm1, %v2356_v35  ;;  %v2651_v35 = vld [vmem:[%s12322_s0 + $0xd6] sm:$0xff] }
 0x240   :  { %7979 = vmatmul.mubr.msk.bf16.gmra.mrb[32].mxu1 %vm203_vm1, %v5321_v36  ;;  %7642 = vmatprep.mubr.msk.bf16.mxu0 %vm203_vm1, %v2665_v37  ;;  %v2652_v36 = vld [vmem:[%s12322_s0 + $0xde] sm:$0xff] }
 0x241   :  { %7984 = vmatprep.mubr.msk.bf16.mxu1 %vm203_vm1, %v5629_v38  ;;  %v6888_v37 = vld [vmem:[%s12322_s0 + $0x21e] sm:$0xff]  ;;  %v6889_v38 = vld [vmem:[%s12322_s0 + $0x226] sm:$0xff]  ;;  %v2676_v0 = vpack.c.bf16 %v2652_v36, %v2651_v35 }
 0x242   :  { %v5640_v8 = vpack.c.bf16 %v6889_v38, %v6888_v37  ;;  %v2961_v37 = vld [vmem:[%s12323_s3 + $0x30] sm:$0xff] }
 0x243   :  { %v6927_v38 = vld [vmem:[%s12323_s3 + $0x150] sm:$0xff] }
 0x247   :  { %7643 = vmatmul.mubr.msk.bf16.vlgmr.msra.gmra.mrb[0].mxu0 %vm203_vm1, %v2666_v30  ;;  %v2655_v30 = vld [vmem:[%s12322_s0 + $0xf6] sm:$0xff] }
 0x248   :  { %7985 = vmatmul.mubr.msk.bf16.vlgmr.msra.gmra.mrb[0].mxu1 %vm203_vm1, %v5630_v31  ;;  %7646 = vmatprep.mubr.msk.bf16.mxu0 %vm203_vm1, %v2667_v45  ;;  %v2656_v31 = vld [vmem:[%s12322_s0 + $0xfe] sm:$0xff] }
 0x249   :  { %7988 = vmatprep.mubr.msk.bf16.mxu1 %vm203_vm1, %v5631_v49  ;;  %v6892_v45 = vld [vmem:[%s12322_s0 + $0x23e] sm:$0xff]  ;;  %v6893_v49 = vld [vmem:[%s12322_s0 + $0x246] sm:$0xff]  ;;  %v2678_v10 = vpack.c.bf16 %v2656_v31, %v2655_v30 }
 0x24a   :  { %v5642_v11 = vpack.c.bf16 %v6893_v49, %v6892_v45  ;;  %v6928_v30 = vld [vmem:[%s12323_s3 + $0x158] sm:$0xff]  ;;  %v2960_v31 = vld [vmem:[%s12323_s3 + $0x28] sm:$0xff] }
 0x24f   :  { %7647 = vmatmul.mubr.msk.bf16.gmra.mrb[4].mxu0 %vm203_vm1, %v2668_v26  ;;  %v2659_v26 = vld [vmem:[%s12322_s0 + $0x116] sm:$0xff] }
 0x250   :  { %7989 = vmatmul.mubr.msk.bf16.gmra.mrb[4].mxu1 %vm203_vm1, %v5632_v27  ;;  %7650 = vmatprep.mubr.msk.bf16.mxu0 %vm203_vm1, %v2669_v40  ;;  %v2660_v27 = vld [vmem:[%s12322_s0 + $0x11e] sm:$0xff] }
 0x251   :  { %7992 = vmatprep.mubr.msk.bf16.mxu1 %vm203_vm1, %v5633_v41  ;;  %v6896_v40 = vld [vmem:[%s12322_s0 + $0x25e] sm:$0xff]  ;;  %v6897_v41 = vld [vmem:[%s12322_s0 + $0x266] sm:$0xff]  ;;  %v2680_v61 = vpack.c.bf16 %v2660_v27, %v2659_v26 }
 0x252   :  { %v5644_v6 = vpack.c.bf16 %v6897_v41, %v6896_v40 }
 0x257   :  { %7651 = vmatmul.mubr.msk.bf16.gmra.mrb[8].mxu0 %vm203_vm1, %v2670_v19  ;;  %v2663_v19 = vld [vmem:[%s12322_s0 + $0x136] sm:$0xff] }
 0x258   :  { %7993 = vmatmul.mubr.msk.bf16.gmra.mrb[8].mxu1 %vm203_vm1, %v5634_v21  ;;  %7654 = vmatprep.mubr.msk.bf16.mxu0 %vm203_vm1, %v2671_v58  ;;  %v2664_v21 = vld [vmem:[%s12322_s0 + $0x13e] sm:$0xff] }
 0x259   :  { %7996 = vmatprep.mubr.msk.bf16.mxu1 %vm203_vm1, %v5635_v14  ;;  %v6900_v58 = vld [vmem:[%s12322_s0 + $0x27e] sm:$0xff]  ;;  %v6901_v14 = vld [vmem:[%s12322_s0 + $0x286] sm:$0xff]  ;;  %v2682_v32 = vpack.c.bf16 %v2664_v21, %v2663_v19 }
 0x25a   :  { %v5646_v33 = vpack.c.bf16 %v6901_v14, %v6900_v58 }
 0x25f   :  { %7655 = vmatmul.mubr.msk.bf16.gmra.mrb[12].mxu0 %vm203_vm1, %v2672_v60 }
 0x260   :  { %7997 = vmatmul.mubr.msk.bf16.gmra.mrb[12].mxu1 %vm203_vm1, %v5636_v13  ;;  %7658 = vmatprep.mubr.msk.bf16.mxu0 %vm203_vm1, %v2673_v1 }
 0x261   :  { %8000 = vmatprep.mubr.msk.bf16.mxu1 %vm203_vm1, %v5637_v2  ;;  %v6924_v2 = vld [vmem:[%s12323_s3 + $0x138] sm:$0xff] }
 0x267   :  { %7659 = vmatmul.mubr.msk.bf16.gmra.mrb[16].mxu0 %vm203_vm1, %v2674_v23 }
 0x268   :  { %8001 = vmatmul.mubr.msk.bf16.gmra.mrb[16].mxu1 %vm203_vm1, %v5638_v28  ;;  %7662 = vmatprep.mubr.msk.bf16.mxu0 %vm203_vm1, %v2675_v29 }
 0x269   :  { %8004 = vmatprep.mubr.msk.bf16.mxu1 %vm203_vm1, %v5639_v34 }
 0x26f   :  { %7663 = vmatmul.mubr.msk.bf16.gmra.mrb[20].mxu0 %vm203_vm1, %v2676_v0  ;;  %v2962_v0 = vld [vmem:[%s12323_s3 + $0x38] sm:$0xff] }
 0x270   :  { %8005 = vmatmul.mubr.msk.bf16.gmra.mrb[20].mxu1 %vm203_vm1, %v5640_v8  ;;  %7666 = vmatprep.mubr.msk.bf16.mxu0 %vm203_vm1, %v2677_v18 }
 0x271   :  { %8008 = vmatprep.mubr.msk.bf16.mxu1 %vm203_vm1, %v5641_v20 }
 0x277   :  { %7667 = vmatmul.mubr.msk.bf16.gmra.mrb[24].mxu0 %vm203_vm1, %v2678_v10 }
 0x278   :  { %8009 = vmatmul.mubr.msk.bf16.gmra.mrb[24].mxu1 %vm203_vm1, %v5642_v11  ;;  %7670 = vmatprep.mubr.msk.bf16.mxu0 %vm203_vm1, %v2679_v24 }
 0x279   :  { %8012 = vmatprep.mubr.msk.bf16.mxu1 %vm203_vm1, %v5643_v25 }
 0x27f   :  { %7671 = vmatmul.mubr.msk.bf16.gmra.mrb[28].mxu0 %vm203_vm1, %v2680_v61 }
 0x280   :  { %8013 = vmatmul.mubr.msk.bf16.gmra.mrb[28].mxu1 %vm203_vm1, %v5644_v6  ;;  %7674 = vmatprep.mubr.msk.bf16.mxu0 %vm203_vm1, %v2681_v7 }
 0x281   :  { %8016 = vmatprep.mubr.msk.bf16.mxu1 %vm203_vm1, %v5645_v9 }
 0x287   :  { %7675 = vmatmul.mubr.msk.bf16.gmra.mrb[32].mxu0 %vm203_vm1, %v2682_v32 }
 0x288   :  { %8017 = vmatmul.mubr.msk.bf16.gmra.mrb[32].mxu1 %vm203_vm1, %v5646_v33 }
 0x31a   :  { %v7644_v53 = vpop.f32.mrb[0].mxu0 }
 0x31b   :  { %v2993_v60 = vadd.f32 %v7644_v53, %v2957_v42  ;;  %v7986_v13 = vpop.f32.mrb[0].mxu1  ;;  %v2776_v1 = vpop.f32.mrb[1].mxu0  ;;  %v2965_v42 = vld [vmem:[%s12323_s3 + $0x50] sm:$0xff]  ;;  %v2963_v53 = vld [vmem:[%s12323_s3 + $0x40] sm:$0xff] }
 0x31c   :  { %v5957_v12 = vadd.f32 %v7986_v13, %v6923_v43  ;;  %v2991_v62 = vadd.f32 %v2955_v44, %v2776_v1  ;;  %v5739_v63 = vpop.f32.mrb[1].mxu1  ;;  %v7645_v15 = vpop.f32.mrb[2].mxu0  ;;  %v6931_v44 = vld [vmem:[%s12323_s3 + $0x170] sm:$0xff] }
 0x31d   :  { %3030 = vst.msk [vmem:[%s12323_s3 + $0x10] sm:$0xff] %vm19_vm2, %v2993_v60  ;;  %v5955_v17 = vadd.f32 %v6921_v54, %v5739_v63  ;;  %v2994_v22 = vadd.f32 %v7645_v15, %v2958_v56  ;;  %v7987_v23 = vpop.f32.mrb[2].mxu1  ;;  %v2779_v28 = vpop.f32.mrb[3].mxu0  ;;  %v6929_v56 = vld [vmem:[%s12323_s3 + $0x160] sm:$0xff]  ;;  %v2966_v60 = vld [vmem:[%s12323_s3 + $0x58] sm:$0xff] }
 0x31e   :  { %6959 = vst.msk [vmem:[%s12323_s3 + $0x130] sm:$0xff] %vm19_vm2, %v5957_v12  ;;  %3028 = vst.msk [vmem:[%s12323_s3] sm:$0xff] %vm19_vm2, %v2991_v62  ;;  %v5958_v29 = vadd.f32 %v7987_v23, %v6924_v2  ;;  %v2992_v34 = vadd.f32 %v2956_v3, %v2779_v28  ;;  %v5742_v35 = vpop.f32.mrb[3].mxu1  ;;  %v6932_v3 = vld [vmem:[%s12323_s3 + $0x178] sm:$0xff]  ;;  %v2964_v12 = vld [vmem:[%s12323_s3 + $0x48] sm:$0xff] }
 0x31f   :  { %6957 = vst.msk [vmem:[%s12323_s3 + $0x120] sm:$0xff] %vm19_vm2, %v5955_v17  ;;  %3031 = vst.msk [vmem:[%s12323_s3 + $0x18] sm:$0xff] %vm19_vm2, %v2994_v22  ;;  %v5956_v36 = vadd.f32 %v6922_v16, %v5742_v35  ;;  %v6930_v22 = vld [vmem:[%s12323_s3 + $0x168] sm:$0xff] }
 0x320   :  { %6960 = vst.msk [vmem:[%s12323_s3 + $0x138] sm:$0xff] %vm19_vm2, %v5958_v29  ;;  %3029 = vst.msk [vmem:[%s12323_s3 + $0x8] sm:$0xff] %vm19_vm2, %v2992_v34 }
 0x321   :  { %6958 = vst.msk [vmem:[%s12323_s3 + $0x128] sm:$0xff] %vm19_vm2, %v5956_v36 }
 0x322   :  { %v7648_v52 = vpop.f32.mrb[4].mxu0 }
 0x323   :  { %v2997_v8 = vadd.f32 %v7648_v52, %v2961_v37  ;;  %v7990_v18 = vpop.f32.mrb[4].mxu1  ;;  %v2792_v20 = vpop.f32.mrb[5].mxu0 }
 0x324   :  { %v6032_v45 = vld [vmem:[%s12323_s3 + $0x10] sm:$0xff]  ;;  %v5961_v49 = vadd.f32 %v7990_v18, %v6927_v38  ;;  %v2995_v50 = vadd.f32 %v2959_v39, %v2792_v20  ;;  %v5755_v51 = vpop.f32.mrb[5].mxu1  ;;  %v7649_v4 = vpop.f32.mrb[6].mxu0 }
 0x325   :  { %v6111_v10 = vadd.f32 %v11304_v48, %v6032_v45  ;;  %v6068_v11 = vld [vmem:[%s12323_s3 + $0x130] sm:$0xff]  ;;  %v6030_v24 = vld [vmem:[%s12323_s3] sm:$0xff]  ;;  %3034 = vst.msk [vmem:[%s12323_s3 + $0x30] sm:$0xff] %vm19_vm2, %v2997_v8  ;;  %v5959_v25 = vadd.f32 %v6925_v55, %v5755_v51  ;;  %v2998_v26 = vadd.f32 %v7649_v4, %v2962_v0  ;;  %v7991_v27 = vpop.f32.mrb[6].mxu1  ;;  %v2795_v40 = vpop.f32.mrb[7].mxu0 }
 0x326   :  { %v6147_v41 = vadd.f32 %v11304_v48, %v6068_v11  ;;  %v6109_v46 = vadd.f32 %v11304_v48, %v6030_v24  ;;  %v6066_v47 = vld [vmem:[%s12323_s3 + $0x120] sm:$0xff]  ;;  %v6033_v57 = vld [vmem:[%s12323_s3 + $0x18] sm:$0xff]  ;;  %6963 = vst.msk [vmem:[%s12323_s3 + $0x150] sm:$0xff] %vm19_vm2, %v5961_v49  ;;  %3032 = vst.msk [vmem:[%s12323_s3 + $0x20] sm:$0xff] %vm19_vm2, %v2995_v50  ;;  %v5962_v59 = vadd.f32 %v7991_v27, %v6928_v30  ;;  %v5758_v6 = vpop.f32.mrb[7].mxu1 }
 0x327   :  { %v2996_v61 = vadd.f32 %v2960_v31, %v2795_v40  ;;  %6183 = vst.msk [vmem:[%s12323_s3 + $0x10] sm:$0xff] %vm19_vm2, %v6111_v10  ;;  %v6145_v7 = vadd.f32 %v11304_v48, %v6066_v47  ;;  %v6112_v9 = vadd.f32 %v11304_v48, %v6033_v57  ;;  %v6069_v19 = vld [vmem:[%s12323_s3 + $0x138] sm:$0xff]  ;;  %v6031_v21 = vld [vmem:[%s12323_s3 + $0x8] sm:$0xff]  ;;  %6961 = vst.msk [vmem:[%s12323_s3 + $0x140] sm:$0xff] %vm19_vm2, %v5959_v25 }
 0x328   :  { %3035 = vst.msk [vmem:[%s12323_s3 + $0x38] sm:$0xff] %vm19_vm2, %v2998_v26  ;;  %v5960_v58 = vadd.f32 %v6926_v5, %v5758_v6  ;;  %6219 = vst.msk [vmem:[%s12323_s3 + $0x130] sm:$0xff] %vm19_vm2, %v6147_v41  ;;  %v6148_v14 = vadd.f32 %v11304_v48, %v6069_v19  ;;  %v6110_v32 = vadd.f32 %v11304_v48, %v6031_v21  ;;  %v6067_v33 = vld [vmem:[%s12323_s3 + $0x128] sm:$0xff]  ;;  %v2969_v5 = vld [vmem:[%s12323_s3 + $0x70] sm:$0xff] }
 0x329   :  { %6181 = vst.msk [vmem:[%s12323_s3] sm:$0xff] %vm19_vm2, %v6109_v46  ;;  %6964 = vst.msk [vmem:[%s12323_s3 + $0x158] sm:$0xff] %vm19_vm2, %v5962_v59  ;;  %v6146_v43 = vadd.f32 %v11304_v48, %v6067_v33  ;;  %v6935_v11 = vld [vmem:[%s12323_s3 + $0x190] sm:$0xff]  ;;  %v2967_v24 = vld [vmem:[%s12323_s3 + $0x60] sm:$0xff] }
 0x32a   :  { %3033 = vst.msk [vmem:[%s12323_s3 + $0x28] sm:$0xff] %vm19_vm2, %v2996_v61  ;;  %6217 = vst.msk [vmem:[%s12323_s3 + $0x120] sm:$0xff] %vm19_vm2, %v6145_v7  ;;  %v7652_v54 = vpop.f32.mrb[8].mxu0  ;;  %v6933_v26 = vld [vmem:[%s12323_s3 + $0x180] sm:$0xff]  ;;  %v2970_v27 = vld [vmem:[%s12323_s3 + $0x78] sm:$0xff] }
 0x32b   :  { %6184 = vst.msk [vmem:[%s12323_s3 + $0x18] sm:$0xff] %vm19_vm2, %v6112_v9  ;;  %6962 = vst.msk [vmem:[%s12323_s3 + $0x148] sm:$0xff] %vm19_vm2, %v5960_v58  ;;  %v3001_v13 = vadd.f32 %v7652_v54, %v2965_v42  ;;  %v7994_v1 = vpop.f32.mrb[8].mxu1  ;;  %v2808_v2 = vpop.f32.mrb[9].mxu0  ;;  %v6936_v47 = vld [vmem:[%s12323_s3 + $0x198] sm:$0xff]  ;;  %v2968_v57 = vld [vmem:[%s12323_s3 + $0x68] sm:$0xff] }
 0x32c   :  { %6220 = vst.msk [vmem:[%s12323_s3 + $0x138] sm:$0xff] %vm19_vm2, %v6148_v14  ;;  %6182 = vst.msk [vmem:[%s12323_s3 + $0x8] sm:$0xff] %vm19_vm2, %v6110_v32  ;;  %v6036_v62 = vld [vmem:[%s12323_s3 + $0x30] sm:$0xff]  ;;  %v5965_v63 = vadd.f32 %v7994_v1, %v6931_v44  ;;  %v2999_v15 = vadd.f32 %v2963_v53, %v2808_v2  ;;  %v5771_v16 = vpop.f32.mrb[9].mxu1  ;;  %v7653_v17 = vpop.f32.mrb[10].mxu0  ;;  %v6934_v19 = vld [vmem:[%s12323_s3 + $0x188] sm:$0xff] }
 0x32d   :  { %6218 = vst.msk [vmem:[%s12323_s3 + $0x128] sm:$0xff] %vm19_vm2, %v6146_v43  ;;  %v6115_v23 = vadd.f32 %v11304_v48, %v6036_v62  ;;  %v6072_v28 = vld [vmem:[%s12323_s3 + $0x150] sm:$0xff]  ;;  %v6034_v29 = vld [vmem:[%s12323_s3 + $0x20] sm:$0xff]  ;;  %3038 = vst.msk [vmem:[%s12323_s3 + $0x50] sm:$0xff] %vm19_vm2, %v3001_v13  ;;  %v5963_v34 = vadd.f32 %v6929_v56, %v5771_v16  ;;  %v3002_v35 = vadd.f32 %v7653_v17, %v2966_v60  ;;  %v7995_v36 = vpop.f32.mrb[10].mxu1  ;;  %v2811_v37 = vpop.f32.mrb[11].mxu0 }
 0x32e   :  { %v6151_v38 = vadd.f32 %v11304_v48, %v6072_v28  ;;  %v6113_v39 = vadd.f32 %v11304_v48, %v6034_v29  ;;  %v6070_v52 = vld [vmem:[%s12323_s3 + $0x140] sm:$0xff]  ;;  %6967 = vst.msk [vmem:[%s12323_s3 + $0x170] sm:$0xff] %vm19_vm2, %v5965_v63  ;;  %3036 = vst.msk [vmem:[%s12323_s3 + $0x40] sm:$0xff] %vm19_vm2, %v2999_v15  ;;  %v5966_v0 = vadd.f32 %v7995_v36, %v6932_v3  ;;  %v5774_v18 = vpop.f32.mrb[11].mxu1  ;;  %v6939_v28 = vld [vmem:[%s12323_s3 + $0x1b0] sm:$0xff] }
 0x32f   :  { %v6037_v55 = vld [vmem:[%s12323_s3 + $0x38] sm:$0xff]  ;;  %v3000_v8 = vadd.f32 %v2964_v12, %v2811_v37  ;;  %6187 = vst.msk [vmem:[%s12323_s3 + $0x30] sm:$0xff] %vm19_vm2, %v6115_v23  ;;  %v6149_v20 = vadd.f32 %v11304_v48, %v6070_v52  ;;  %6965 = vst.msk [vmem:[%s12323_s3 + $0x160] sm:$0xff] %vm19_vm2, %v5963_v34  ;;  %v5964_v49 = vadd.f32 %v6930_v22, %v5774_v18  ;;  %v2973_v22 = vld [vmem:[%s12323_s3 + $0x90] sm:$0xff] }
 0x330   :  { %v6116_v30 = vadd.f32 %v11304_v48, %v6037_v55  ;;  %v6073_v31 = vld [vmem:[%s12323_s3 + $0x158] sm:$0xff]  ;;  %3039 = vst.msk [vmem:[%s12323_s3 + $0x58] sm:$0xff] %vm19_vm2, %v3002_v35  ;;  %6223 = vst.msk [vmem:[%s12323_s3 + $0x150] sm:$0xff] %vm19_vm2, %v6151_v38  ;;  %v2971_v29 = vld [vmem:[%s12323_s3 + $0x80] sm:$0xff] }
 0x331   :  { %v6035_v45 = vld [vmem:[%s12323_s3 + $0x28] sm:$0xff]  ;;  %6185 = vst.msk [vmem:[%s12323_s3 + $0x20] sm:$0xff] %vm19_vm2, %v6113_v39  ;;  %v6152_v50 = vadd.f32 %v11304_v48, %v6073_v31  ;;  %6968 = vst.msk [vmem:[%s12323_s3 + $0x178] sm:$0xff] %vm19_vm2, %v5966_v0  ;;  %v6937_v35 = vld [vmem:[%s12323_s3 + $0x1a0] sm:$0xff] }
 0x332   :  { %v6114_v51 = vadd.f32 %v11304_v48, %v6035_v45  ;;  %v6071_v4 = vld [vmem:[%s12323_s3 + $0x148] sm:$0xff]  ;;  %3037 = vst.msk [vmem:[%s12323_s3 + $0x48] sm:$0xff] %vm19_vm2, %v3000_v8  ;;  %6221 = vst.msk [vmem:[%s12323_s3 + $0x140] sm:$0xff] %vm19_vm2, %v6149_v20  ;;  %v7656_v25 = vpop.f32.mrb[12].mxu0  ;;  %v2974_v36 = vld [vmem:[%s12323_s3 + $0x98] sm:$0xff] }
 0x333   :  { %6188 = vst.msk [vmem:[%s12323_s3 + $0x38] sm:$0xff] %vm19_vm2, %v6116_v30  ;;  %v6150_v10 = vadd.f32 %v11304_v48, %v6071_v4  ;;  %6966 = vst.msk [vmem:[%s12323_s3 + $0x168] sm:$0xff] %vm19_vm2, %v5964_v49  ;;  %v3005_v40 = vadd.f32 %v7656_v25, %v2969_v5  ;;  %v7998_v41 = vpop.f32.mrb[12].mxu1  ;;  %v2824_v46 = vpop.f32.mrb[13].mxu0  ;;  %v6940_v52 = vld [vmem:[%s12323_s3 + $0x1b8] sm:$0xff]  ;;  %v2972_v55 = vld [vmem:[%s12323_s3 + $0x88] sm:$0xff] }
 0x334   :  { %6224 = vst.msk [vmem:[%s12323_s3 + $0x158] sm:$0xff] %vm19_vm2, %v6152_v50  ;;  %6186 = vst.msk [vmem:[%s12323_s3 + $0x28] sm:$0xff] %vm19_vm2, %v6114_v51  ;;  %v6040_v59 = vld [vmem:[%s12323_s3 + $0x50] sm:$0xff]  ;;  %v5969_v61 = vadd.f32 %v7998_v41, %v6935_v11  ;;  %v3003_v6 = vadd.f32 %v2967_v24, %v2824_v46  ;;  %v5787_v7 = vpop.f32.mrb[13].mxu1  ;;  %v7657_v9 = vpop.f32.mrb[14].mxu0  ;;  %v6938_v31 = vld [vmem:[%s12323_s3 + $0x1a8] sm:$0xff] }
 0x335   :  { %6222 = vst.msk [vmem:[%s12323_s3 + $0x148] sm:$0xff] %vm19_vm2, %v6150_v10  ;;  %v6119_v21 = vadd.f32 %v11304_v48, %v6040_v59  ;;  %v6076_v58 = vld [vmem:[%s12323_s3 + $0x170] sm:$0xff]  ;;  %v6038_v14 = vld [vmem:[%s12323_s3 + $0x40] sm:$0xff]  ;;  %3042 = vst.msk [vmem:[%s12323_s3 + $0x70] sm:$0xff] %vm19_vm2, %v3005_v40  ;;  %v5967_v32 = vadd.f32 %v6933_v26, %v5787_v7  ;;  %v3006_v33 = vadd.f32 %v7657_v9, %v2970_v27  ;;  %v7999_v42 = vpop.f32.mrb[14].mxu1  ;;  %v2827_v43 = vpop.f32.mrb[15].mxu0 }
 0x336   :  { %v6155_v44 = vadd.f32 %v11304_v48, %v6076_v58  ;;  %v6117_v53 = vadd.f32 %v11304_v48, %v6038_v14  ;;  %v6074_v54 = vld [vmem:[%s12323_s3 + $0x160] sm:$0xff]  ;;  %6971 = vst.msk [vmem:[%s12323_s3 + $0x190] sm:$0xff] %vm19_vm2, %v5969_v61  ;;  %3040 = vst.msk [vmem:[%s12323_s3 + $0x60] sm:$0xff] %vm19_vm2, %v3003_v6  ;;  %v5970_v60 = vadd.f32 %v7999_v42, %v6936_v47  ;;  %v5790_v1 = vpop.f32.mrb[15].mxu1  ;;  %v6943_v58 = vld [vmem:[%s12323_s3 + $0x1d0] sm:$0xff] }
 0x337   :  { %v6041_v56 = vld [vmem:[%s12323_s3 + $0x58] sm:$0xff]  ;;  %v3004_v13 = vadd.f32 %v2968_v57, %v2827_v43  ;;  %6191 = vst.msk [vmem:[%s12323_s3 + $0x50] sm:$0xff] %vm19_vm2, %v6119_v21  ;;  %v6153_v2 = vadd.f32 %v11304_v48, %v6074_v54  ;;  %6969 = vst.msk [vmem:[%s12323_s3 + $0x180] sm:$0xff] %vm19_vm2, %v5967_v32  ;;  %v5968_v63 = vadd.f32 %v6934_v19, %v5790_v1  ;;  %v2977_v19 = vld [vmem:[%s12323_s3 + $0xb0] sm:$0xff] }
 0x338   :  { %v6120_v3 = vadd.f32 %v11304_v48, %v6041_v56  ;;  %v6077_v12 = vld [vmem:[%s12323_s3 + $0x178] sm:$0xff]  ;;  %3043 = vst.msk [vmem:[%s12323_s3 + $0x78] sm:$0xff] %vm19_vm2, %v3006_v33  ;;  %6227 = vst.msk [vmem:[%s12323_s3 + $0x170] sm:$0xff] %vm19_vm2, %v6155_v44  ;;  %v2975_v14 = vld [vmem:[%s12323_s3 + $0xa0] sm:$0xff] }
 0x339   :  { %v6039_v62 = vld [vmem:[%s12323_s3 + $0x48] sm:$0xff]  ;;  %6189 = vst.msk [vmem:[%s12323_s3 + $0x40] sm:$0xff] %vm19_vm2, %v6117_v53  ;;  %v6156_v15 = vadd.f32 %v11304_v48, %v6077_v12  ;;  %6972 = vst.msk [vmem:[%s12323_s3 + $0x198] sm:$0xff] %vm19_vm2, %v5970_v60  ;;  %v6941_v33 = vld [vmem:[%s12323_s3 + $0x1c0] sm:$0xff] }
 0x33a   :  { %v6118_v16 = vadd.f32 %v11304_v48, %v6039_v62  ;;  %v6075_v17 = vld [vmem:[%s12323_s3 + $0x168] sm:$0xff]  ;;  %3041 = vst.msk [vmem:[%s12323_s3 + $0x68] sm:$0xff] %vm19_vm2, %v3004_v13  ;;  %6225 = vst.msk [vmem:[%s12323_s3 + $0x160] sm:$0xff] %vm19_vm2, %v6153_v2  ;;  %v7660_v34 = vpop.f32.mrb[16].mxu0  ;;  %v2978_v42 = vld [vmem:[%s12323_s3 + $0xb8] sm:$0xff] }
 0x33b   :  { %6192 = vst.msk [vmem:[%s12323_s3 + $0x58] sm:$0xff] %vm19_vm2, %v6120_v3  ;;  %v6154_v23 = vadd.f32 %v11304_v48, %v6075_v17  ;;  %6970 = vst.msk [vmem:[%s12323_s3 + $0x188] sm:$0xff] %vm19_vm2, %v5968_v63  ;;  %v3009_v37 = vadd.f32 %v7660_v34, %v2973_v22  ;;  %v8002_v38 = vpop.f32.mrb[16].mxu1  ;;  %v2840_v39 = vpop.f32.mrb[17].mxu0  ;;  %v6944_v54 = vld [vmem:[%s12323_s3 + $0x1d8] sm:$0xff]  ;;  %v2976_v56 = vld [vmem:[%s12323_s3 + $0xa8] sm:$0xff] }
 0x33c   :  { %6228 = vst.msk [vmem:[%s12323_s3 + $0x178] sm:$0xff] %vm19_vm2, %v6156_v15  ;;  %6190 = vst.msk [vmem:[%s12323_s3 + $0x48] sm:$0xff] %vm19_vm2, %v6118_v16  ;;  %v6044_v0 = vld [vmem:[%s12323_s3 + $0x70] sm:$0xff]  ;;  %v5973_v8 = vadd.f32 %v8002_v38, %v6939_v28  ;;  %v3007_v18 = vadd.f32 %v2971_v29, %v2840_v39  ;;  %v5803_v20 = vpop.f32.mrb[17].mxu1  ;;  %v7661_v30 = vpop.f32.mrb[18].mxu0  ;;  %v6942_v12 = vld [vmem:[%s12323_s3 + $0x1c8] sm:$0xff] }
 0x33d   :  { %6226 = vst.msk [vmem:[%s12323_s3 + $0x168] sm:$0xff] %vm19_vm2, %v6154_v23  ;;  %v6123_v45 = vadd.f32 %v11304_v48, %v6044_v0  ;;  %v6080_v49 = vld [vmem:[%s12323_s3 + $0x190] sm:$0xff]  ;;  %v6042_v50 = vld [vmem:[%s12323_s3 + $0x60] sm:$0xff]  ;;  %3046 = vst.msk [vmem:[%s12323_s3 + $0x90] sm:$0xff] %vm19_vm2, %v3009_v37  ;;  %v5971_v51 = vadd.f32 %v6937_v35, %v5803_v20  ;;  %v3010_v4 = vadd.f32 %v7661_v30, %v2974_v36  ;;  %v8003_v5 = vpop.f32.mrb[18].mxu1  ;;  %v2843_v10 = vpop.f32.mrb[19].mxu0 }
 0x33e   :  { %v6159_v11 = vadd.f32 %v11304_v48, %v6080_v49  ;;  %v6121_v24 = vadd.f32 %v11304_v48, %v6042_v50  ;;  %v6078_v25 = vld [vmem:[%s12323_s3 + $0x180] sm:$0xff]  ;;  %6975 = vst.msk [vmem:[%s12323_s3 + $0x1b0] sm:$0xff] %vm19_vm2, %v5973_v8  ;;  %3044 = vst.msk [vmem:[%s12323_s3 + $0x80] sm:$0xff] %vm19_vm2, %v3007_v18  ;;  %v5974_v27 = vadd.f32 %v8003_v5, %v6940_v52  ;;  %v5806_v41 = vpop.f32.mrb[19].mxu1  ;;  %v6947_v49 = vld [vmem:[%s12323_s3 + $0x1f0] sm:$0xff] }
 0x33f   :  { %v6045_v26 = vld [vmem:[%s12323_s3 + $0x78] sm:$0xff]  ;;  %v3008_v40 = vadd.f32 %v2972_v55, %v2843_v10  ;;  %6195 = vst.msk [vmem:[%s12323_s3 + $0x70] sm:$0xff] %vm19_vm2, %v6123_v45  ;;  %v6157_v46 = vadd.f32 %v11304_v48, %v6078_v25  ;;  %6973 = vst.msk [vmem:[%s12323_s3 + $0x1a0] sm:$0xff] %vm19_vm2, %v5971_v51  ;;  %v5972_v61 = vadd.f32 %v6938_v31, %v5806_v41  ;;  %v2981_v31 = vld [vmem:[%s12323_s3 + $0xd0] sm:$0xff] }
 0x340   :  { %v6124_v47 = vadd.f32 %v11304_v48, %v6045_v26  ;;  %v6081_v57 = vld [vmem:[%s12323_s3 + $0x198] sm:$0xff]  ;;  %3047 = vst.msk [vmem:[%s12323_s3 + $0x98] sm:$0xff] %vm19_vm2, %v3010_v4  ;;  %6231 = vst.msk [vmem:[%s12323_s3 + $0x190] sm:$0xff] %vm19_vm2, %v6159_v11  ;;  %v2979_v50 = vld [vmem:[%s12323_s3 + $0xc0] sm:$0xff] }
 0x341   :  { %v6043_v59 = vld [vmem:[%s12323_s3 + $0x68] sm:$0xff]  ;;  %6193 = vst.msk [vmem:[%s12323_s3 + $0x60] sm:$0xff] %vm19_vm2, %v6121_v24  ;;  %v6160_v6 = vadd.f32 %v11304_v48, %v6081_v57  ;;  %6976 = vst.msk [vmem:[%s12323_s3 + $0x1b8] sm:$0xff] %vm19_vm2, %v5974_v27  ;;  %v6945_v4 = vld [vmem:[%s12323_s3 + $0x1e0] sm:$0xff] }
 0x342   :  { %v6122_v7 = vadd.f32 %v11304_v48, %v6043_v59  ;;  %v6079_v9 = vld [vmem:[%s12323_s3 + $0x188] sm:$0xff]  ;;  %3045 = vst.msk [vmem:[%s12323_s3 + $0x88] sm:$0xff] %vm19_vm2, %v3008_v40  ;;  %6229 = vst.msk [vmem:[%s12323_s3 + $0x180] sm:$0xff] %vm19_vm2, %v6157_v46  ;;  %v7664_v32 = vpop.f32.mrb[20].mxu0  ;;  %v2982_v5 = vld [vmem:[%s12323_s3 + $0xd8] sm:$0xff] }
 0x343   :  { %6196 = vst.msk [vmem:[%s12323_s3 + $0x78] sm:$0xff] %vm19_vm2, %v6124_v47  ;;  %v6158_v21 = vadd.f32 %v11304_v48, %v6079_v9  ;;  %6974 = vst.msk [vmem:[%s12323_s3 + $0x1a8] sm:$0xff] %vm19_vm2, %v5972_v61  ;;  %v3013_v43 = vadd.f32 %v7664_v32, %v2977_v19  ;;  %v8006_v44 = vpop.f32.mrb[20].mxu1  ;;  %v2856_v53 = vpop.f32.mrb[21].mxu0  ;;  %v6948_v25 = vld [vmem:[%s12323_s3 + $0x1f8] sm:$0xff]  ;;  %v2980_v26 = vld [vmem:[%s12323_s3 + $0xc8] sm:$0xff] }
 0x344   :  { %6232 = vst.msk [vmem:[%s12323_s3 + $0x198] sm:$0xff] %vm19_vm2, %v6160_v6  ;;  %6194 = vst.msk [vmem:[%s12323_s3 + $0x68] sm:$0xff] %vm19_vm2, %v6122_v7  ;;  %v6048_v60 = vld [vmem:[%s12323_s3 + $0x90] sm:$0xff]  ;;  %v5977_v13 = vadd.f32 %v8006_v44, %v6943_v58  ;;  %v3011_v1 = vadd.f32 %v2975_v14, %v2856_v53  ;;  %v5819_v2 = vpop.f32.mrb[21].mxu1  ;;  %v7665_v3 = vpop.f32.mrb[22].mxu0  ;;  %v6946_v57 = vld [vmem:[%s12323_s3 + $0x1e8] sm:$0xff] }
 0x345   :  { %6230 = vst.msk [vmem:[%s12323_s3 + $0x188] sm:$0xff] %vm19_vm2, %v6158_v21  ;;  %v6127_v62 = vadd.f32 %v11304_v48, %v6048_v60  ;;  %v6084_v63 = vld [vmem:[%s12323_s3 + $0x1b0] sm:$0xff]  ;;  %v6046_v15 = vld [vmem:[%s12323_s3 + $0x80] sm:$0xff]  ;;  %3050 = vst.msk [vmem:[%s12323_s3 + $0xb0] sm:$0xff] %vm19_vm2, %v3013_v43  ;;  %v5975_v16 = vadd.f32 %v6941_v33, %v5819_v2  ;;  %v3014_v17 = vadd.f32 %v7665_v3, %v2978_v42  ;;  %v8007_v22 = vpop.f32.mrb[22].mxu1  ;;  %v2859_v23 = vpop.f32.mrb[23].mxu0 }
 0x346   :  { %v6163_v28 = vadd.f32 %v11304_v48, %v6084_v63  ;;  %v6125_v29 = vadd.f32 %v11304_v48, %v6046_v15  ;;  %v6082_v34 = vld [vmem:[%s12323_s3 + $0x1a0] sm:$0xff]  ;;  %6979 = vst.msk [vmem:[%s12323_s3 + $0x1d0] sm:$0xff] %vm19_vm2, %v5977_v13  ;;  %3048 = vst.msk [vmem:[%s12323_s3 + $0xa0] sm:$0xff] %vm19_vm2, %v3011_v1  ;;  %v5978_v36 = vadd.f32 %v8007_v22, %v6944_v54  ;;  %v5822_v38 = vpop.f32.mrb[23].mxu1  ;;  %v6951_v63 = vld [vmem:[%s12323_s3 + $0x210] sm:$0xff] }
 0x347   :  { %v6049_v35 = vld [vmem:[%s12323_s3 + $0x98] sm:$0xff]  ;;  %v3012_v37 = vadd.f32 %v2976_v56, %v2859_v23  ;;  %6199 = vst.msk [vmem:[%s12323_s3 + $0x90] sm:$0xff] %vm19_vm2, %v6127_v62  ;;  %v6161_v39 = vadd.f32 %v11304_v48, %v6082_v34  ;;  %6977 = vst.msk [vmem:[%s12323_s3 + $0x1c0] sm:$0xff] %vm19_vm2, %v5975_v16  ;;  %v5976_v8 = vadd.f32 %v6942_v12, %v5822_v38  ;;  %v2985_v12 = vld [vmem:[%s12323_s3 + $0xf0] sm:$0xff] }
 0x348   :  { %v6128_v52 = vadd.f32 %v11304_v48, %v6049_v35  ;;  %v6085_v55 = vld [vmem:[%s12323_s3 + $0x1b8] sm:$0xff]  ;;  %3051 = vst.msk [vmem:[%s12323_s3 + $0xb8] sm:$0xff] %vm19_vm2, %v3014_v17  ;;  %6235 = vst.msk [vmem:[%s12323_s3 + $0x1b0] sm:$0xff] %vm19_vm2, %v6163_v28  ;;  %v2983_v15 = vld [vmem:[%s12323_s3 + $0xe0] sm:$0xff] }
 0x349   :  { %v6047_v0 = vld [vmem:[%s12323_s3 + $0x88] sm:$0xff]  ;;  %6197 = vst.msk [vmem:[%s12323_s3 + $0x80] sm:$0xff] %vm19_vm2, %v6125_v29  ;;  %v6164_v18 = vadd.f32 %v11304_v48, %v6085_v55  ;;  %6980 = vst.msk [vmem:[%s12323_s3 + $0x1d8] sm:$0xff] %vm19_vm2, %v5978_v36  ;;  %v6949_v17 = vld [vmem:[%s12323_s3 + $0x200] sm:$0xff] }
 0x34a   :  { %v6126_v20 = vadd.f32 %v11304_v48, %v6047_v0  ;;  %v6083_v30 = vld [vmem:[%s12323_s3 + $0x1a8] sm:$0xff]  ;;  %3049 = vst.msk [vmem:[%s12323_s3 + $0xa8] sm:$0xff] %vm19_vm2, %v3012_v37  ;;  %6233 = vst.msk [vmem:[%s12323_s3 + $0x1a0] sm:$0xff] %vm19_vm2, %v6161_v39  ;;  %v7668_v51 = vpop.f32.mrb[24].mxu0  ;;  %v2986_v22 = vld [vmem:[%s12323_s3 + $0xf8] sm:$0xff] }
 0x34b   :  { %6200 = vst.msk [vmem:[%s12323_s3 + $0x98] sm:$0xff] %vm19_vm2, %v6128_v52  ;;  %v6162_v45 = vadd.f32 %v11304_v48, %v6083_v30  ;;  %6978 = vst.msk [vmem:[%s12323_s3 + $0x1c8] sm:$0xff] %vm19_vm2, %v5976_v8  ;;  %v3017_v10 = vadd.f32 %v7668_v51, %v2981_v31  ;;  %v8010_v11 = vpop.f32.mrb[24].mxu1  ;;  %v2872_v24 = vpop.f32.mrb[25].mxu0  ;;  %v6952_v34 = vld [vmem:[%s12323_s3 + $0x218] sm:$0xff]  ;;  %v2984_v35 = vld [vmem:[%s12323_s3 + $0xe8] sm:$0xff] }
 0x34c   :  { %6236 = vst.msk [vmem:[%s12323_s3 + $0x1b8] sm:$0xff] %vm19_vm2, %v6164_v18  ;;  %6198 = vst.msk [vmem:[%s12323_s3 + $0x88] sm:$0xff] %vm19_vm2, %v6126_v20  ;;  %v6052_v27 = vld [vmem:[%s12323_s3 + $0xb0] sm:$0xff]  ;;  %v5981_v40 = vadd.f32 %v8010_v11, %v6947_v49  ;;  %v3015_v41 = vadd.f32 %v2979_v50, %v2872_v24  ;;  %v5835_v46 = vpop.f32.mrb[25].mxu1  ;;  %v7669_v47 = vpop.f32.mrb[26].mxu0  ;;  %v6950_v55 = vld [vmem:[%s12323_s3 + $0x208] sm:$0xff] }
 0x34d   :  { %6234 = vst.msk [vmem:[%s12323_s3 + $0x1a8] sm:$0xff] %vm19_vm2, %v6162_v45  ;;  %v6131_v59 = vadd.f32 %v11304_v48, %v6052_v27  ;;  %v6088_v61 = vld [vmem:[%s12323_s3 + $0x1d0] sm:$0xff]  ;;  %v6050_v6 = vld [vmem:[%s12323_s3 + $0xa0] sm:$0xff]  ;;  %3054 = vst.msk [vmem:[%s12323_s3 + $0xd0] sm:$0xff] %vm19_vm2, %v3017_v10  ;;  %v5979_v7 = vadd.f32 %v6945_v4, %v5835_v46  ;;  %v3018_v9 = vadd.f32 %v7669_v47, %v2982_v5  ;;  %v8011_v19 = vpop.f32.mrb[26].mxu1  ;;  %v2875_v21 = vpop.f32.mrb[27].mxu0 }
 0x34e   :  { %v6167_v58 = vadd.f32 %v11304_v48, %v6088_v61  ;;  %v6129_v14 = vadd.f32 %v11304_v48, %v6050_v6  ;;  %v6086_v32 = vld [vmem:[%s12323_s3 + $0x1c0] sm:$0xff]  ;;  %6983 = vst.msk [vmem:[%s12323_s3 + $0x1f0] sm:$0xff] %vm19_vm2, %v5981_v40  ;;  %3052 = vst.msk [vmem:[%s12323_s3 + $0xc0] sm:$0xff] %vm19_vm2, %v3015_v41  ;;  %v5982_v42 = vadd.f32 %v8011_v19, %v6948_v25  ;;  %v5838_v44 = vpop.f32.mrb[27].mxu1  ;;  %v6955_v61 = vld [vmem:[%s12323_s3 + $0x230] sm:$0xff] }
 0x34f   :  { %v6053_v33 = vld [vmem:[%s12323_s3 + $0xb8] sm:$0xff]  ;;  %v3016_v43 = vadd.f32 %v2980_v26, %v2875_v21  ;;  %6203 = vst.msk [vmem:[%s12323_s3 + $0xb0] sm:$0xff] %vm19_vm2, %v6131_v59  ;;  %v6165_v53 = vadd.f32 %v11304_v48, %v6086_v32  ;;  %6981 = vst.msk [vmem:[%s12323_s3 + $0x1e0] sm:$0xff] %vm19_vm2, %v5979_v7  ;;  %v5980_v13 = vadd.f32 %v6946_v57, %v5838_v44  ;;  %v2989_v57 = vld [vmem:[%s12323_s3 + $0x110] sm:$0xff] }
 0x350   :  { %v6132_v54 = vadd.f32 %v11304_v48, %v6053_v33  ;;  %v6089_v56 = vld [vmem:[%s12323_s3 + $0x1d8] sm:$0xff]  ;;  %3055 = vst.msk [vmem:[%s12323_s3 + $0xd8] sm:$0xff] %vm19_vm2, %v3018_v9  ;;  %6239 = vst.msk [vmem:[%s12323_s3 + $0x1d0] sm:$0xff] %vm19_vm2, %v6167_v58  ;;  %v2987_v6 = vld [vmem:[%s12323_s3 + $0x100] sm:$0xff] }
 0x351   :  { %v6051_v60 = vld [vmem:[%s12323_s3 + $0xa8] sm:$0xff]  ;;  %6201 = vst.msk [vmem:[%s12323_s3 + $0xa0] sm:$0xff] %vm19_vm2, %v6129_v14  ;;  %v6168_v1 = vadd.f32 %v11304_v48, %v6089_v56  ;;  %6984 = vst.msk [vmem:[%s12323_s3 + $0x1f8] sm:$0xff] %vm19_vm2, %v5982_v42  ;;  %v6953_v9 = vld [vmem:[%s12323_s3 + $0x220] sm:$0xff] }
 0x352   :  { %v6130_v2 = vadd.f32 %v11304_v48, %v6051_v60  ;;  %v6087_v3 = vld [vmem:[%s12323_s3 + $0x1c8] sm:$0xff]  ;;  %3053 = vst.msk [vmem:[%s12323_s3 + $0xc8] sm:$0xff] %vm19_vm2, %v3016_v43  ;;  %6237 = vst.msk [vmem:[%s12323_s3 + $0x1c0] sm:$0xff] %vm19_vm2, %v6165_v53  ;;  %v7672_v16 = vpop.f32.mrb[28].mxu0  ;;  %v2990_v19 = vld [vmem:[%s12323_s3 + $0x118] sm:$0xff] }
 0x353   :  { %6204 = vst.msk [vmem:[%s12323_s3 + $0xb8] sm:$0xff] %vm19_vm2, %v6132_v54  ;;  %v6166_v62 = vadd.f32 %v11304_v48, %v6087_v3  ;;  %6982 = vst.msk [vmem:[%s12323_s3 + $0x1e8] sm:$0xff] %vm19_vm2, %v5980_v13  ;;  %v3021_v23 = vadd.f32 %v7672_v16, %v2985_v12  ;;  %v8014_v28 = vpop.f32.mrb[28].mxu1  ;;  %v2888_v29 = vpop.f32.mrb[29].mxu0  ;;  %v6956_v32 = vld [vmem:[%s12323_s3 + $0x238] sm:$0xff]  ;;  %v2988_v33 = vld [vmem:[%s12323_s3 + $0x108] sm:$0xff] }
 0x354   :  { %6240 = vst.msk [vmem:[%s12323_s3 + $0x1d8] sm:$0xff] %vm19_vm2, %v6168_v1  ;;  %6202 = vst.msk [vmem:[%s12323_s3 + $0xa8] sm:$0xff] %vm19_vm2, %v6130_v2  ;;  %v6056_v36 = vld [vmem:[%s12323_s3 + $0xd0] sm:$0xff]  ;;  %v5985_v37 = vadd.f32 %v8014_v28, %v6951_v63  ;;  %v3019_v38 = vadd.f32 %v2983_v15, %v2888_v29  ;;  %v5851_v39 = vpop.f32.mrb[29].mxu1  ;;  %v7673_v52 = vpop.f32.mrb[30].mxu0  ;;  %v6954_v56 = vld [vmem:[%s12323_s3 + $0x228] sm:$0xff] }
 0x355   :  { %6238 = vst.msk [vmem:[%s12323_s3 + $0x1c8] sm:$0xff] %vm19_vm2, %v6166_v62  ;;  %v6135_v0 = vadd.f32 %v11304_v48, %v6056_v36  ;;  %v6092_v8 = vld [vmem:[%s12323_s3 + $0x1f0] sm:$0xff]  ;;  %v6054_v18 = vld [vmem:[%s12323_s3 + $0xc0] sm:$0xff]  ;;  %3058 = vst.msk [vmem:[%s12323_s3 + $0xf0] sm:$0xff] %vm19_vm2, %v3021_v23  ;;  %v5983_v20 = vadd.f32 %v6949_v17, %v5851_v39  ;;  %v3022_v30 = vadd.f32 %v7673_v52, %v2986_v22  ;;  %v8015_v31 = vpop.f32.mrb[30].mxu1  ;;  %v2891_v45 = vpop.f32.mrb[31].mxu0 }
 0x356   :  { %v6171_v49 = vadd.f32 %v11304_v48, %v6092_v8  ;;  %v6133_v50 = vadd.f32 %v11304_v48, %v6054_v18  ;;  %v6090_v51 = vld [vmem:[%s12323_s3 + $0x1e0] sm:$0xff]  ;;  %6987 = vst.msk [vmem:[%s12323_s3 + $0x210] sm:$0xff] %vm19_vm2, %v5985_v37  ;;  %3056 = vst.msk [vmem:[%s12323_s3 + $0xe0] sm:$0xff] %vm19_vm2, %v3019_v38  ;;  %v5986_v5 = vadd.f32 %v8015_v31, %v6952_v34  ;;  %v5854_v11 = vpop.f32.mrb[31].mxu1 }
 0x357   :  { %v6057_v4 = vld [vmem:[%s12323_s3 + $0xd8] sm:$0xff]  ;;  %v3020_v10 = vadd.f32 %v2984_v35, %v2891_v45  ;;  %6207 = vst.msk [vmem:[%s12323_s3 + $0xd0] sm:$0xff] %vm19_vm2, %v6135_v0  ;;  %v6169_v24 = vadd.f32 %v11304_v48, %v6090_v51  ;;  %6985 = vst.msk [vmem:[%s12323_s3 + $0x200] sm:$0xff] %vm19_vm2, %v5983_v20  ;;  %v5984_v40 = vadd.f32 %v6950_v55, %v5854_v11 }
 0x358   :  { %v6136_v25 = vadd.f32 %v11304_v48, %v6057_v4  ;;  %v6093_v26 = vld [vmem:[%s12323_s3 + $0x1f8] sm:$0xff]  ;;  %3059 = vst.msk [vmem:[%s12323_s3 + $0xf8] sm:$0xff] %vm19_vm2, %v3022_v30  ;;  %6243 = vst.msk [vmem:[%s12323_s3 + $0x1f0] sm:$0xff] %vm19_vm2, %v6171_v49 }
 0x359   :  { %v6055_v27 = vld [vmem:[%s12323_s3 + $0xc8] sm:$0xff]  ;;  %6205 = vst.msk [vmem:[%s12323_s3 + $0xc0] sm:$0xff] %vm19_vm2, %v6133_v50  ;;  %v6172_v41 = vadd.f32 %v11304_v48, %v6093_v26  ;;  %6988 = vst.msk [vmem:[%s12323_s3 + $0x218] sm:$0xff] %vm19_vm2, %v5986_v5 }
 0x35a   :  { %v6134_v46 = vadd.f32 %v11304_v48, %v6055_v27  ;;  %v6091_v47 = vld [vmem:[%s12323_s3 + $0x1e8] sm:$0xff]  ;;  %3057 = vst.msk [vmem:[%s12323_s3 + $0xe8] sm:$0xff] %vm19_vm2, %v3020_v10  ;;  %6241 = vst.msk [vmem:[%s12323_s3 + $0x1e0] sm:$0xff] %vm19_vm2, %v6169_v24  ;;  %v7676_v7 = vpop.f32.mrb[32].mxu0 }
 0x35b   :  { %6208 = vst.msk [vmem:[%s12323_s3 + $0xd8] sm:$0xff] %vm19_vm2, %v6136_v25  ;;  %v6170_v59 = vadd.f32 %v11304_v48, %v6091_v47  ;;  %6986 = vst.msk [vmem:[%s12323_s3 + $0x208] sm:$0xff] %vm19_vm2, %v5984_v40  ;;  %v3025_v21 = vadd.f32 %v7676_v7, %v2989_v57  ;;  %v8018_v58 = vpop.f32.mrb[32].mxu1  ;;  %v2904_v14 = vpop.f32.mrb[33].mxu0 }
 0x35c   :  { %6244 = vst.msk [vmem:[%s12323_s3 + $0x1f8] sm:$0xff] %vm19_vm2, %v6172_v41  ;;  %6206 = vst.msk [vmem:[%s12323_s3 + $0xc8] sm:$0xff] %vm19_vm2, %v6134_v46  ;;  %v6060_v42 = vld [vmem:[%s12323_s3 + $0xf0] sm:$0xff]  ;;  %v5989_v43 = vadd.f32 %v8018_v58, %v6955_v61  ;;  %v3023_v44 = vadd.f32 %v2987_v6, %v2904_v14  ;;  %v5867_v53 = vpop.f32.mrb[33].mxu1  ;;  %v7677_v54 = vpop.f32.mrb[34].mxu0 }
 0x35d   :  { %6242 = vst.msk [vmem:[%s12323_s3 + $0x1e8] sm:$0xff] %vm19_vm2, %v6170_v59  ;;  %v6139_v60 = vadd.f32 %v11304_v48, %v6060_v42  ;;  %v6096_v13 = vld [vmem:[%s12323_s3 + $0x210] sm:$0xff]  ;;  %v6058_v1 = vld [vmem:[%s12323_s3 + $0xe0] sm:$0xff]  ;;  %3062 = vst.msk [vmem:[%s12323_s3 + $0x110] sm:$0xff] %vm19_vm2, %v3025_v21  ;;  %v5987_v2 = vadd.f32 %v6953_v9, %v5867_v53  ;;  %v3026_v3 = vadd.f32 %v7677_v54, %v2990_v19  ;;  %v8019_v12 = vpop.f32.mrb[34].mxu1  ;;  %v2907_v62 = vpop.f32.mrb[35].mxu0 }
 0x35e   :  { %v6175_v63 = vadd.f32 %v11304_v48, %v6096_v13  ;;  %v6137_v15 = vadd.f32 %v11304_v48, %v6058_v1  ;;  %v6094_v16 = vld [vmem:[%s12323_s3 + $0x200] sm:$0xff]  ;;  %6991 = vst.msk [vmem:[%s12323_s3 + $0x230] sm:$0xff] %vm19_vm2, %v5989_v43  ;;  %3060 = vst.msk [vmem:[%s12323_s3 + $0x100] sm:$0xff] %vm19_vm2, %v3023_v44  ;;  %v5990_v22 = vadd.f32 %v8019_v12, %v6956_v32  ;;  %v5870_v28 = vpop.f32.mrb[35].mxu1 }
 0x35f   :  { %v6061_v17 = vld [vmem:[%s12323_s3 + $0xf8] sm:$0xff]  ;;  %v3024_v23 = vadd.f32 %v2988_v33, %v2907_v62  ;;  %6211 = vst.msk [vmem:[%s12323_s3 + $0xf0] sm:$0xff] %vm19_vm2, %v6139_v60  ;;  %v6173_v29 = vadd.f32 %v11304_v48, %v6094_v16  ;;  %6989 = vst.msk [vmem:[%s12323_s3 + $0x220] sm:$0xff] %vm19_vm2, %v5987_v2  ;;  %v5988_v37 = vadd.f32 %v6954_v56, %v5870_v28 }
 0x360   :  { %v6140_v34 = vadd.f32 %v11304_v48, %v6061_v17  ;;  %v6097_v35 = vld [vmem:[%s12323_s3 + $0x218] sm:$0xff]  ;;  %3063 = vst.msk [vmem:[%s12323_s3 + $0x118] sm:$0xff] %vm19_vm2, %v3026_v3  ;;  %6247 = vst.msk [vmem:[%s12323_s3 + $0x210] sm:$0xff] %vm19_vm2, %v6175_v63 }
 0x361   :  { %v6059_v36 = vld [vmem:[%s12323_s3 + $0xe8] sm:$0xff]  ;;  %6209 = vst.msk [vmem:[%s12323_s3 + $0xe0] sm:$0xff] %vm19_vm2, %v6137_v15  ;;  %v6176_v38 = vadd.f32 %v11304_v48, %v6097_v35  ;;  %6992 = vst.msk [vmem:[%s12323_s3 + $0x238] sm:$0xff] %vm19_vm2, %v5990_v22 }
 0x362   :  { %v6138_v39 = vadd.f32 %v11304_v48, %v6059_v36  ;;  %v6095_v52 = vld [vmem:[%s12323_s3 + $0x208] sm:$0xff]  ;;  %3061 = vst.msk [vmem:[%s12323_s3 + $0x108] sm:$0xff] %vm19_vm2, %v3024_v23  ;;  %6245 = vst.msk [vmem:[%s12323_s3 + $0x200] sm:$0xff] %vm19_vm2, %v6173_v29 }
 0x363   :  { %6212 = vst.msk [vmem:[%s12323_s3 + $0xf8] sm:$0xff] %vm19_vm2, %v6140_v34  ;;  %v6174_v55 = vadd.f32 %v11304_v48, %v6095_v52  ;;  %6990 = vst.msk [vmem:[%s12323_s3 + $0x228] sm:$0xff] %vm19_vm2, %v5988_v37 }
 0x364   :  { %6248 = vst.msk [vmem:[%s12323_s3 + $0x218] sm:$0xff] %vm19_vm2, %v6176_v38  ;;  %6210 = vst.msk [vmem:[%s12323_s3 + $0xe8] sm:$0xff] %vm19_vm2, %v6138_v39  ;;  %v6064_v0 = vld [vmem:[%s12323_s3 + $0x110] sm:$0xff] }
 0x365   :  { %6246 = vst.msk [vmem:[%s12323_s3 + $0x208] sm:$0xff] %vm19_vm2, %v6174_v55  ;;  %v6143_v8 = vadd.f32 %v11304_v48, %v6064_v0  ;;  %v6100_v18 = vld [vmem:[%s12323_s3 + $0x230] sm:$0xff]  ;;  %v6062_v20 = vld [vmem:[%s12323_s3 + $0x100] sm:$0xff] }
 0x366   :  { %v6179_v30 = vadd.f32 %v11304_v48, %v6100_v18  ;;  %v6141_v31 = vadd.f32 %v11304_v48, %v6062_v20  ;;  %v6098_v45 = vld [vmem:[%s12323_s3 + $0x220] sm:$0xff] }
 0x367   :  { %v6065_v49 = vld [vmem:[%s12323_s3 + $0x118] sm:$0xff]  ;;  %6215 = vst.msk [vmem:[%s12323_s3 + $0x110] sm:$0xff] %vm19_vm2, %v6143_v8  ;;  %v6177_v50 = vadd.f32 %v11304_v48, %v6098_v45 }
 0x368   :  { %v6144_v51 = vadd.f32 %v11304_v48, %v6065_v49  ;;  %v6101_v4 = vld [vmem:[%s12323_s3 + $0x238] sm:$0xff]  ;;  %6251 = vst.msk [vmem:[%s12323_s3 + $0x230] sm:$0xff] %vm19_vm2, %v6179_v30  ;;  %6213 = vst.msk [vmem:[%s12323_s3 + $0x100] sm:$0xff] %vm19_vm2, %v6141_v31 }
 0x369   :  { %v6063_v5 = vld [vmem:[%s12323_s3 + $0x108] sm:$0xff]  ;;  %v6180_v10 = vadd.f32 %v11304_v48, %v6101_v4  ;;  %6249 = vst.msk [vmem:[%s12323_s3 + $0x220] sm:$0xff] %vm19_vm2, %v6177_v50 }
 0x36a   :  { %v6142_v11 = vadd.f32 %v11304_v48, %v6063_v5  ;;  %v6099_v24 = vld [vmem:[%s12323_s3 + $0x228] sm:$0xff]  ;;  %6216 = vst.msk [vmem:[%s12323_s3 + $0x118] sm:$0xff] %vm19_vm2, %v6144_v51 }
 0x36b   :  { %v6178_v25 = vadd.f32 %v11304_v48, %v6099_v24  ;;  %6252 = vst.msk [vmem:[%s12323_s3 + $0x238] sm:$0xff] %vm19_vm2, %v6180_v10 }
 0x36c   :  { %6214 = vst.msk [vmem:[%s12323_s3 + $0x108] sm:$0xff] %vm19_vm2, %v6142_v11 }
 0x36d   :  { %6250 = vst.msk [vmem:[%s12323_s3 + $0x228] sm:$0xff] %vm19_vm2, %v6178_v25 }

</bundles_post_ra>
